<compile_context>
chip_gen: v7x
topology: tpu7x:2x2x1
jax: 0.10.0
libtpu: 0.0.40
codegen_flags: <defaults>
</compile_context>

<pallas_src>
import functools

import jax
import jax.numpy as jnp
from jax.experimental import pallas as pl
from jax.experimental.pallas import tpu as pltpu

TM_MAX = 512                  # max rows (N*OH*OW) processed per grid step
LANE = 128                    # lane width; Cout is padded up to this
STEM_OUT = 16
STAGE_CH = (16, 32, 64, 128)
STAGE_BLOCKS = (2, 2, 2, 2)
STAGE_STRIDES = (1, 2, 2, 2)
BN_EPS = 1e-5


def _round_up(x, m):
    return ((x + m - 1) // m) * m


# --------------------------- Pallas kernels ---------------------------------

def _conv_bn_kernel(p_ref, w_ref, b_ref, o_ref, *, relu):
    """Fused im2col-matmul (bf16 in, f32 acc) + bias (+ ReLU)."""
    y = jnp.dot(p_ref[...], w_ref[...], preferred_element_type=jnp.float32)
    y = y + b_ref[...]                      # BN scale already folded into w
    if relu:
        y = jnp.maximum(y, 0.0)
    o_ref[...] = y


def _conv_bn_res_kernel(p_ref, w_ref, b_ref, r_ref, o_ref, *, relu):
    """Conv+BN + precomputed residual (identity shortcut) (+ ReLU)."""
    y = jnp.dot(p_ref[...], w_ref[...], preferred_element_type=jnp.float32)
    y = y + b_ref[...] + r_ref[...]
    if relu:
        y = jnp.maximum(y, 0.0)
    o_ref[...] = y


def _conv_bn_ds_kernel(p_ref, w_ref, b_ref, pd_ref, wd_ref, bd_ref, o_ref, *,
                       relu):
    """Conv2+BN2 fused with the 1x1 downsample conv+BN of the shortcut.

    out = relu( (p @ w + b) + (pd @ wd + bd) ) -- both matmuls on the MXU,
    f32 accumulation, epilogue on the VPU.
    """
    y = jnp.dot(p_ref[...], w_ref[...], preferred_element_type=jnp.float32)
    y = y + b_ref[...]
    r = jnp.dot(pd_ref[...], wd_ref[...], preferred_element_type=jnp.float32)
    r = r + bd_ref[...]
    y = y + r
    if relu:
        y = jnp.maximum(y, 0.0)
    o_ref[...] = y


def _maxpool_kernel(p_ref, o_ref):
    """Max over the 9 window taps: p_ref is (9, TM, Cp), reduce leading axis."""
    o_ref[...] = jnp.max(p_ref[...], axis=0)


# --------------------------- conv / pool wrappers ----------------------------

def _im2col(x, kh, kw, stride, pad, pad_value=0.0):
    """x: [N,H,W,C] -> patches [N*OH*OW, kh*kw*C] (taps outer, channels inner)."""
    n, h, w, c = x.shape
    xp = jnp.pad(x, ((0, 0), (pad, pad), (pad, pad), (0, 0)),
                 constant_values=pad_value)
    oh = (h + 2 * pad - kh) // stride + 1
    ow = (w + 2 * pad - kw) // stride + 1
    cols = []
    for dy in range(kh):
        for dx in range(kw):
            cols.append(xp[:, dy:dy + stride * oh:stride,
                           dx:dx + stride * ow:stride, :])
    patches = jnp.stack(cols, axis=3)                      # [N, OH, OW, kh*kw, C]
    return patches.reshape(n * oh * ow, kh * kw * c), (n, oh, ow)


def _fold_weight(w, scale, kp, coutp):
    """[kh,kw,cin,cout] -> bf16 [kp, coutp] with BN scale folded into columns."""
    kh, kw, cin, cout = w.shape
    wf = w.reshape(kh * kw * cin, cout) * scale.reshape(1, cout)
    return jnp.pad(wf.astype(jnp.bfloat16),
                   ((0, kp - kh * kw * cin), (0, coutp - cout)))


def _pad_bias(bias, coutp):
    cout = bias.shape[0]
    return jnp.pad(bias.reshape(1, cout).astype(jnp.float32),
                   ((0, 0), (0, coutp - cout)))


def conv_bn(x, w, scale, bias, *, stride=1, padding=None, relu=True,
            residual=None, downsample=None):
    """Conv (any kh/kw/stride/pad) + folded BN via Pallas.

    `residual`:   NHWC tensor added before the final ReLU (identity shortcut).
    `downsample`: (x_in, w_ds, scale_ds, bias_ds, ds_stride) -- a 1x1 strided
                  conv+BN computed on x_in inside the same kernel and added
                  before the final ReLU (projection shortcut).
    """
    kh, kw, cin, cout = w.shape
    if padding is None:
        padding = kh // 2
    patches, (n, oh, ow) = _im2col(x, kh, kw, stride, padding)
    m, k = patches.shape
    kp = _round_up(k, 128)
    coutp = _round_up(cout, LANE)                 # lane-dense output columns
    tm = min(TM_MAX, _round_up(m, 16))            # per-layer M tile (bf16-safe)
    mp = _round_up(m, tm)

    # bf16 operands for the MXU; fold BN scale into the weight columns.
    patches = jnp.pad(patches.astype(jnp.bfloat16), ((0, mp - m), (0, kp - k)))
    wf = _fold_weight(w, scale, kp, coutp)
    b2 = _pad_bias(bias, coutp)

    inputs = [patches, wf, b2]
    in_specs = [
        pl.BlockSpec((tm, kp), lambda i: (i, 0)),
        pl.BlockSpec((kp, coutp), lambda i: (0, 0)),
        pl.BlockSpec((1, coutp), lambda i: (0, 0)),
    ]
    flops = 2 * mp * kp * coutp
    bytes_accessed = mp * kp * 2 + kp * coutp * 2 + coutp * 4 + mp * coutp * 4

    if downsample is not None:
        x_in, wd, sd, bd, ds_stride = downsample
        pd, _ = _im2col(x_in, 1, 1, ds_stride, 0)     # 1x1 conv: strided sample
        md, kd = pd.shape
        kdp = _round_up(kd, 128)
        pd = jnp.pad(pd.astype(jnp.bfloat16), ((0, mp - md), (0, kdp - kd)))
        wdf = _fold_weight(wd, sd, kdp, coutp)
        bd2 = _pad_bias(bd, coutp)
        inputs += [pd, wdf, bd2]
        in_specs += [
            pl.BlockSpec((tm, kdp), lambda i: (i, 0)),
            pl.BlockSpec((kdp, coutp), lambda i: (0, 0)),
            pl.BlockSpec((1, coutp), lambda i: (0, 0)),
        ]
        kernel = functools.partial(_conv_bn_ds_kernel, relu=relu)
        flops += 2 * mp * kdp * coutp
        bytes_accessed += mp * kdp * 2 + kdp * coutp * 2 + coutp * 4
    elif residual is not None:
        r = residual.reshape(m, cout).astype(jnp.float32)
        r = jnp.pad(r, ((0, mp - m), (0, coutp - cout)))
        inputs.append(r)
        in_specs.append(pl.BlockSpec((tm, coutp), lambda i: (i, 0)))
        kernel = functools.partial(_conv_bn_res_kernel, relu=relu)
        bytes_accessed += mp * coutp * 4
    else:
        kernel = functools.partial(_conv_bn_kernel, relu=relu)

    out = pl.pallas_call(
        kernel,
        out_shape=jax.ShapeDtypeStruct((mp, coutp), jnp.float32),
        grid=(mp // tm,),
        in_specs=in_specs,
        out_specs=pl.BlockSpec((tm, coutp), lambda i: (i, 0)),
        compiler_params=pltpu.CompilerParams(dimension_semantics=("parallel",)),
        cost_estimate=pl.CostEstimate(flops=flops, transcendentals=0,
                                      bytes_accessed=bytes_accessed),
    )(*inputs)
    return out[:m, :cout].reshape(n, oh, ow, cout)


def maxpool_3x3_s2(x):
    """nn.MaxPool2d(kernel_size=3, stride=2, padding=1) on NHWC via Pallas."""
    n, h, w, c = x.shape
    xp = jnp.pad(x, ((0, 0), (1, 1), (1, 1), (0, 0)),
                 constant_values=-jnp.inf)
    oh = (h + 2 - 3) // 2 + 1
    ow = (w + 2 - 3) // 2 + 1
    cols = []
    for dy in range(3):
        for dx in range(3):
            cols.append(xp[:, dy:dy + 2 * oh:2, dx:dx + 2 * ow:2, :])
    # (9, M, C): taps on the leading axis, channels lane-dense (padded to 128).
    patches = jnp.stack(cols, axis=0).reshape(9, n * oh * ow, c)
    m = n * oh * ow
    cp = _round_up(c, LANE)
    tm = min(TM_MAX, _round_up(m, 8))
    mp = _round_up(m, tm)
    patches = jnp.pad(patches, ((0, 0), (0, mp - m), (0, cp - c)))

    out = pl.pallas_call(
        _maxpool_kernel,
        out_shape=jax.ShapeDtypeStruct((mp, cp), jnp.float32),
        grid=(mp // tm,),
        in_specs=[pl.BlockSpec((9, tm, cp), lambda i: (0, i, 0))],
        out_specs=pl.BlockSpec((tm, cp), lambda i: (i, 0)),
        compiler_params=pltpu.CompilerParams(dimension_semantics=("parallel",)),
        cost_estimate=pl.CostEstimate(flops=8 * mp * cp,
                                      transcendentals=0,
                                      bytes_accessed=9 * mp * cp * 4 + mp * cp * 4),
    )(patches)
    return out[:m, :c].reshape(n, oh, ow, c)


# --------------------------- ResNet structure --------------------------------

def basic_block(x, p, stride):
    """torchvision BasicBlock: relu(bn2(conv2(relu(bn1(conv1(x))))) + shortcut)."""
    out = conv_bn(x, p["conv1_w"], p["bn1_s"], p["bn1_b"],
                  stride=stride, relu=True)
    if "ds_w" in p:
        # projection shortcut fused into conv2's pallas_call
        out = conv_bn(out, p["conv2_w"], p["bn2_s"], p["bn2_b"],
                      stride=1, relu=True,
                      downsample=(x, p["ds_w"], p["ds_s"], p["ds_b"], stride))
    else:
        out = conv_bn(out, p["conv2_w"], p["bn2_s"], p["bn2_b"],
                      stride=1, relu=True, residual=x)
    return out


def resnet_backbone(params, imgs_nchw):
    # layout: accepts NCHW (PyTorch convention), computes in NHWC, returns NCHW.
    x = jnp.transpose(imgs_nchw, (0, 2, 3, 1)).astype(jnp.float32)
    # stem: conv7x7/s2 + bn + relu + maxpool3x3/s2
    x = conv_bn(x, params["stem_w"], params["stem_bn_s"], params["stem_bn_b"],
                stride=2, padding=3, relu=True)
    x = maxpool_3x3_s2(x)
    feats = []
    for si, blocks in enumerate(params["stages"]):
        stride = STAGE_STRIDES[si]
        for bi, bp in enumerate(blocks):
            x = basic_block(x, bp, stride if bi == 0 else 1)
        feats.append(jnp.transpose(x, (0, 3, 1, 2)))       # back to NCHW
    return feats                                           # [conv1..conv4]


# --------------------------- deterministic init -------------------------------

def _init_conv(key, kh, kw, cin, cout):
    fan_in = kh * kw * cin
    return (jax.random.normal(key, (kh, kw, cin, cout), jnp.float32)
            * (1.0 / float(fan_in) ** 0.5))


def _init_bn(key, c):
    k1, k2, k3, k4 = jax.random.split(key, 4)
    gamma = 1.0 + 0.1 * jax.random.normal(k1, (c,), jnp.float32)
    beta = 0.1 * jax.random.normal(k2, (c,), jnp.float32)
    mean = 0.1 * jax.random.normal(k3, (c,), jnp.float32)
    var = 1.0 + 0.1 * jax.random.uniform(k4, (c,), jnp.float32)
    scale = gamma / jnp.sqrt(var + BN_EPS)
    bias = beta - mean * scale
    return scale, bias


def init_params(key):
    keys = iter(jax.random.split(key, 256))
    params = {}
    params["stem_w"] = _init_conv(next(keys), 7, 7, 3, STEM_OUT)
    params["stem_bn_s"], params["stem_bn_b"] = _init_bn(next(keys), STEM_OUT)
    cin = STEM_OUT
    stages = []
    for cout, nblocks, stride in zip(STAGE_CH, STAGE_BLOCKS, STAGE_STRIDES):
        blocks = []
        for bi in range(nblocks):
            s = stride if bi == 0 else 1
            bp = {
                "conv1_w": _init_conv(next(keys), 3, 3, cin, cout),
                "conv2_w": _init_conv(next(keys), 3, 3, cout, cout),
            }
            bp["bn1_s"], bp["bn1_b"] = _init_bn(next(keys), cout)
            bp["bn2_s"], bp["bn2_b"] = _init_bn(next(keys), cout)
            if s != 1 or cin != cout:
                bp["ds_w"] = _init_conv(next(keys), 1, 1, cin, cout)
                bp["ds_s"], bp["ds_b"] = _init_bn(next(keys), cout)
            blocks.append(bp)
            cin = cout
        stages.append(blocks)
    params["stages"] = stages
    return params


# --------------------------------- main ---------------------------------------

if __name__ == "__main__":
    root = jax.random.PRNGKey(0)
    pkey, xkey = jax.random.split(root)
    params = init_params(pkey)
    imgs = jax.random.normal(xkey, (2, 3, 32, 32), jnp.float32)   # NCHW

    feats = jax.jit(resnet_backbone)(params, imgs)
    feats = jax.block_until_ready(feats)

    expected = [(2, 16, 8, 8), (2, 32, 4, 4), (2, 64, 2, 2), (2, 128, 1, 1)]
    assert [tuple(f.shape) for f in feats] == expected, \
        [tuple(f.shape) for f in feats]
    assert all(bool(jnp.all(jnp.isfinite(f))) for f in feats)
    print("KERNEL_OK")
</pallas_src>

<mosaic_0001>
module attributes {stable_mosaic.version = 11 : i64} {
  func.func @_conv_bn_kernel(%arg0: i32, %arg1: memref<512x256xbf16, #tpu.memory_space<vmem>>, %arg2: memref<256x128xbf16, #tpu.memory_space<vmem>>, %arg3: memref<1x128xf32, #tpu.memory_space<vmem>>, %arg4: memref<512x128xf32, #tpu.memory_space<vmem>>) attributes {dimension_semantics = [#tpu.dimension_semantics<parallel>], iteration_bounds = array<i64: 1>, scalar_prefetch = 0 : i64, scratch_operands = 0 : i64, tpu.core_type = #tpu.core_type<tc>, window_params = [{transform_indices = @transform_0, window_bounds = array<i64: 512, 256>}, {pipeline_mode = #tpu.pipeline_mode<synchronous>, transform_indices = @transform_1, window_bounds = array<i64: 256, 128>}, {pipeline_mode = #tpu.pipeline_mode<synchronous>, transform_indices = @transform_2, window_bounds = array<i64: 1, 128>}, {transform_indices = @transform_3, window_bounds = array<i64: 512, 128>}]} {
    %c0 = arith.constant 0 : index
    %c0_0 = arith.constant 0 : index
    %0 = vector.load %arg1[%c0, %c0_0] : memref<512x256xbf16, #tpu.memory_space<vmem>>, vector<512x256xbf16>
    %c0_1 = arith.constant 0 : index
    %c0_2 = arith.constant 0 : index
    %1 = vector.load %arg2[%c0_1, %c0_2] : memref<256x128xbf16, #tpu.memory_space<vmem>>, vector<256x128xbf16>
    %cst = arith.constant dense<0.000000e+00> : vector<512x128xf32>
    %2 = tpu.matmul %0, %1, %cst {dimension_numbers = #tpu.dot_dimension_numbers<[1], [0], [0], [1], [0, 0, 1, 1], [], []>} : vector<512x256xbf16>, vector<256x128xbf16>, vector<512x128xf32> -> vector<512x128xf32>
    %c0_3 = arith.constant 0 : index
    %c0_4 = arith.constant 0 : index
    %3 = vector.load %arg3[%c0_3, %c0_4] : memref<1x128xf32, #tpu.memory_space<vmem>>, vector<1x128xf32>
    %4 = vector.broadcast %3 : vector<1x128xf32> to vector<512x128xf32>
    %5 = arith.addf %2, %4 : vector<512x128xf32>
    %cst_5 = arith.constant 0.000000e+00 : f32
    %6 = vector.broadcast %cst_5 : f32 to vector<512x128xf32>
    %7 = arith.maximumf %5, %6 : vector<512x128xf32>
    %c0_6 = arith.constant 0 : index
    %c0_7 = arith.constant 0 : index
    %8 = vector.load %arg4[%c0_6, %c0_7] : memref<512x128xf32, #tpu.memory_space<vmem>>, vector<512x128xf32>
    tpu.vector_store %arg4[%c0_6, %c0_7], %7 {strides = array<i32>} : memref<512x128xf32, #tpu.memory_space<vmem>>, vector<512x128xf32>,
    return
  }
  func.func @transform_0(%arg0: i32) -> (i32, i32) {
    %c0_i32 = arith.constant 0 : i32
    %c0_i32_0 = arith.constant 0 : i32
    return %arg0, %c0_i32 : i32, i32
  }
  func.func @transform_1(%arg0: i32) -> (i32, i32) {
    %c0_i32 = arith.constant 0 : i32
    %c0_i32_0 = arith.constant 0 : i32
    %c0_i32_1 = arith.constant 0 : i32
    return %c0_i32, %c0_i32_0 : i32, i32
  }
  func.func @transform_2(%arg0: i32) -> (i32, i32) {
    %c0_i32 = arith.constant 0 : i32
    %c0_i32_0 = arith.constant 0 : i32
    %c0_i32_1 = arith.constant 0 : i32
    return %c0_i32, %c0_i32_0 : i32, i32
  }
  func.func @transform_3(%arg0: i32) -> (i32, i32) {
    %c0_i32 = arith.constant 0 : i32
    %c0_i32_0 = arith.constant 0 : i32
    return %arg0, %c0_i32 : i32, i32
  }
}

module attributes {stable_mosaic.version = 11 : i64} {
  func.func @_maxpool_kernel(%arg0: i32, %arg1: memref<9x128x128xf32, #tpu.memory_space<vmem>>, %arg2: memref<128x128xf32, #tpu.memory_space<vmem>>) attributes {dimension_semantics = [#tpu.dimension_semantics<parallel>], iteration_bounds = array<i64: 1>, scalar_prefetch = 0 : i64, scratch_operands = 0 : i64, tpu.core_type = #tpu.core_type<tc>, window_params = [{transform_indices = @transform_0, window_bounds = array<i64: 9, 128, 128>}, {transform_indices = @transform_1, window_bounds = array<i64: 128, 128>}]} {
    %c0 = arith.constant 0 : index
    %c0_0 = arith.constant 0 : index
    %c0_1 = arith.constant 0 : index
    %0 = vector.load %arg1[%c0, %c0_0, %c0_1] : memref<9x128x128xf32, #tpu.memory_space<vmem>>, vector<9x128x128xf32>
    %cst = arith.constant dense<0xFF800000> : vector<128x128xf32>
    %1 = vector.multi_reduction <maximumf>, %0, %cst [0] : vector<9x128x128xf32> to vector<128x128xf32>
    %c0_2 = arith.constant 0 : index
    %c0_3 = arith.constant 0 : index
    %2 = vector.load %arg2[%c0_2, %c0_3] : memref<128x128xf32, #tpu.memory_space<vmem>>, vector<128x128xf32>
    tpu.vector_store %arg2[%c0_2, %c0_3], %1 {strides = array<i32>} : memref<128x128xf32, #tpu.memory_space<vmem>>, vector<128x128xf32>,
    return
  }
  func.func @transform_0(%arg0: i32) -> (i32, i32, i32) {
    %c0_i32 = arith.constant 0 : i32
    %c0_i32_0 = arith.constant 0 : i32
    %c0_i32_1 = arith.constant 0 : i32
    return %c0_i32, %arg0, %c0_i32_0 : i32, i32, i32
  }
  func.func @transform_1(%arg0: i32) -> (i32, i32) {
    %c0_i32 = arith.constant 0 : i32
    %c0_i32_0 = arith.constant 0 : i32
    return %arg0, %c0_i32 : i32, i32
  }
}

module attributes {stable_mosaic.version = 11 : i64} {
  func.func @_conv_bn_kernel(%arg0: i32, %arg1: memref<128x256xbf16, #tpu.memory_space<vmem>>, %arg2: memref<256x128xbf16, #tpu.memory_space<vmem>>, %arg3: memref<1x128xf32, #tpu.memory_space<vmem>>, %arg4: memref<128x128xf32, #tpu.memory_space<vmem>>) attributes {dimension_semantics = [#tpu.dimension_semantics<parallel>], iteration_bounds = array<i64: 1>, scalar_prefetch = 0 : i64, scratch_operands = 0 : i64, tpu.core_type = #tpu.core_type<tc>, window_params = [{transform_indices = @transform_0, window_bounds = array<i64: 128, 256>}, {pipeline_mode = #tpu.pipeline_mode<synchronous>, transform_indices = @transform_1, window_bounds = array<i64: 256, 128>}, {pipeline_mode = #tpu.pipeline_mode<synchronous>, transform_indices = @transform_2, window_bounds = array<i64: 1, 128>}, {transform_indices = @transform_3, window_bounds = array<i64: 128, 128>}]} {
    %c0 = arith.constant 0 : index
    %c0_0 = arith.constant 0 : index
    %0 = vector.load %arg1[%c0, %c0_0] : memref<128x256xbf16, #tpu.memory_space<vmem>>, vector<128x256xbf16>
    %c0_1 = arith.constant 0 : index
    %c0_2 = arith.constant 0 : index
    %1 = vector.load %arg2[%c0_1, %c0_2] : memref<256x128xbf16, #tpu.memory_space<vmem>>, vector<256x128xbf16>
    %cst = arith.constant dense<0.000000e+00> : vector<128x128xf32>
    %2 = tpu.matmul %0, %1, %cst {dimension_numbers = #tpu.dot_dimension_numbers<[1], [0], [0], [1], [0, 0, 1, 1], [], []>} : vector<128x256xbf16>, vector<256x128xbf16>, vector<128x128xf32> -> vector<128x128xf32>
    %c0_3 = arith.constant 0 : index
    %c0_4 = arith.constant 0 : index
    %3 = vector.load %arg3[%c0_3, %c0_4] : memref<1x128xf32, #tpu.memory_space<vmem>>, vector<1x128xf32>
    %4 = vector.broadcast %3 : vector<1x128xf32> to vector<128x128xf32>
    %5 = arith.addf %2, %4 : vector<128x128xf32>
    %cst_5 = arith.constant 0.000000e+00 : f32
    %6 = vector.broadcast %cst_5 : f32 to vector<128x128xf32>
    %7 = arith.maximumf %5, %6 : vector<128x128xf32>
    %c0_6 = arith.constant 0 : index
    %c0_7 = arith.constant 0 : index
    %8 = vector.load %arg4[%c0_6, %c0_7] : memref<128x128xf32, #tpu.memory_space<vmem>>, vector<128x128xf32>
    tpu.vector_store %arg4[%c0_6, %c0_7], %7 {strides = array<i32>} : memref<128x128xf32, #tpu.memory_space<vmem>>, vector<128x128xf32>,
    return
  }
  func.func @transform_0(%arg0: i32) -> (i32, i32) {
    %c0_i32 = arith.constant 0 : i32
    %c0_i32_0 = arith.constant 0 : i32
    return %arg0, %c0_i32 : i32, i32
  }
  func.func @transform_1(%arg0: i32) -> (i32, i32) {
    %c0_i32 = arith.constant 0 : i32
    %c0_i32_0 = arith.constant 0 : i32
    %c0_i32_1 = arith.constant 0 : i32
    return %c0_i32, %c0_i32_0 : i32, i32
  }
  func.func @transform_2(%arg0: i32) -> (i32, i32) {
    %c0_i32 = arith.constant 0 : i32
    %c0_i32_0 = arith.constant 0 : i32
    %c0_i32_1 = arith.constant 0 : i32
    return %c0_i32, %c0_i32_0 : i32, i32
  }
  func.func @transform_3(%arg0: i32) -> (i32, i32) {
    %c0_i32 = arith.constant 0 : i32
    %c0_i32_0 = arith.constant 0 : i32
    return %arg0, %c0_i32 : i32, i32
  }
}

module attributes {stable_mosaic.version = 11 : i64} {
  func.func @_conv_bn_res_kernel(%arg0: i32, %arg1: memref<128x256xbf16, #tpu.memory_space<vmem>>, %arg2: memref<256x128xbf16, #tpu.memory_space<vmem>>, %arg3: memref<1x128xf32, #tpu.memory_space<vmem>>, %arg4: memref<128x128xf32, #tpu.memory_space<vmem>>, %arg5: memref<128x128xf32, #tpu.memory_space<vmem>>) attributes {dimension_semantics = [#tpu.dimension_semantics<parallel>], iteration_bounds = array<i64: 1>, scalar_prefetch = 0 : i64, scratch_operands = 0 : i64, tpu.core_type = #tpu.core_type<tc>, window_params = [{transform_indices = @transform_0, window_bounds = array<i64: 128, 256>}, {pipeline_mode = #tpu.pipeline_mode<synchronous>, transform_indices = @transform_1, window_bounds = array<i64: 256, 128>}, {pipeline_mode = #tpu.pipeline_mode<synchronous>, transform_indices = @transform_2, window_bounds = array<i64: 1, 128>}, {transform_indices = @transform_3, window_bounds = array<i64: 128, 128>}, {transform_indices = @transform_4, window_bounds = array<i64: 128, 128>}]} {
    %c0 = arith.constant 0 : index
    %c0_0 = arith.constant 0 : index
    %0 = vector.load %arg1[%c0, %c0_0] : memref<128x256xbf16, #tpu.memory_space<vmem>>, vector<128x256xbf16>
    %c0_1 = arith.constant 0 : index
    %c0_2 = arith.constant 0 : index
    %1 = vector.load %arg2[%c0_1, %c0_2] : memref<256x128xbf16, #tpu.memory_space<vmem>>, vector<256x128xbf16>
    %cst = arith.constant dense<0.000000e+00> : vector<128x128xf32>
    %2 = tpu.matmul %0, %1, %cst {dimension_numbers = #tpu.dot_dimension_numbers<[1], [0], [0], [1], [0, 0, 1, 1], [], []>} : vector<128x256xbf16>, vector<256x128xbf16>, vector<128x128xf32> -> vector<128x128xf32>
    %c0_3 = arith.constant 0 : index
    %c0_4 = arith.constant 0 : index
    %3 = vector.load %arg3[%c0_3, %c0_4] : memref<1x128xf32, #tpu.memory_space<vmem>>, vector<1x128xf32>
    %4 = vector.broadcast %3 : vector<1x128xf32> to vector<128x128xf32>
    %5 = arith.addf %2, %4 : vector<128x128xf32>
    %c0_5 = arith.constant 0 : index
    %c0_6 = arith.constant 0 : index
    %6 = vector.load %arg4[%c0_5, %c0_6] : memref<128x128xf32, #tpu.memory_space<vmem>>, vector<128x128xf32>
    %7 = arith.addf %5, %6 : vector<128x128xf32>
    %cst_7 = arith.constant 0.000000e+00 : f32
    %8 = vector.broadcast %cst_7 : f32 to vector<128x128xf32>
    %9 = arith.maximumf %7, %8 : vector<128x128xf32>
    %c0_8 = arith.constant 0 : index
    %c0_9 = arith.constant 0 : index
    %10 = vector.load %arg5[%c0_8, %c0_9] : memref<128x128xf32, #tpu.memory_space<vmem>>, vector<128x128xf32>
    tpu.vector_store %arg5[%c0_8, %c0_9], %9 {strides = array<i32>} : memref<128x128xf32, #tpu.memory_space<vmem>>, vector<128x128xf32>,
    return
  }
  func.func @transform_0(%arg0: i32) -> (i32, i32) {
    %c0_i32 = arith.constant 0 : i32
    %c0_i32_0 = arith.constant 0 : i32
    return %arg0, %c0_i32 : i32, i32
  }
  func.func @transform_1(%arg0: i32) -> (i32, i32) {
    %c0_i32 = arith.constant 0 : i32
    %c0_i32_0 = arith.constant 0 : i32
    %c0_i32_1 = arith.constant 0 : i32
    return %c0_i32, %c0_i32_0 : i32, i32
  }
  func.func @transform_2(%arg0: i32) -> (i32, i32) {
    %c0_i32 = arith.constant 0 : i32
    %c0_i32_0 = arith.constant 0 : i32
    %c0_i32_1 = arith.constant 0 : i32
    return %c0_i32, %c0_i32_0 : i32, i32
  }
  func.func @transform_3(%arg0: i32) -> (i32, i32) {
    %c0_i32 = arith.constant 0 : i32
    %c0_i32_0 = arith.constant 0 : i32
    return %arg0, %c0_i32 : i32, i32
  }
  func.func @transform_4(%arg0: i32) -> (i32, i32) {
    %c0_i32 = arith.constant 0 : i32
    %c0_i32_0 = arith.constant 0 : i32
    return %arg0, %c0_i32 : i32, i32
  }
}

module attributes {stable_mosaic.version = 11 : i64} {
  func.func @_conv_bn_kernel(%arg0: i32, %arg1: memref<32x256xbf16, #tpu.memory_space<vmem>>, %arg2: memref<256x128xbf16, #tpu.memory_space<vmem>>, %arg3: memref<1x128xf32, #tpu.memory_space<vmem>>, %arg4: memref<32x128xf32, #tpu.memory_space<vmem>>) attributes {dimension_semantics = [#tpu.dimension_semantics<parallel>], iteration_bounds = array<i64: 1>, scalar_prefetch = 0 : i64, scratch_operands = 0 : i64, tpu.core_type = #tpu.core_type<tc>, window_params = [{transform_indices = @transform_0, window_bounds = array<i64: 32, 256>}, {pipeline_mode = #tpu.pipeline_mode<synchronous>, transform_indices = @transform_1, window_bounds = array<i64: 256, 128>}, {pipeline_mode = #tpu.pipeline_mode<synchronous>, transform_indices = @transform_2, window_bounds = array<i64: 1, 128>}, {transform_indices = @transform_3, window_bounds = array<i64: 32, 128>}]} {
    %c0 = arith.constant 0 : index
    %c0_0 = arith.constant 0 : index
    %0 = vector.load %arg1[%c0, %c0_0] : memref<32x256xbf16, #tpu.memory_space<vmem>>, vector<32x256xbf16>
    %c0_1 = arith.constant 0 : index
    %c0_2 = arith.constant 0 : index
    %1 = vector.load %arg2[%c0_1, %c0_2] : memref<256x128xbf16, #tpu.memory_space<vmem>>, vector<256x128xbf16>
    %cst = arith.constant dense<0.000000e+00> : vector<32x128xf32>
    %2 = tpu.matmul %0, %1, %cst {dimension_numbers = #tpu.dot_dimension_numbers<[1], [0], [0], [1], [0, 0, 1, 1], [], []>} : vector<32x256xbf16>, vector<256x128xbf16>, vector<32x128xf32> -> vector<32x128xf32>
    %c0_3 = arith.constant 0 : index
    %c0_4 = arith.constant 0 : index
    %3 = vector.load %arg3[%c0_3, %c0_4] : memref<1x128xf32, #tpu.memory_space<vmem>>, vector<1x128xf32>
    %4 = vector.broadcast %3 : vector<1x128xf32> to vector<32x128xf32>
    %5 = arith.addf %2, %4 : vector<32x128xf32>
    %cst_5 = arith.constant 0.000000e+00 : f32
    %6 = vector.broadcast %cst_5 : f32 to vector<32x128xf32>
    %7 = arith.maximumf %5, %6 : vector<32x128xf32>
    %c0_6 = arith.constant 0 : index
    %c0_7 = arith.constant 0 : index
    %8 = vector.load %arg4[%c0_6, %c0_7] : memref<32x128xf32, #tpu.memory_space<vmem>>, vector<32x128xf32>
    tpu.vector_store %arg4[%c0_6, %c0_7], %7 {strides = array<i32>} : memref<32x128xf32, #tpu.memory_space<vmem>>, vector<32x128xf32>,
    return
  }
  func.func @transform_0(%arg0: i32) -> (i32, i32) {
    %c0_i32 = arith.constant 0 : i32
    %c0_i32_0 = arith.constant 0 : i32
    return %arg0, %c0_i32 : i32, i32
  }
  func.func @transform_1(%arg0: i32) -> (i32, i32) {
    %c0_i32 = arith.constant 0 : i32
    %c0_i32_0 = arith.constant 0 : i32
    %c0_i32_1 = arith.constant 0 : i32
    return %c0_i32, %c0_i32_0 : i32, i32
  }
  func.func @transform_2(%arg0: i32) -> (i32, i32) {
    %c0_i32 = arith.constant 0 : i32
    %c0_i32_0 = arith.constant 0 : i32
    %c0_i32_1 = arith.constant 0 : i32
    return %c0_i32, %c0_i32_0 : i32, i32
  }
  func.func @transform_3(%arg0: i32) -> (i32, i32) {
    %c0_i32 = arith.constant 0 : i32
    %c0_i32_0 = arith.constant 0 : i32
    return %arg0, %c0_i32 : i32, i32
  }
}

module attributes {stable_mosaic.version = 11 : i64} {
  func.func @_conv_bn_kernel(%arg0: i32, %arg1: memref<32x384xbf16, #tpu.memory_space<vmem>>, %arg2: memref<384x128xbf16, #tpu.memory_space<vmem>>, %arg3: memref<1x128xf32, #tpu.memory_space<vmem>>, %arg4: memref<32x128xf32, #tpu.memory_space<vmem>>) attributes {dimension_semantics = [#tpu.dimension_semantics<parallel>], iteration_bounds = array<i64: 1>, scalar_prefetch = 0 : i64, scratch_operands = 0 : i64, tpu.core_type = #tpu.core_type<tc>, window_params = [{transform_indices = @transform_0, window_bounds = array<i64: 32, 384>}, {pipeline_mode = #tpu.pipeline_mode<synchronous>, transform_indices = @transform_1, window_bounds = array<i64: 384, 128>}, {pipeline_mode = #tpu.pipeline_mode<synchronous>, transform_indices = @transform_2, window_bounds = array<i64: 1, 128>}, {transform_indices = @transform_3, window_bounds = array<i64: 32, 128>}]} {
    %c0 = arith.constant 0 : index
    %c0_0 = arith.constant 0 : index
    %0 = vector.load %arg1[%c0, %c0_0] : memref<32x384xbf16, #tpu.memory_space<vmem>>, vector<32x384xbf16>
    %c0_1 = arith.constant 0 : index
    %c0_2 = arith.constant 0 : index
    %1 = vector.load %arg2[%c0_1, %c0_2] : memref<384x128xbf16, #tpu.memory_space<vmem>>, vector<384x128xbf16>
    %cst = arith.constant dense<0.000000e+00> : vector<32x128xf32>
    %2 = tpu.matmul %0, %1, %cst {dimension_numbers = #tpu.dot_dimension_numbers<[1], [0], [0], [1], [0, 0, 1, 1], [], []>} : vector<32x384xbf16>, vector<384x128xbf16>, vector<32x128xf32> -> vector<32x128xf32>
    %c0_3 = arith.constant 0 : index
    %c0_4 = arith.constant 0 : index
    %3 = vector.load %arg3[%c0_3, %c0_4] : memref<1x128xf32, #tpu.memory_space<vmem>>, vector<1x128xf32>
    %4 = vector.broadcast %3 : vector<1x128xf32> to vector<32x128xf32>
    %5 = arith.addf %2, %4 : vector<32x128xf32>
    %cst_5 = arith.constant 0.000000e+00 : f32
    %6 = vector.broadcast %cst_5 : f32 to vector<32x128xf32>
    %7 = arith.maximumf %5, %6 : vector<32x128xf32>
    %c0_6 = arith.constant 0 : index
    %c0_7 = arith.constant 0 : index
    %8 = vector.load %arg4[%c0_6, %c0_7] : memref<32x128xf32, #tpu.memory_space<vmem>>, vector<32x128xf32>
    tpu.vector_store %arg4[%c0_6, %c0_7], %7 {strides = array<i32>} : memref<32x128xf32, #tpu.memory_space<vmem>>, vector<32x128xf32>,
    return
  }
  func.func @transform_0(%arg0: i32) -> (i32, i32) {
    %c0_i32 = arith.constant 0 : i32
    %c0_i32_0 = arith.constant 0 : i32
    return %arg0, %c0_i32 : i32, i32
  }
  func.func @transform_1(%arg0: i32) -> (i32, i32) {
    %c0_i32 = arith.constant 0 : i32
    %c0_i32_0 = arith.constant 0 : i32
    %c0_i32_1 = arith.constant 0 : i32
    return %c0_i32, %c0_i32_0 : i32, i32
  }
  func.func @transform_2(%arg0: i32) -> (i32, i32) {
    %c0_i32 = arith.constant 0 : i32
    %c0_i32_0 = arith.constant 0 : i32
    %c0_i32_1 = arith.constant 0 : i32
    return %c0_i32, %c0_i32_0 : i32, i32
  }
  func.func @transform_3(%arg0: i32) -> (i32, i32) {
    %c0_i32 = arith.constant 0 : i32
    %c0_i32_0 = arith.constant 0 : i32
    return %arg0, %c0_i32 : i32, i32
  }
}

module attributes {stable_mosaic.version = 11 : i64} {
  func.func @_conv_bn_ds_kernel(%arg0: i32, %arg1: memref<32x384xbf16, #tpu.memory_space<vmem>>, %arg2: memref<384x128xbf16, #tpu.memory_space<vmem>>, %arg3: memref<1x128xf32, #tpu.memory_space<vmem>>, %arg4: memref<32x128xbf16, #tpu.memory_space<vmem>>, %arg5: memref<128x128xbf16, #tpu.memory_space<vmem>>, %arg6: memref<1x128xf32, #tpu.memory_space<vmem>>, %arg7: memref<32x128xf32, #tpu.memory_space<vmem>>) attributes {dimension_semantics = [#tpu.dimension_semantics<parallel>], iteration_bounds = array<i64: 1>, scalar_prefetch = 0 : i64, scratch_operands = 0 : i64, tpu.core_type = #tpu.core_type<tc>, window_params = [{transform_indices = @transform_0, window_bounds = array<i64: 32, 384>}, {pipeline_mode = #tpu.pipeline_mode<synchronous>, transform_indices = @transform_1, window_bounds = array<i64: 384, 128>}, {pipeline_mode = #tpu.pipeline_mode<synchronous>, transform_indices = @transform_2, window_bounds = array<i64: 1, 128>}, {transform_indices = @transform_3, window_bounds = array<i64: 32, 128>}, {pipeline_mode = #tpu.pipeline_mode<synchronous>, transform_indices = @transform_4, window_bounds = array<i64: 128, 128>}, {pipeline_mode = #tpu.pipeline_mode<synchronous>, transform_indices = @transform_5, window_bounds = array<i64: 1, 128>}, {transform_indices = @transform_6, window_bounds = array<i64: 32, 128>}]} {
    %c0 = arith.constant 0 : index
    %c0_0 = arith.constant 0 : index
    %0 = vector.load %arg1[%c0, %c0_0] : memref<32x384xbf16, #tpu.memory_space<vmem>>, vector<32x384xbf16>
    %c0_1 = arith.constant 0 : index
    %c0_2 = arith.constant 0 : index
    %1 = vector.load %arg2[%c0_1, %c0_2] : memref<384x128xbf16, #tpu.memory_space<vmem>>, vector<384x128xbf16>
    %cst = arith.constant dense<0.000000e+00> : vector<32x128xf32>
    %2 = tpu.matmul %0, %1, %cst {dimension_numbers = #tpu.dot_dimension_numbers<[1], [0], [0], [1], [0, 0, 1, 1], [], []>} : vector<32x384xbf16>, vector<384x128xbf16>, vector<32x128xf32> -> vector<32x128xf32>
    %c0_3 = arith.constant 0 : index
    %c0_4 = arith.constant 0 : index
    %3 = vector.load %arg3[%c0_3, %c0_4] : memref<1x128xf32, #tpu.memory_space<vmem>>, vector<1x128xf32>
    %4 = vector.broadcast %3 : vector<1x128xf32> to vector<32x128xf32>
    %5 = arith.addf %2, %4 : vector<32x128xf32>
    %c0_5 = arith.constant 0 : index
    %c0_6 = arith.constant 0 : index
    %6 = vector.load %arg4[%c0_5, %c0_6] : memref<32x128xbf16, #tpu.memory_space<vmem>>, vector<32x128xbf16>
    %c0_7 = arith.constant 0 : index
    %c0_8 = arith.constant 0 : index
    %7 = vector.load %arg5[%c0_7, %c0_8] : memref<128x128xbf16, #tpu.memory_space<vmem>>, vector<128x128xbf16>
    %cst_9 = arith.constant dense<0.000000e+00> : vector<32x128xf32>
    %8 = tpu.matmul %6, %7, %cst_9 {dimension_numbers = #tpu.dot_dimension_numbers<[1], [0], [0], [1], [0, 0, 1, 1], [], []>} : vector<32x128xbf16>, vector<128x128xbf16>, vector<32x128xf32> -> vector<32x128xf32>
    %c0_10 = arith.constant 0 : index
    %c0_11 = arith.constant 0 : index
    %9 = vector.load %arg6[%c0_10, %c0_11] : memref<1x128xf32, #tpu.memory_space<vmem>>, vector<1x128xf32>
    %10 = vector.broadcast %9 : vector<1x128xf32> to vector<32x128xf32>
    %11 = arith.addf %8, %10 : vector<32x128xf32>
    %12 = arith.addf %5, %11 : vector<32x128xf32>
    %cst_12 = arith.constant 0.000000e+00 : f32
    %13 = vector.broadcast %cst_12 : f32 to vector<32x128xf32>
    %14 = arith.maximumf %12, %13 : vector<32x128xf32>
    %c0_13 = arith.constant 0 : index
    %c0_14 = arith.constant 0 : index
    %15 = vector.load %arg7[%c0_13, %c0_14] : memref<32x128xf32, #tpu.memory_space<vmem>>, vector<32x128xf32>
    tpu.vector_store %arg7[%c0_13, %c0_14], %14 {strides = array<i32>} : memref<32x128xf32, #tpu.memory_space<vmem>>, vector<32x128xf32>,
    return
  }
  func.func @transform_0(%arg0: i32) -> (i32, i32) {
    %c0_i32 = arith.constant 0 : i32
    %c0_i32_0 = arith.constant 0 : i32
    return %arg0, %c0_i32 : i32, i32
  }
  func.func @transform_1(%arg0: i32) -> (i32, i32) {
    %c0_i32 = arith.constant 0 : i32
    %c0_i32_0 = arith.constant 0 : i32
    %c0_i32_1 = arith.constant 0 : i32
    return %c0_i32, %c0_i32_0 : i32, i32
  }
  func.func @transform_2(%arg0: i32) -> (i32, i32) {
    %c0_i32 = arith.constant 0 : i32
    %c0_i32_0 = arith.constant 0 : i32
    %c0_i32_1 = arith.constant 0 : i32
    return %c0_i32, %c0_i32_0 : i32, i32
  }
  func.func @transform_3(%arg0: i32) -> (i32, i32) {
    %c0_i32 = arith.constant 0 : i32
    %c0_i32_0 = arith.constant 0 : i32
    return %arg0, %c0_i32 : i32, i32
  }
  func.func @transform_4(%arg0: i32) -> (i32, i32) {
    %c0_i32 = arith.constant 0 : i32
    %c0_i32_0 = arith.constant 0 : i32
    %c0_i32_1 = arith.constant 0 : i32
    return %c0_i32, %c0_i32_0 : i32, i32
  }
  func.func @transform_5(%arg0: i32) -> (i32, i32) {
    %c0_i32 = arith.constant 0 : i32
    %c0_i32_0 = arith.constant 0 : i32
    %c0_i32_1 = arith.constant 0 : i32
    return %c0_i32, %c0_i32_0 : i32, i32
  }
  func.func @transform_6(%arg0: i32) -> (i32, i32) {
    %c0_i32 = arith.constant 0 : i32
    %c0_i32_0 = arith.constant 0 : i32
    return %arg0, %c0_i32 : i32, i32
  }
}

module attributes {stable_mosaic.version = 11 : i64} {
  func.func @_conv_bn_res_kernel(%arg0: i32, %arg1: memref<32x384xbf16, #tpu.memory_space<vmem>>, %arg2: memref<384x128xbf16, #tpu.memory_space<vmem>>, %arg3: memref<1x128xf32, #tpu.memory_space<vmem>>, %arg4: memref<32x128xf32, #tpu.memory_space<vmem>>, %arg5: memref<32x128xf32, #tpu.memory_space<vmem>>) attributes {dimension_semantics = [#tpu.dimension_semantics<parallel>], iteration_bounds = array<i64: 1>, scalar_prefetch = 0 : i64, scratch_operands = 0 : i64, tpu.core_type = #tpu.core_type<tc>, window_params = [{transform_indices = @transform_0, window_bounds = array<i64: 32, 384>}, {pipeline_mode = #tpu.pipeline_mode<synchronous>, transform_indices = @transform_1, window_bounds = array<i64: 384, 128>}, {pipeline_mode = #tpu.pipeline_mode<synchronous>, transform_indices = @transform_2, window_bounds = array<i64: 1, 128>}, {transform_indices = @transform_3, window_bounds = array<i64: 32, 128>}, {transform_indices = @transform_4, window_bounds = array<i64: 32, 128>}]} {
    %c0 = arith.constant 0 : index
    %c0_0 = arith.constant 0 : index
    %0 = vector.load %arg1[%c0, %c0_0] : memref<32x384xbf16, #tpu.memory_space<vmem>>, vector<32x384xbf16>
    %c0_1 = arith.constant 0 : index
    %c0_2 = arith.constant 0 : index
    %1 = vector.load %arg2[%c0_1, %c0_2] : memref<384x128xbf16, #tpu.memory_space<vmem>>, vector<384x128xbf16>
    %cst = arith.constant dense<0.000000e+00> : vector<32x128xf32>
    %2 = tpu.matmul %0, %1, %cst {dimension_numbers = #tpu.dot_dimension_numbers<[1], [0], [0], [1], [0, 0, 1, 1], [], []>} : vector<32x384xbf16>, vector<384x128xbf16>, vector<32x128xf32> -> vector<32x128xf32>
    %c0_3 = arith.constant 0 : index
    %c0_4 = arith.constant 0 : index
    %3 = vector.load %arg3[%c0_3, %c0_4] : memref<1x128xf32, #tpu.memory_space<vmem>>, vector<1x128xf32>
    %4 = vector.broadcast %3 : vector<1x128xf32> to vector<32x128xf32>
    %5 = arith.addf %2, %4 : vector<32x128xf32>
    %c0_5 = arith.constant 0 : index
    %c0_6 = arith.constant 0 : index
    %6 = vector.load %arg4[%c0_5, %c0_6] : memref<32x128xf32, #tpu.memory_space<vmem>>, vector<32x128xf32>
    %7 = arith.addf %5, %6 : vector<32x128xf32>
    %cst_7 = arith.constant 0.000000e+00 : f32
    %8 = vector.broadcast %cst_7 : f32 to vector<32x128xf32>
    %9 = arith.maximumf %7, %8 : vector<32x128xf32>
    %c0_8 = arith.constant 0 : index
    %c0_9 = arith.constant 0 : index
    %10 = vector.load %arg5[%c0_8, %c0_9] : memref<32x128xf32, #tpu.memory_space<vmem>>, vector<32x128xf32>
    tpu.vector_store %arg5[%c0_8, %c0_9], %9 {strides = array<i32>} : memref<32x128xf32, #tpu.memory_space<vmem>>, vector<32x128xf32>,
    return
  }
  func.func @transform_0(%arg0: i32) -> (i32, i32) {
    %c0_i32 = arith.constant 0 : i32
    %c0_i32_0 = arith.constant 0 : i32
    return %arg0, %c0_i32 : i32, i32
  }
  func.func @transform_1(%arg0: i32) -> (i32, i32) {
    %c0_i32 = arith.constant 0 : i32
    %c0_i32_0 = arith.constant 0 : i32
    %c0_i32_1 = arith.constant 0 : i32
    return %c0_i32, %c0_i32_0 : i32, i32
  }
  func.func @transform_2(%arg0: i32) -> (i32, i32) {
    %c0_i32 = arith.constant 0 : i32
    %c0_i32_0 = arith.constant 0 : i32
    %c0_i32_1 = arith.constant 0 : i32
    return %c0_i32, %c0_i32_0 : i32, i32
  }
  func.func @transform_3(%arg0: i32) -> (i32, i32) {
    %c0_i32 = arith.constant 0 : i32
    %c0_i32_0 = arith.constant 0 : i32
    return %arg0, %c0_i32 : i32, i32
  }
  func.func @transform_4(%arg0: i32) -> (i32, i32) {
    %c0_i32 = arith.constant 0 : i32
    %c0_i32_0 = arith.constant 0 : i32
    return %arg0, %c0_i32 : i32, i32
  }
}

module attributes {stable_mosaic.version = 11 : i64} {
  func.func @_conv_bn_kernel(%arg0: i32, %arg1: memref<16x384xbf16, #tpu.memory_space<vmem>>, %arg2: memref<384x128xbf16, #tpu.memory_space<vmem>>, %arg3: memref<1x128xf32, #tpu.memory_space<vmem>>, %arg4: memref<16x128xf32, #tpu.memory_space<vmem>>) attributes {dimension_semantics = [#tpu.dimension_semantics<parallel>], iteration_bounds = array<i64: 1>, scalar_prefetch = 0 : i64, scratch_operands = 0 : i64, tpu.core_type = #tpu.core_type<tc>, window_params = [{transform_indices = @transform_0, window_bounds = array<i64: 16, 384>}, {pipeline_mode = #tpu.pipeline_mode<synchronous>, transform_indices = @transform_1, window_bounds = array<i64: 384, 128>}, {pipeline_mode = #tpu.pipeline_mode<synchronous>, transform_indices = @transform_2, window_bounds = array<i64: 1, 128>}, {transform_indices = @transform_3, window_bounds = array<i64: 16, 128>}]} {
    %c0 = arith.constant 0 : index
    %c0_0 = arith.constant 0 : index
    %0 = vector.load %arg1[%c0, %c0_0] : memref<16x384xbf16, #tpu.memory_space<vmem>>, vector<16x384xbf16>
    %c0_1 = arith.constant 0 : index
    %c0_2 = arith.constant 0 : index
    %1 = vector.load %arg2[%c0_1, %c0_2] : memref<384x128xbf16, #tpu.memory_space<vmem>>, vector<384x128xbf16>
    %cst = arith.constant dense<0.000000e+00> : vector<16x128xf32>
    %2 = tpu.matmul %0, %1, %cst {dimension_numbers = #tpu.dot_dimension_numbers<[1], [0], [0], [1], [0, 0, 1, 1], [], []>} : vector<16x384xbf16>, vector<384x128xbf16>, vector<16x128xf32> -> vector<16x128xf32>
    %c0_3 = arith.constant 0 : index
    %c0_4 = arith.constant 0 : index
    %3 = vector.load %arg3[%c0_3, %c0_4] : memref<1x128xf32, #tpu.memory_space<vmem>>, vector<1x128xf32>
    %4 = vector.broadcast %3 : vector<1x128xf32> to vector<16x128xf32>
    %5 = arith.addf %2, %4 : vector<16x128xf32>
    %cst_5 = arith.constant 0.000000e+00 : f32
    %6 = vector.broadcast %cst_5 : f32 to vector<16x128xf32>
    %7 = arith.maximumf %5, %6 : vector<16x128xf32>
    %c0_6 = arith.constant 0 : index
    %c0_7 = arith.constant 0 : index
    %8 = vector.load %arg4[%c0_6, %c0_7] : memref<16x128xf32, #tpu.memory_space<vmem>>, vector<16x128xf32>
    tpu.vector_store %arg4[%c0_6, %c0_7], %7 {strides = array<i32>} : memref<16x128xf32, #tpu.memory_space<vmem>>, vector<16x128xf32>,
    return
  }
  func.func @transform_0(%arg0: i32) -> (i32, i32) {
    %c0_i32 = arith.constant 0 : i32
    %c0_i32_0 = arith.constant 0 : i32
    return %arg0, %c0_i32 : i32, i32
  }
  func.func @transform_1(%arg0: i32) -> (i32, i32) {
    %c0_i32 = arith.constant 0 : i32
    %c0_i32_0 = arith.constant 0 : i32
    %c0_i32_1 = arith.constant 0 : i32
    return %c0_i32, %c0_i32_0 : i32, i32
  }
  func.func @transform_2(%arg0: i32) -> (i32, i32) {
    %c0_i32 = arith.constant 0 : i32
    %c0_i32_0 = arith.constant 0 : i32
    %c0_i32_1 = arith.constant 0 : i32
    return %c0_i32, %c0_i32_0 : i32, i32
  }
  func.func @transform_3(%arg0: i32) -> (i32, i32) {
    %c0_i32 = arith.constant 0 : i32
    %c0_i32_0 = arith.constant 0 : i32
    return %arg0, %c0_i32 : i32, i32
  }
}

module attributes {stable_mosaic.version = 11 : i64} {
  func.func @_conv_bn_kernel(%arg0: i32, %arg1: memref<16x640xbf16, #tpu.memory_space<vmem>>, %arg2: memref<640x128xbf16, #tpu.memory_space<vmem>>, %arg3: memref<1x128xf32, #tpu.memory_space<vmem>>, %arg4: memref<16x128xf32, #tpu.memory_space<vmem>>) attributes {dimension_semantics = [#tpu.dimension_semantics<parallel>], iteration_bounds = array<i64: 1>, scalar_prefetch = 0 : i64, scratch_operands = 0 : i64, tpu.core_type = #tpu.core_type<tc>, window_params = [{transform_indices = @transform_0, window_bounds = array<i64: 16, 640>}, {pipeline_mode = #tpu.pipeline_mode<synchronous>, transform_indices = @transform_1, window_bounds = array<i64: 640, 128>}, {pipeline_mode = #tpu.pipeline_mode<synchronous>, transform_indices = @transform_2, window_bounds = array<i64: 1, 128>}, {transform_indices = @transform_3, window_bounds = array<i64: 16, 128>}]} {
    %c0 = arith.constant 0 : index
    %c0_0 = arith.constant 0 : index
    %0 = vector.load %arg1[%c0, %c0_0] : memref<16x640xbf16, #tpu.memory_space<vmem>>, vector<16x640xbf16>
    %c0_1 = arith.constant 0 : index
    %c0_2 = arith.constant 0 : index
    %1 = vector.load %arg2[%c0_1, %c0_2] : memref<640x128xbf16, #tpu.memory_space<vmem>>, vector<640x128xbf16>
    %cst = arith.constant dense<0.000000e+00> : vector<16x128xf32>
    %2 = tpu.matmul %0, %1, %cst {dimension_numbers = #tpu.dot_dimension_numbers<[1], [0], [0], [1], [0, 0, 1, 1], [], []>} : vector<16x640xbf16>, vector<640x128xbf16>, vector<16x128xf32> -> vector<16x128xf32>
    %c0_3 = arith.constant 0 : index
    %c0_4 = arith.constant 0 : index
    %3 = vector.load %arg3[%c0_3, %c0_4] : memref<1x128xf32, #tpu.memory_space<vmem>>, vector<1x128xf32>
    %4 = vector.broadcast %3 : vector<1x128xf32> to vector<16x128xf32>
    %5 = arith.addf %2, %4 : vector<16x128xf32>
    %cst_5 = arith.constant 0.000000e+00 : f32
    %6 = vector.broadcast %cst_5 : f32 to vector<16x128xf32>
    %7 = arith.maximumf %5, %6 : vector<16x128xf32>
    %c0_6 = arith.constant 0 : index
    %c0_7 = arith.constant 0 : index
    %8 = vector.load %arg4[%c0_6, %c0_7] : memref<16x128xf32, #tpu.memory_space<vmem>>, vector<16x128xf32>
    tpu.vector_store %arg4[%c0_6, %c0_7], %7 {strides = array<i32>} : memref<16x128xf32, #tpu.memory_space<vmem>>, vector<16x128xf32>,
    return
  }
  func.func @transform_0(%arg0: i32) -> (i32, i32) {
    %c0_i32 = arith.constant 0 : i32
    %c0_i32_0 = arith.constant 0 : i32
    return %arg0, %c0_i32 : i32, i32
  }
  func.func @transform_1(%arg0: i32) -> (i32, i32) {
    %c0_i32 = arith.constant 0 : i32
    %c0_i32_0 = arith.constant 0 : i32
    %c0_i32_1 = arith.constant 0 : i32
    return %c0_i32, %c0_i32_0 : i32, i32
  }
  func.func @transform_2(%arg0: i32) -> (i32, i32) {
    %c0_i32 = arith.constant 0 : i32
    %c0_i32_0 = arith.constant 0 : i32
    %c0_i32_1 = arith.constant 0 : i32
    return %c0_i32, %c0_i32_0 : i32, i32
  }
  func.func @transform_3(%arg0: i32) -> (i32, i32) {
    %c0_i32 = arith.constant 0 : i32
    %c0_i32_0 = arith.constant 0 : i32
    return %arg0, %c0_i32 : i32, i32
  }
}

module attributes {stable_mosaic.version = 11 : i64} {
  func.func @_conv_bn_ds_kernel(%arg0: i32, %arg1: memref<16x640xbf16, #tpu.memory_space<vmem>>, %arg2: memref<640x128xbf16, #tpu.memory_space<vmem>>, %arg3: memref<1x128xf32, #tpu.memory_space<vmem>>, %arg4: memref<16x128xbf16, #tpu.memory_space<vmem>>, %arg5: memref<128x128xbf16, #tpu.memory_space<vmem>>, %arg6: memref<1x128xf32, #tpu.memory_space<vmem>>, %arg7: memref<16x128xf32, #tpu.memory_space<vmem>>) attributes {dimension_semantics = [#tpu.dimension_semantics<parallel>], iteration_bounds = array<i64: 1>, scalar_prefetch = 0 : i64, scratch_operands = 0 : i64, tpu.core_type = #tpu.core_type<tc>, window_params = [{transform_indices = @transform_0, window_bounds = array<i64: 16, 640>}, {pipeline_mode = #tpu.pipeline_mode<synchronous>, transform_indices = @transform_1, window_bounds = array<i64: 640, 128>}, {pipeline_mode = #tpu.pipeline_mode<synchronous>, transform_indices = @transform_2, window_bounds = array<i64: 1, 128>}, {transform_indices = @transform_3, window_bounds = array<i64: 16, 128>}, {pipeline_mode = #tpu.pipeline_mode<synchronous>, transform_indices = @transform_4, window_bounds = array<i64: 128, 128>}, {pipeline_mode = #tpu.pipeline_mode<synchronous>, transform_indices = @transform_5, window_bounds = array<i64: 1, 128>}, {transform_indices = @transform_6, window_bounds = array<i64: 16, 128>}]} {
    %c0 = arith.constant 0 : index
    %c0_0 = arith.constant 0 : index
    %0 = vector.load %arg1[%c0, %c0_0] : memref<16x640xbf16, #tpu.memory_space<vmem>>, vector<16x640xbf16>
    %c0_1 = arith.constant 0 : index
    %c0_2 = arith.constant 0 : index
    %1 = vector.load %arg2[%c0_1, %c0_2] : memref<640x128xbf16, #tpu.memory_space<vmem>>, vector<640x128xbf16>
    %cst = arith.constant dense<0.000000e+00> : vector<16x128xf32>
    %2 = tpu.matmul %0, %1, %cst {dimension_numbers = #tpu.dot_dimension_numbers<[1], [0], [0], [1], [0, 0, 1, 1], [], []>} : vector<16x640xbf16>, vector<640x128xbf16>, vector<16x128xf32> -> vector<16x128xf32>
    %c0_3 = arith.constant 0 : index
    %c0_4 = arith.constant 0 : index
    %3 = vector.load %arg3[%c0_3, %c0_4] : memref<1x128xf32, #tpu.memory_space<vmem>>, vector<1x128xf32>
    %4 = vector.broadcast %3 : vector<1x128xf32> to vector<16x128xf32>
    %5 = arith.addf %2, %4 : vector<16x128xf32>
    %c0_5 = arith.constant 0 : index
    %c0_6 = arith.constant 0 : index
    %6 = vector.load %arg4[%c0_5, %c0_6] : memref<16x128xbf16, #tpu.memory_space<vmem>>, vector<16x128xbf16>
    %c0_7 = arith.constant 0 : index
    %c0_8 = arith.constant 0 : index
    %7 = vector.load %arg5[%c0_7, %c0_8] : memref<128x128xbf16, #tpu.memory_space<vmem>>, vector<128x128xbf16>
    %cst_9 = arith.constant dense<0.000000e+00> : vector<16x128xf32>
    %8 = tpu.matmul %6, %7, %cst_9 {dimension_numbers = #tpu.dot_dimension_numbers<[1], [0], [0], [1], [0, 0, 1, 1], [], []>} : vector<16x128xbf16>, vector<128x128xbf16>, vector<16x128xf32> -> vector<16x128xf32>
    %c0_10 = arith.constant 0 : index
    %c0_11 = arith.constant 0 : index
    %9 = vector.load %arg6[%c0_10, %c0_11] : memref<1x128xf32, #tpu.memory_space<vmem>>, vector<1x128xf32>
    %10 = vector.broadcast %9 : vector<1x128xf32> to vector<16x128xf32>
    %11 = arith.addf %8, %10 : vector<16x128xf32>
    %12 = arith.addf %5, %11 : vector<16x128xf32>
    %cst_12 = arith.constant 0.000000e+00 : f32
    %13 = vector.broadcast %cst_12 : f32 to vector<16x128xf32>
    %14 = arith.maximumf %12, %13 : vector<16x128xf32>
    %c0_13 = arith.constant 0 : index
    %c0_14 = arith.constant 0 : index
    %15 = vector.load %arg7[%c0_13, %c0_14] : memref<16x128xf32, #tpu.memory_space<vmem>>, vector<16x128xf32>
    tpu.vector_store %arg7[%c0_13, %c0_14], %14 {strides = array<i32>} : memref<16x128xf32, #tpu.memory_space<vmem>>, vector<16x128xf32>,
    return
  }
  func.func @transform_0(%arg0: i32) -> (i32, i32) {
    %c0_i32 = arith.constant 0 : i32
    %c0_i32_0 = arith.constant 0 : i32
    return %arg0, %c0_i32 : i32, i32
  }
  func.func @transform_1(%arg0: i32) -> (i32, i32) {
    %c0_i32 = arith.constant 0 : i32
    %c0_i32_0 = arith.constant 0 : i32
    %c0_i32_1 = arith.constant 0 : i32
    return %c0_i32, %c0_i32_0 : i32, i32
  }
  func.func @transform_2(%arg0: i32) -> (i32, i32) {
    %c0_i32 = arith.constant 0 : i32
    %c0_i32_0 = arith.constant 0 : i32
    %c0_i32_1 = arith.constant 0 : i32
    return %c0_i32, %c0_i32_0 : i32, i32
  }
  func.func @transform_3(%arg0: i32) -> (i32, i32) {
    %c0_i32 = arith.constant 0 : i32
    %c0_i32_0 = arith.constant 0 : i32
    return %arg0, %c0_i32 : i32, i32
  }
  func.func @transform_4(%arg0: i32) -> (i32, i32) {
    %c0_i32 = arith.constant 0 : i32
    %c0_i32_0 = arith.constant 0 : i32
    %c0_i32_1 = arith.constant 0 : i32
    return %c0_i32, %c0_i32_0 : i32, i32
  }
  func.func @transform_5(%arg0: i32) -> (i32, i32) {
    %c0_i32 = arith.constant 0 : i32
    %c0_i32_0 = arith.constant 0 : i32
    %c0_i32_1 = arith.constant 0 : i32
    return %c0_i32, %c0_i32_0 : i32, i32
  }
  func.func @transform_6(%arg0: i32) -> (i32, i32) {
    %c0_i32 = arith.constant 0 : i32
    %c0_i32_0 = arith.constant 0 : i32
    return %arg0, %c0_i32 : i32, i32
  }
}

module attributes {stable_mosaic.version = 11 : i64} {
  func.func @_conv_bn_res_kernel(%arg0: i32, %arg1: memref<16x640xbf16, #tpu.memory_space<vmem>>, %arg2: memref<640x128xbf16, #tpu.memory_space<vmem>>, %arg3: memref<1x128xf32, #tpu.memory_space<vmem>>, %arg4: memref<16x128xf32, #tpu.memory_space<vmem>>, %arg5: memref<16x128xf32, #tpu.memory_space<vmem>>) attributes {dimension_semantics = [#tpu.dimension_semantics<parallel>], iteration_bounds = array<i64: 1>, scalar_prefetch = 0 : i64, scratch_operands = 0 : i64, tpu.core_type = #tpu.core_type<tc>, window_params = [{transform_indices = @transform_0, window_bounds = array<i64: 16, 640>}, {pipeline_mode = #tpu.pipeline_mode<synchronous>, transform_indices = @transform_1, window_bounds = array<i64: 640, 128>}, {pipeline_mode = #tpu.pipeline_mode<synchronous>, transform_indices = @transform_2, window_bounds = array<i64: 1, 128>}, {transform_indices = @transform_3, window_bounds = array<i64: 16, 128>}, {transform_indices = @transform_4, window_bounds = array<i64: 16, 128>}]} {
    %c0 = arith.constant 0 : index
    %c0_0 = arith.constant 0 : index
    %0 = vector.load %arg1[%c0, %c0_0] : memref<16x640xbf16, #tpu.memory_space<vmem>>, vector<16x640xbf16>
    %c0_1 = arith.constant 0 : index
    %c0_2 = arith.constant 0 : index
    %1 = vector.load %arg2[%c0_1, %c0_2] : memref<640x128xbf16, #tpu.memory_space<vmem>>, vector<640x128xbf16>
    %cst = arith.constant dense<0.000000e+00> : vector<16x128xf32>
    %2 = tpu.matmul %0, %1, %cst {dimension_numbers = #tpu.dot_dimension_numbers<[1], [0], [0], [1], [0, 0, 1, 1], [], []>} : vector<16x640xbf16>, vector<640x128xbf16>, vector<16x128xf32> -> vector<16x128xf32>
    %c0_3 = arith.constant 0 : index
    %c0_4 = arith.constant 0 : index
    %3 = vector.load %arg3[%c0_3, %c0_4] : memref<1x128xf32, #tpu.memory_space<vmem>>, vector<1x128xf32>
    %4 = vector.broadcast %3 : vector<1x128xf32> to vector<16x128xf32>
    %5 = arith.addf %2, %4 : vector<16x128xf32>
    %c0_5 = arith.constant 0 : index
    %c0_6 = arith.constant 0 : index
    %6 = vector.load %arg4[%c0_5, %c0_6] : memref<16x128xf32, #tpu.memory_space<vmem>>, vector<16x128xf32>
    %7 = arith.addf %5, %6 : vector<16x128xf32>
    %cst_7 = arith.constant 0.000000e+00 : f32
    %8 = vector.broadcast %cst_7 : f32 to vector<16x128xf32>
    %9 = arith.maximumf %7, %8 : vector<16x128xf32>
    %c0_8 = arith.constant 0 : index
    %c0_9 = arith.constant 0 : index
    %10 = vector.load %arg5[%c0_8, %c0_9] : memref<16x128xf32, #tpu.memory_space<vmem>>, vector<16x128xf32>
    tpu.vector_store %arg5[%c0_8, %c0_9], %9 {strides = array<i32>} : memref<16x128xf32, #tpu.memory_space<vmem>>, vector<16x128xf32>,
    return
  }
  func.func @transform_0(%arg0: i32) -> (i32, i32) {
    %c0_i32 = arith.constant 0 : i32
    %c0_i32_0 = arith.constant 0 : i32
    return %arg0, %c0_i32 : i32, i32
  }
  func.func @transform_1(%arg0: i32) -> (i32, i32) {
    %c0_i32 = arith.constant 0 : i32
    %c0_i32_0 = arith.constant 0 : i32
    %c0_i32_1 = arith.constant 0 : i32
    return %c0_i32, %c0_i32_0 : i32, i32
  }
  func.func @transform_2(%arg0: i32) -> (i32, i32) {
    %c0_i32 = arith.constant 0 : i32
    %c0_i32_0 = arith.constant 0 : i32
    %c0_i32_1 = arith.constant 0 : i32
    return %c0_i32, %c0_i32_0 : i32, i32
  }
  func.func @transform_3(%arg0: i32) -> (i32, i32) {
    %c0_i32 = arith.constant 0 : i32
    %c0_i32_0 = arith.constant 0 : i32
    return %arg0, %c0_i32 : i32, i32
  }
  func.func @transform_4(%arg0: i32) -> (i32, i32) {
    %c0_i32 = arith.constant 0 : i32
    %c0_i32_0 = arith.constant 0 : i32
    return %arg0, %c0_i32 : i32, i32
  }
}

module attributes {stable_mosaic.version = 11 : i64} {
  func.func @_conv_bn_ds_kernel(%arg0: i32, %arg1: memref<16x1152xbf16, #tpu.memory_space<vmem>>, %arg2: memref<1152x128xbf16, #tpu.memory_space<vmem>>, %arg3: memref<1x128xf32, #tpu.memory_space<vmem>>, %arg4: memref<16x128xbf16, #tpu.memory_space<vmem>>, %arg5: memref<128x128xbf16, #tpu.memory_space<vmem>>, %arg6: memref<1x128xf32, #tpu.memory_space<vmem>>, %arg7: memref<16x128xf32, #tpu.memory_space<vmem>>) attributes {dimension_semantics = [#tpu.dimension_semantics<parallel>], iteration_bounds = array<i64: 1>, scalar_prefetch = 0 : i64, scratch_operands = 0 : i64, tpu.core_type = #tpu.core_type<tc>, window_params = [{transform_indices = @transform_0, window_bounds = array<i64: 16, 1152>}, {pipeline_mode = #tpu.pipeline_mode<synchronous>, transform_indices = @transform_1, window_bounds = array<i64: 1152, 128>}, {pipeline_mode = #tpu.pipeline_mode<synchronous>, transform_indices = @transform_2, window_bounds = array<i64: 1, 128>}, {transform_indices = @transform_3, window_bounds = array<i64: 16, 128>}, {pipeline_mode = #tpu.pipeline_mode<synchronous>, transform_indices = @transform_4, window_bounds = array<i64: 128, 128>}, {pipeline_mode = #tpu.pipeline_mode<synchronous>, transform_indices = @transform_5, window_bounds = array<i64: 1, 128>}, {transform_indices = @transform_6, window_bounds = array<i64: 16, 128>}]} {
    %c0 = arith.constant 0 : index
    %c0_0 = arith.constant 0 : index
    %0 = vector.load %arg1[%c0, %c0_0] : memref<16x1152xbf16, #tpu.memory_space<vmem>>, vector<16x1152xbf16>
    %c0_1 = arith.constant 0 : index
    %c0_2 = arith.constant 0 : index
    %1 = vector.load %arg2[%c0_1, %c0_2] : memref<1152x128xbf16, #tpu.memory_space<vmem>>, vector<1152x128xbf16>
    %cst = arith.constant dense<0.000000e+00> : vector<16x128xf32>
    %2 = tpu.matmul %0, %1, %cst {dimension_numbers = #tpu.dot_dimension_numbers<[1], [0], [0], [1], [0, 0, 1, 1], [], []>} : vector<16x1152xbf16>, vector<1152x128xbf16>, vector<16x128xf32> -> vector<16x128xf32>
    %c0_3 = arith.constant 0 : index
    %c0_4 = arith.constant 0 : index
    %3 = vector.load %arg3[%c0_3, %c0_4] : memref<1x128xf32, #tpu.memory_space<vmem>>, vector<1x128xf32>
    %4 = vector.broadcast %3 : vector<1x128xf32> to vector<16x128xf32>
    %5 = arith.addf %2, %4 : vector<16x128xf32>
    %c0_5 = arith.constant 0 : index
    %c0_6 = arith.constant 0 : index
    %6 = vector.load %arg4[%c0_5, %c0_6] : memref<16x128xbf16, #tpu.memory_space<vmem>>, vector<16x128xbf16>
    %c0_7 = arith.constant 0 : index
    %c0_8 = arith.constant 0 : index
    %7 = vector.load %arg5[%c0_7, %c0_8] : memref<128x128xbf16, #tpu.memory_space<vmem>>, vector<128x128xbf16>
    %cst_9 = arith.constant dense<0.000000e+00> : vector<16x128xf32>
    %8 = tpu.matmul %6, %7, %cst_9 {dimension_numbers = #tpu.dot_dimension_numbers<[1], [0], [0], [1], [0, 0, 1, 1], [], []>} : vector<16x128xbf16>, vector<128x128xbf16>, vector<16x128xf32> -> vector<16x128xf32>
    %c0_10 = arith.constant 0 : index
    %c0_11 = arith.constant 0 : index
    %9 = vector.load %arg6[%c0_10, %c0_11] : memref<1x128xf32, #tpu.memory_space<vmem>>, vector<1x128xf32>
    %10 = vector.broadcast %9 : vector<1x128xf32> to vector<16x128xf32>
    %11 = arith.addf %8, %10 : vector<16x128xf32>
    %12 = arith.addf %5, %11 : vector<16x128xf32>
    %cst_12 = arith.constant 0.000000e+00 : f32
    %13 = vector.broadcast %cst_12 : f32 to vector<16x128xf32>
    %14 = arith.maximumf %12, %13 : vector<16x128xf32>
    %c0_13 = arith.constant 0 : index
    %c0_14 = arith.constant 0 : index
    %15 = vector.load %arg7[%c0_13, %c0_14] : memref<16x128xf32, #tpu.memory_space<vmem>>, vector<16x128xf32>
    tpu.vector_store %arg7[%c0_13, %c0_14], %14 {strides = array<i32>} : memref<16x128xf32, #tpu.memory_space<vmem>>, vector<16x128xf32>,
    return
  }
  func.func @transform_0(%arg0: i32) -> (i32, i32) {
    %c0_i32 = arith.constant 0 : i32
    %c0_i32_0 = arith.constant 0 : i32
    return %arg0, %c0_i32 : i32, i32
  }
  func.func @transform_1(%arg0: i32) -> (i32, i32) {
    %c0_i32 = arith.constant 0 : i32
    %c0_i32_0 = arith.constant 0 : i32
    %c0_i32_1 = arith.constant 0 : i32
    return %c0_i32, %c0_i32_0 : i32, i32
  }
  func.func @transform_2(%arg0: i32) -> (i32, i32) {
    %c0_i32 = arith.constant 0 : i32
    %c0_i32_0 = arith.constant 0 : i32
    %c0_i32_1 = arith.constant 0 : i32
    return %c0_i32, %c0_i32_0 : i32, i32
  }
  func.func @transform_3(%arg0: i32) -> (i32, i32) {
    %c0_i32 = arith.constant 0 : i32
    %c0_i32_0 = arith.constant 0 : i32
    return %arg0, %c0_i32 : i32, i32
  }
  func.func @transform_4(%arg0: i32) -> (i32, i32) {
    %c0_i32 = arith.constant 0 : i32
    %c0_i32_0 = arith.constant 0 : i32
    %c0_i32_1 = arith.constant 0 : i32
    return %c0_i32, %c0_i32_0 : i32, i32
  }
  func.func @transform_5(%arg0: i32) -> (i32, i32) {
    %c0_i32 = arith.constant 0 : i32
    %c0_i32_0 = arith.constant 0 : i32
    %c0_i32_1 = arith.constant 0 : i32
    return %c0_i32, %c0_i32_0 : i32, i32
  }
  func.func @transform_6(%arg0: i32) -> (i32, i32) {
    %c0_i32 = arith.constant 0 : i32
    %c0_i32_0 = arith.constant 0 : i32
    return %arg0, %c0_i32 : i32, i32
  }
}

module attributes {stable_mosaic.version = 11 : i64} {
  func.func @_conv_bn_kernel(%arg0: i32, %arg1: memref<16x1152xbf16, #tpu.memory_space<vmem>>, %arg2: memref<1152x128xbf16, #tpu.memory_space<vmem>>, %arg3: memref<1x128xf32, #tpu.memory_space<vmem>>, %arg4: memref<16x128xf32, #tpu.memory_space<vmem>>) attributes {dimension_semantics = [#tpu.dimension_semantics<parallel>], iteration_bounds = array<i64: 1>, scalar_prefetch = 0 : i64, scratch_operands = 0 : i64, tpu.core_type = #tpu.core_type<tc>, window_params = [{transform_indices = @transform_0, window_bounds = array<i64: 16, 1152>}, {pipeline_mode = #tpu.pipeline_mode<synchronous>, transform_indices = @transform_1, window_bounds = array<i64: 1152, 128>}, {pipeline_mode = #tpu.pipeline_mode<synchronous>, transform_indices = @transform_2, window_bounds = array<i64: 1, 128>}, {transform_indices = @transform_3, window_bounds = array<i64: 16, 128>}]} {
    %c0 = arith.constant 0 : index
    %c0_0 = arith.constant 0 : index
    %0 = vector.load %arg1[%c0, %c0_0] : memref<16x1152xbf16, #tpu.memory_space<vmem>>, vector<16x1152xbf16>
    %c0_1 = arith.constant 0 : index
    %c0_2 = arith.constant 0 : index
    %1 = vector.load %arg2[%c0_1, %c0_2] : memref<1152x128xbf16, #tpu.memory_space<vmem>>, vector<1152x128xbf16>
    %cst = arith.constant dense<0.000000e+00> : vector<16x128xf32>
    %2 = tpu.matmul %0, %1, %cst {dimension_numbers = #tpu.dot_dimension_numbers<[1], [0], [0], [1], [0, 0, 1, 1], [], []>} : vector<16x1152xbf16>, vector<1152x128xbf16>, vector<16x128xf32> -> vector<16x128xf32>
    %c0_3 = arith.constant 0 : index
    %c0_4 = arith.constant 0 : index
    %3 = vector.load %arg3[%c0_3, %c0_4] : memref<1x128xf32, #tpu.memory_space<vmem>>, vector<1x128xf32>
    %4 = vector.broadcast %3 : vector<1x128xf32> to vector<16x128xf32>
    %5 = arith.addf %2, %4 : vector<16x128xf32>
    %cst_5 = arith.constant 0.000000e+00 : f32
    %6 = vector.broadcast %cst_5 : f32 to vector<16x128xf32>
    %7 = arith.maximumf %5, %6 : vector<16x128xf32>
    %c0_6 = arith.constant 0 : index
    %c0_7 = arith.constant 0 : index
    %8 = vector.load %arg4[%c0_6, %c0_7] : memref<16x128xf32, #tpu.memory_space<vmem>>, vector<16x128xf32>
    tpu.vector_store %arg4[%c0_6, %c0_7], %7 {strides = array<i32>} : memref<16x128xf32, #tpu.memory_space<vmem>>, vector<16x128xf32>,
    return
  }
  func.func @transform_0(%arg0: i32) -> (i32, i32) {
    %c0_i32 = arith.constant 0 : i32
    %c0_i32_0 = arith.constant 0 : i32
    return %arg0, %c0_i32 : i32, i32
  }
  func.func @transform_1(%arg0: i32) -> (i32, i32) {
    %c0_i32 = arith.constant 0 : i32
    %c0_i32_0 = arith.constant 0 : i32
    %c0_i32_1 = arith.constant 0 : i32
    return %c0_i32, %c0_i32_0 : i32, i32
  }
  func.func @transform_2(%arg0: i32) -> (i32, i32) {
    %c0_i32 = arith.constant 0 : i32
    %c0_i32_0 = arith.constant 0 : i32
    %c0_i32_1 = arith.constant 0 : i32
    return %c0_i32, %c0_i32_0 : i32, i32
  }
  func.func @transform_3(%arg0: i32) -> (i32, i32) {
    %c0_i32 = arith.constant 0 : i32
    %c0_i32_0 = arith.constant 0 : i32
    return %arg0, %c0_i32 : i32, i32
  }
}

module attributes {stable_mosaic.version = 11 : i64} {
  func.func @_conv_bn_res_kernel(%arg0: i32, %arg1: memref<16x1152xbf16, #tpu.memory_space<vmem>>, %arg2: memref<1152x128xbf16, #tpu.memory_space<vmem>>, %arg3: memref<1x128xf32, #tpu.memory_space<vmem>>, %arg4: memref<16x128xf32, #tpu.memory_space<vmem>>, %arg5: memref<16x128xf32, #tpu.memory_space<vmem>>) attributes {dimension_semantics = [#tpu.dimension_semantics<parallel>], iteration_bounds = array<i64: 1>, scalar_prefetch = 0 : i64, scratch_operands = 0 : i64, tpu.core_type = #tpu.core_type<tc>, window_params = [{transform_indices = @transform_0, window_bounds = array<i64: 16, 1152>}, {pipeline_mode = #tpu.pipeline_mode<synchronous>, transform_indices = @transform_1, window_bounds = array<i64: 1152, 128>}, {pipeline_mode = #tpu.pipeline_mode<synchronous>, transform_indices = @transform_2, window_bounds = array<i64: 1, 128>}, {transform_indices = @transform_3, window_bounds = array<i64: 16, 128>}, {transform_indices = @transform_4, window_bounds = array<i64: 16, 128>}]} {
    %c0 = arith.constant 0 : index
    %c0_0 = arith.constant 0 : index
    %0 = vector.load %arg1[%c0, %c0_0] : memref<16x1152xbf16, #tpu.memory_space<vmem>>, vector<16x1152xbf16>
    %c0_1 = arith.constant 0 : index
    %c0_2 = arith.constant 0 : index
    %1 = vector.load %arg2[%c0_1, %c0_2] : memref<1152x128xbf16, #tpu.memory_space<vmem>>, vector<1152x128xbf16>
    %cst = arith.constant dense<0.000000e+00> : vector<16x128xf32>
    %2 = tpu.matmul %0, %1, %cst {dimension_numbers = #tpu.dot_dimension_numbers<[1], [0], [0], [1], [0, 0, 1, 1], [], []>} : vector<16x1152xbf16>, vector<1152x128xbf16>, vector<16x128xf32> -> vector<16x128xf32>
    %c0_3 = arith.constant 0 : index
    %c0_4 = arith.constant 0 : index
    %3 = vector.load %arg3[%c0_3, %c0_4] : memref<1x128xf32, #tpu.memory_space<vmem>>, vector<1x128xf32>
    %4 = vector.broadcast %3 : vector<1x128xf32> to vector<16x128xf32>
    %5 = arith.addf %2, %4 : vector<16x128xf32>
    %c0_5 = arith.constant 0 : index
    %c0_6 = arith.constant 0 : index
    %6 = vector.load %arg4[%c0_5, %c0_6] : memref<16x128xf32, #tpu.memory_space<vmem>>, vector<16x128xf32>
    %7 = arith.addf %5, %6 : vector<16x128xf32>
    %cst_7 = arith.constant 0.000000e+00 : f32
    %8 = vector.broadcast %cst_7 : f32 to vector<16x128xf32>
    %9 = arith.maximumf %7, %8 : vector<16x128xf32>
    %c0_8 = arith.constant 0 : index
    %c0_9 = arith.constant 0 : index
    %10 = vector.load %arg5[%c0_8, %c0_9] : memref<16x128xf32, #tpu.memory_space<vmem>>, vector<16x128xf32>
    tpu.vector_store %arg5[%c0_8, %c0_9], %9 {strides = array<i32>} : memref<16x128xf32, #tpu.memory_space<vmem>>, vector<16x128xf32>,
    return
  }
  func.func @transform_0(%arg0: i32) -> (i32, i32) {
    %c0_i32 = arith.constant 0 : i32
    %c0_i32_0 = arith.constant 0 : i32
    return %arg0, %c0_i32 : i32, i32
  }
  func.func @transform_1(%arg0: i32) -> (i32, i32) {
    %c0_i32 = arith.constant 0 : i32
    %c0_i32_0 = arith.constant 0 : i32
    %c0_i32_1 = arith.constant 0 : i32
    return %c0_i32, %c0_i32_0 : i32, i32
  }
  func.func @transform_2(%arg0: i32) -> (i32, i32) {
    %c0_i32 = arith.constant 0 : i32
    %c0_i32_0 = arith.constant 0 : i32
    %c0_i32_1 = arith.constant 0 : i32
    return %c0_i32, %c0_i32_0 : i32, i32
  }
  func.func @transform_3(%arg0: i32) -> (i32, i32) {
    %c0_i32 = arith.constant 0 : i32
    %c0_i32_0 = arith.constant 0 : i32
    return %arg0, %c0_i32 : i32, i32
  }
  func.func @transform_4(%arg0: i32) -> (i32, i32) {
    %c0_i32 = arith.constant 0 : i32
    %c0_i32_0 = arith.constant 0 : i32
    return %arg0, %c0_i32 : i32, i32
  }
}

</mosaic_0001>

<bundles_post_ra>
// kernel: resnet_backbone.18
= control target key start
LH: loop header
LB: loop body
LE: loop exit
PB: predicated region body
PF: predicated region fallthrough
CT: control target
= control target key end

     0   :  { %v1181_v0 = vmov 0   ;;  %s1735_s1 = inlined_call_operand.vmem [shape: bf16[256,128], index: 1, kind: input, shape index: {}]   ;;  %s1736_s0 = inlined_call_operand.vmem [shape: bf16[512,256], index: 0, kind: input, shape index: {}]   ;;  %s1737_s2 = inlined_call_operand.vmem [shape: f32[1,128], index: 2, kind: input, shape index: {}]   ;;  %s1738_s3 = inlined_call_operand.vmem [shape: f32[512,128], index: 3, kind: output, shape index: {}]  }
   0x1   :  { %534 = vmatprep.subr.bf16.mxu0 %v1181_v0  ;;  %1036 = vmatprep.subr.bf16.mxu1 %v1181_v0  ;;  %v1069_v1 = vld [vmem:[%s1735_s1] sm:$0xff]   ;;  %v1070_v2 = vld [vmem:[%s1735_s1 + $0x8] sm:$0xff]   ;;  %v1071_v3 = vld [vmem:[%s1735_s1 + $0x10] sm:$0xff]  }
   0x2   :  { %535 = vmatpush1.bf16.msra.mxu0 %v1069_v1  ;;  %1052 = vmatpush1.bf16.msra.mxu1 %v1069_v1  ;;  %v1072_v4 = vld [vmem:[%s1735_s1 + $0x18] sm:$0xff]   ;;  %v1073_v5 = vld [vmem:[%s1735_s1 + $0x20] sm:$0xff]   ;;  %v1074_v7 = vld [vmem:[%s1735_s1 + $0x28] sm:$0xff]  }
   0x3   :  { %536 = vmatprep.subr.bf16.mxu0 %v1181_v0  ;;  %1037 = vmatprep.subr.bf16.mxu1 %v1181_v0  ;;  %v1087_v6 = vld [vmem:[%s1736_s0 + $0x4] ss:$8 sps:$4 sm:$0xff]   ;;  %v1075_v9 = vld [vmem:[%s1735_s1 + $0x30] sm:$0xff]   ;;  %v1076_v10 = vld [vmem:[%s1735_s1 + $0x38] sm:$0xff]  }
   0x4   :  { %v1090_v8 = vld [vmem:[%s1736_s0 + $0x104] ss:$8 sps:$4 sm:$0xff]   ;;  %566 = vmatprep.mubr.bf16.mxu0 %v1087_v6  ;;  %v1079_v13 = vld [vmem:[%s1735_s1 + $0x50] sm:$0xff]   ;;  %v1080_v14 = vld [vmem:[%s1735_s1 + $0x58] sm:$0xff]  }
   0x5   :  { %694 = vmatprep.mubr.bf16.mxu1 %v1090_v8  ;;  %v1077_v11 = vld [vmem:[%s1735_s1 + $0x40] sm:$0xff]   ;;  %v1078_v12 = vld [vmem:[%s1735_s1 + $0x48] sm:$0xff]   ;;  %v1083_v17 = vld [vmem:[%s1735_s1 + $0x70] sm:$0xff]  }
   0x6   :  { %537 = vmatpush1.bf16.msra.mxu0 %v1070_v2  ;;  %1053 = vmatpush1.bf16.msra.mxu1 %v1070_v2  ;;  %v1081_v15 = vld [vmem:[%s1735_s1 + $0x60] sm:$0xff]   ;;  %v1082_v16 = vld [vmem:[%s1735_s1 + $0x68] sm:$0xff]   ;;  %v1084_v18 = vld [vmem:[%s1735_s1 + $0x78] sm:$0xff]  }
   0x7   :  { %538 = vmatprep.subr.bf16.mxu0 %v1181_v0  ;;  %1038 = vmatprep.subr.bf16.mxu1 %v1181_v0  ;;  %v1085_v19 = vld [vmem:[%s1736_s0] ss:$8 sps:$4 sm:$0xff]   ;;  %v1091_v21 = vld [vmem:[%s1736_s0 + $0x14] ss:$8 sps:$4 sm:$0xff]   ;;  %v1095_v23 = vld [vmem:[%s1736_s0 + $0x10] ss:$8 sps:$4 sm:$0xff]  }
   0x8   :  { %v1088_v20 = vld [vmem:[%s1736_s0 + $0x100] ss:$8 sps:$4 sm:$0xff]   ;;  %v1093_v22 = vld [vmem:[%s1736_s0 + $0x114] ss:$8 sps:$4 sm:$0xff]   ;;  %v1096_v24 = vld [vmem:[%s1736_s0 + $0x110] ss:$8 sps:$4 sm:$0xff]  }
   0x9   :  { %v1097_v25 = vld [vmem:[%s1736_s0 + $0x24] ss:$8 sps:$4 sm:$0xff]   ;;  %v1101_v27 = vld [vmem:[%s1736_s0 + $0x20] ss:$8 sps:$4 sm:$0xff]   ;;  %v1103_v29 = vld [vmem:[%s1736_s0 + $0x34] ss:$8 sps:$4 sm:$0xff]  }
   0xa   :  { %539 = vmatpush1.bf16.msra.mxu0 %v1071_v3  ;;  %1054 = vmatpush1.bf16.msra.mxu1 %v1071_v3  ;;  %v1099_v26 = vld [vmem:[%s1736_s0 + $0x124] ss:$8 sps:$4 sm:$0xff]   ;;  %v1102_v28 = vld [vmem:[%s1736_s0 + $0x120] ss:$8 sps:$4 sm:$0xff]   ;;  %v1105_v30 = vld [vmem:[%s1736_s0 + $0x134] ss:$8 sps:$4 sm:$0xff]  }
   0xb   :  { %540 = vmatprep.subr.bf16.mxu0 %v1181_v0  ;;  %1039 = vmatprep.subr.bf16.mxu1 %v1181_v0  ;;  %v1107_v31 = vld [vmem:[%s1736_s0 + $0x30] ss:$8 sps:$4 sm:$0xff]   ;;  %v1109_v33 = vld [vmem:[%s1736_s0 + $0x44] ss:$8 sps:$4 sm:$0xff]   ;;  %v1113_v35 = vld [vmem:[%s1736_s0 + $0x40] ss:$8 sps:$4 sm:$0xff]  }
   0xc   :  { %v1108_v32 = vld [vmem:[%s1736_s0 + $0x130] ss:$8 sps:$4 sm:$0xff]   ;;  %v1111_v34 = vld [vmem:[%s1736_s0 + $0x144] ss:$8 sps:$4 sm:$0xff]   ;;  %v1114_v36 = vld [vmem:[%s1736_s0 + $0x140] ss:$8 sps:$4 sm:$0xff]  }
   0xd   :  { %v1115_v37 = vld [vmem:[%s1736_s0 + $0x54] ss:$8 sps:$4 sm:$0xff]   ;;  %v1119_v39 = vld [vmem:[%s1736_s0 + $0x50] ss:$8 sps:$4 sm:$0xff]   ;;  %v1121_v41 = vld [vmem:[%s1736_s0 + $0x64] ss:$8 sps:$4 sm:$0xff]  }
   0xe   :  { %541 = vmatpush1.bf16.msra.mxu0 %v1072_v4  ;;  %1055 = vmatpush1.bf16.msra.mxu1 %v1072_v4  ;;  %v1117_v38 = vld [vmem:[%s1736_s0 + $0x154] ss:$8 sps:$4 sm:$0xff]   ;;  %v1120_v40 = vld [vmem:[%s1736_s0 + $0x150] ss:$8 sps:$4 sm:$0xff]   ;;  %v1123_v42 = vld [vmem:[%s1736_s0 + $0x164] ss:$8 sps:$4 sm:$0xff]  }
   0xf   :  { %542 = vmatprep.subr.bf16.mxu0 %v1181_v0  ;;  %1040 = vmatprep.subr.bf16.mxu1 %v1181_v0  ;;  %v1125_v43 = vld [vmem:[%s1736_s0 + $0x60] ss:$8 sps:$4 sm:$0xff]   ;;  %v1127_v45 = vld [vmem:[%s1736_s0 + $0x74] ss:$8 sps:$4 sm:$0xff]   ;;  %v1131_v47 = vld [vmem:[%s1736_s0 + $0x70] ss:$8 sps:$4 sm:$0xff]  }
  0x10   :  { %v1126_v44 = vld [vmem:[%s1736_s0 + $0x160] ss:$8 sps:$4 sm:$0xff]   ;;  %v1129_v46 = vld [vmem:[%s1736_s0 + $0x174] ss:$8 sps:$4 sm:$0xff]   ;;  %v1132_v48 = vld [vmem:[%s1736_s0 + $0x170] ss:$8 sps:$4 sm:$0xff]  }
  0x11   :  { %v1133_v49 = vld [vmem:[%s1736_s0 + $0x84] ss:$8 sps:$4 sm:$0xff]   ;;  %v1137_v51 = vld [vmem:[%s1736_s0 + $0x80] ss:$8 sps:$4 sm:$0xff]   ;;  %v1139_v53 = vld [vmem:[%s1736_s0 + $0x94] ss:$8 sps:$4 sm:$0xff]  }
  0x12   :  { %543 = vmatpush1.bf16.msra.mxu0 %v1073_v5  ;;  %1056 = vmatpush1.bf16.msra.mxu1 %v1073_v5  ;;  %v1135_v50 = vld [vmem:[%s1736_s0 + $0x184] ss:$8 sps:$4 sm:$0xff]   ;;  %v1138_v52 = vld [vmem:[%s1736_s0 + $0x180] ss:$8 sps:$4 sm:$0xff]   ;;  %v1141_v54 = vld [vmem:[%s1736_s0 + $0x194] ss:$8 sps:$4 sm:$0xff]  }
  0x13   :  { %544 = vmatprep.subr.bf16.mxu0 %v1181_v0  ;;  %1041 = vmatprep.subr.bf16.mxu1 %v1181_v0  ;;  %v1143_v55 = vld [vmem:[%s1736_s0 + $0x90] ss:$8 sps:$4 sm:$0xff]   ;;  %v1145_v57 = vld [vmem:[%s1736_s0 + $0xa4] ss:$8 sps:$4 sm:$0xff]   ;;  %v1149_v59 = vld [vmem:[%s1736_s0 + $0xa0] ss:$8 sps:$4 sm:$0xff]  }
  0x14   :  { %v1144_v56 = vld [vmem:[%s1736_s0 + $0x190] ss:$8 sps:$4 sm:$0xff]   ;;  %v1147_v58 = vld [vmem:[%s1736_s0 + $0x1a4] ss:$8 sps:$4 sm:$0xff]   ;;  %v1150_v60 = vld [vmem:[%s1736_s0 + $0x1a0] ss:$8 sps:$4 sm:$0xff]  }
  0x15   :  { %v1151_v61 = vld [vmem:[%s1736_s0 + $0xb4] ss:$8 sps:$4 sm:$0xff]   ;;  %v1155_v63 = vld [vmem:[%s1736_s0 + $0xb0] ss:$8 sps:$4 sm:$0xff]   ;;  %v1157_v1 = vld [vmem:[%s1736_s0 + $0xc4] ss:$8 sps:$4 sm:$0xff]  }
  0x16   :  { %545 = vmatpush1.bf16.msra.mxu0 %v1074_v7  ;;  %1057 = vmatpush1.bf16.msra.mxu1 %v1074_v7  ;;  %v1153_v62 = vld [vmem:[%s1736_s0 + $0x1b4] ss:$8 sps:$4 sm:$0xff]   ;;  %v1159_v2 = vld [vmem:[%s1736_s0 + $0x1c4] ss:$8 sps:$4 sm:$0xff]   ;;  %v1161_v3 = vld [vmem:[%s1736_s0 + $0xc0] ss:$8 sps:$4 sm:$0xff]  }
  0x17   :  { %546 = vmatprep.subr.bf16.mxu0 %v1181_v0  ;;  %1042 = vmatprep.subr.bf16.mxu1 %v1181_v0  ;;  %v1162_v4 = vld [vmem:[%s1736_s0 + $0x1c0] ss:$8 sps:$4 sm:$0xff]   ;;  %v1163_v5 = vld [vmem:[%s1736_s0 + $0xd4] ss:$8 sps:$4 sm:$0xff]   ;;  %v1167_v7 = vld [vmem:[%s1736_s0 + $0xd0] ss:$8 sps:$4 sm:$0xff]  }
  0x18   :  { %v1165_v6 = vld [vmem:[%s1736_s0 + $0x1d4] ss:$8 sps:$4 sm:$0xff]   ;;  %v1168_v8 = vld [vmem:[%s1736_s0 + $0x1d0] ss:$8 sps:$4 sm:$0xff]  }
  0x1a   :  { %547 = vmatpush1.bf16.msra.mxu0 %v1075_v9  ;;  %1058 = vmatpush1.bf16.msra.mxu1 %v1075_v9  ;;  %v1169_v9 = vld [vmem:[%s1736_s0 + $0xe4] ss:$8 sps:$4 sm:$0xff]  }
  0x1b   :  { %548 = vmatprep.subr.bf16.mxu0 %v1181_v0  ;;  %1043 = vmatprep.subr.bf16.mxu1 %v1181_v0 }
  0x1e   :  { %549 = vmatpush1.bf16.msra.mxu0 %v1076_v10  ;;  %1059 = vmatpush1.bf16.msra.mxu1 %v1076_v10  ;;  %v1171_v10 = vld [vmem:[%s1736_s0 + $0x1e4] ss:$8 sps:$4 sm:$0xff]  }
  0x1f   :  { %550 = vmatprep.subr.bf16.mxu0 %v1181_v0  ;;  %1044 = vmatprep.subr.bf16.mxu1 %v1181_v0 }
  0x22   :  { %551 = vmatpush1.bf16.msra.mxu0 %v1077_v11  ;;  %1060 = vmatpush1.bf16.msra.mxu1 %v1077_v11  ;;  %v1173_v11 = vld [vmem:[%s1736_s0 + $0xe0] ss:$8 sps:$4 sm:$0xff]  }
  0x23   :  { %552 = vmatprep.subr.bf16.mxu0 %v1181_v0  ;;  %1045 = vmatprep.subr.bf16.mxu1 %v1181_v0 }
  0x26   :  { %553 = vmatpush1.bf16.msra.mxu0 %v1078_v12  ;;  %1061 = vmatpush1.bf16.msra.mxu1 %v1078_v12  ;;  %v1174_v12 = vld [vmem:[%s1736_s0 + $0x1e0] ss:$8 sps:$4 sm:$0xff]  }
  0x27   :  { %554 = vmatprep.subr.bf16.mxu0 %v1181_v0  ;;  %1046 = vmatprep.subr.bf16.mxu1 %v1181_v0 }
  0x2a   :  { %555 = vmatpush1.bf16.msra.mxu0 %v1079_v13  ;;  %1062 = vmatpush1.bf16.msra.mxu1 %v1079_v13  ;;  %v1175_v13 = vld [vmem:[%s1736_s0 + $0xf4] ss:$8 sps:$4 sm:$0xff]  }
  0x2b   :  { %556 = vmatprep.subr.bf16.mxu0 %v1181_v0  ;;  %1047 = vmatprep.subr.bf16.mxu1 %v1181_v0 }
  0x2e   :  { %557 = vmatpush1.bf16.msra.mxu0 %v1080_v14  ;;  %1063 = vmatpush1.bf16.msra.mxu1 %v1080_v14  ;;  %v1177_v14 = vld [vmem:[%s1736_s0 + $0x1f4] ss:$8 sps:$4 sm:$0xff]  }
  0x2f   :  { %558 = vmatprep.subr.bf16.mxu0 %v1181_v0  ;;  %1048 = vmatprep.subr.bf16.mxu1 %v1181_v0 }
  0x32   :  { %559 = vmatpush1.bf16.msra.mxu0 %v1081_v15  ;;  %1064 = vmatpush1.bf16.msra.mxu1 %v1081_v15  ;;  %v1179_v15 = vld [vmem:[%s1736_s0 + $0xf0] ss:$8 sps:$4 sm:$0xff]  }
  0x33   :  { %560 = vmatprep.subr.bf16.mxu0 %v1181_v0  ;;  %1049 = vmatprep.subr.bf16.mxu1 %v1181_v0 }
  0x36   :  { %561 = vmatpush1.bf16.msra.mxu0 %v1082_v16  ;;  %1065 = vmatpush1.bf16.msra.mxu1 %v1082_v16  ;;  %v1180_v16 = vld [vmem:[%s1736_s0 + $0x1f0] ss:$8 sps:$4 sm:$0xff]  }
  0x37   :  { %562 = vmatprep.subr.bf16.mxu0 %v1181_v0  ;;  %1050 = vmatprep.subr.bf16.mxu1 %v1181_v0 }
  0x3a   :  { %563 = vmatpush1.bf16.msra.mxu0 %v1083_v17  ;;  %1066 = vmatpush1.bf16.msra.mxu1 %v1083_v17  ;;  %v1477_v17 = vld [vmem:[%s1737_s2] ss:$0 sm:$0xff] }
  0x3b   :  { %564 = vmatprep.subr.bf16.mxu0 %v1181_v0  ;;  %1051 = vmatprep.subr.bf16.mxu1 %v1181_v0  ;;  %v1156_v0 = vld [vmem:[%s1736_s0 + $0x1b0] ss:$8 sps:$4 sm:$0xff]  }
  0x3e   :  { %565 = vmatpush1.bf16.msra.mxu0 %v1084_v18  ;;  %1067 = vmatpush1.bf16.msra.mxu1 %v1084_v18 }
  0x41   :  { %567 = vmatmul.mubr.bf16.vlgmr.msra.gmra.mrb[0].mxu0 %v1085_v19  ;;  %695 = vmatmul.mubr.bf16.vlgmr.msra.gmra.mrb[0].mxu1 %v1088_v20 }
  0x42   :  { %574 = vmatprep.mubr.bf16.mxu0 %v1091_v21  ;;  %702 = vmatprep.mubr.bf16.mxu1 %v1093_v22 }
  0x49   :  { %575 = vmatmul.mubr.bf16.gmra.mrb[4].mxu0 %v1095_v23  ;;  %703 = vmatmul.mubr.bf16.gmra.mrb[4].mxu1 %v1096_v24 }
  0x4a   :  { %582 = vmatprep.mubr.bf16.mxu0 %v1097_v25  ;;  %710 = vmatprep.mubr.bf16.mxu1 %v1099_v26 }
  0x51   :  { %583 = vmatmul.mubr.bf16.gmra.mrb[8].mxu0 %v1101_v27  ;;  %711 = vmatmul.mubr.bf16.gmra.mrb[8].mxu1 %v1102_v28 }
  0x52   :  { %590 = vmatprep.mubr.bf16.mxu0 %v1103_v29  ;;  %718 = vmatprep.mubr.bf16.mxu1 %v1105_v30 }
  0x59   :  { %591 = vmatmul.mubr.bf16.gmra.mrb[12].mxu0 %v1107_v31  ;;  %719 = vmatmul.mubr.bf16.gmra.mrb[12].mxu1 %v1108_v32 }
  0x5a   :  { %598 = vmatprep.mubr.bf16.mxu0 %v1109_v33  ;;  %726 = vmatprep.mubr.bf16.mxu1 %v1111_v34 }
  0x61   :  { %599 = vmatmul.mubr.bf16.gmra.mrb[16].mxu0 %v1113_v35  ;;  %727 = vmatmul.mubr.bf16.gmra.mrb[16].mxu1 %v1114_v36 }
  0x62   :  { %606 = vmatprep.mubr.bf16.mxu0 %v1115_v37  ;;  %734 = vmatprep.mubr.bf16.mxu1 %v1117_v38 }
  0x69   :  { %607 = vmatmul.mubr.bf16.gmra.mrb[20].mxu0 %v1119_v39  ;;  %735 = vmatmul.mubr.bf16.gmra.mrb[20].mxu1 %v1120_v40 }
  0x6a   :  { %614 = vmatprep.mubr.bf16.mxu0 %v1121_v41  ;;  %742 = vmatprep.mubr.bf16.mxu1 %v1123_v42 }
  0x71   :  { %615 = vmatmul.mubr.bf16.gmra.mrb[24].mxu0 %v1125_v43  ;;  %743 = vmatmul.mubr.bf16.gmra.mrb[24].mxu1 %v1126_v44 }
  0x72   :  { %622 = vmatprep.mubr.bf16.mxu0 %v1127_v45  ;;  %750 = vmatprep.mubr.bf16.mxu1 %v1129_v46 }
  0x79   :  { %623 = vmatmul.mubr.bf16.gmra.mrb[28].mxu0 %v1131_v47  ;;  %751 = vmatmul.mubr.bf16.gmra.mrb[28].mxu1 %v1132_v48 }
  0x7a   :  { %630 = vmatprep.mubr.bf16.mxu0 %v1133_v49  ;;  %758 = vmatprep.mubr.bf16.mxu1 %v1135_v50 }
  0x81   :  { %631 = vmatmul.mubr.bf16.gmra.mrb[32].mxu0 %v1137_v51  ;;  %759 = vmatmul.mubr.bf16.gmra.mrb[32].mxu1 %v1138_v52 }
  0x82   :  { %638 = vmatprep.mubr.bf16.mxu0 %v1139_v53  ;;  %766 = vmatprep.mubr.bf16.mxu1 %v1141_v54 }
  0x89   :  { %639 = vmatmul.mubr.bf16.gmra.mrb[36].mxu0 %v1143_v55  ;;  %767 = vmatmul.mubr.bf16.gmra.mrb[36].mxu1 %v1144_v56 }
  0x8a   :  { %646 = vmatprep.mubr.bf16.mxu0 %v1145_v57  ;;  %774 = vmatprep.mubr.bf16.mxu1 %v1147_v58 }
  0x91   :  { %647 = vmatmul.mubr.bf16.gmra.mrb[40].mxu0 %v1149_v59  ;;  %775 = vmatmul.mubr.bf16.gmra.mrb[40].mxu1 %v1150_v60 }
  0x92   :  { %654 = vmatprep.mubr.bf16.mxu0 %v1151_v61  ;;  %782 = vmatprep.mubr.bf16.mxu1 %v1153_v62 }
  0x99   :  { %655 = vmatmul.mubr.bf16.gmra.mrb[44].mxu0 %v1155_v63  ;;  %783 = vmatmul.mubr.bf16.gmra.mrb[44].mxu1 %v1156_v0 }
  0x9a   :  { %662 = vmatprep.mubr.bf16.mxu0 %v1157_v1  ;;  %790 = vmatprep.mubr.bf16.mxu1 %v1159_v2 }
  0xa1   :  { %663 = vmatmul.mubr.bf16.gmra.mrb[48].mxu0 %v1161_v3  ;;  %791 = vmatmul.mubr.bf16.gmra.mrb[48].mxu1 %v1162_v4 }
  0xa2   :  { %670 = vmatprep.mubr.bf16.mxu0 %v1163_v5  ;;  %798 = vmatprep.mubr.bf16.mxu1 %v1165_v6 }
  0xa9   :  { %671 = vmatmul.mubr.bf16.gmra.mrb[52].mxu0 %v1167_v7  ;;  %799 = vmatmul.mubr.bf16.gmra.mrb[52].mxu1 %v1168_v8 }
  0xaa   :  { %678 = vmatprep.mubr.bf16.mxu0 %v1169_v9  ;;  %806 = vmatprep.mubr.bf16.mxu1 %v1171_v10 }
  0xb1   :  { %679 = vmatmul.mubr.bf16.gmra.mrb[56].mxu0 %v1173_v11  ;;  %807 = vmatmul.mubr.bf16.gmra.mrb[56].mxu1 %v1174_v12 }
  0xb2   :  { %686 = vmatprep.mubr.bf16.mxu0 %v1175_v13  ;;  %814 = vmatprep.mubr.bf16.mxu1 %v1177_v14 }
  0xb9   :  { %687 = vmatmul.mubr.bf16.gmra.mrb[60].mxu0 %v1179_v15  ;;  %815 = vmatmul.mubr.bf16.gmra.mrb[60].mxu1 %v1180_v16 }
 0x114   :  { %v568_v18 = vpop.f32.mrb[0].mxu0  ;;  %v696_v19 = vpop.f32.mrb[0].mxu1 }
 0x115   :  { %v569_v20 = vadd.f32 %v1477_v17, %v568_v18  ;;  %v697_v21 = vadd.f32 %v1477_v17, %v696_v19  ;;  %v570_v22 = vpop.f32.mrb[1].mxu0  ;;  %v698_v23 = vpop.f32.mrb[1].mxu1 }
 0x116   :  { %v571_v24 = vpop.f32.mrb[2].mxu0  ;;  %v699_v25 = vpop.f32.mrb[2].mxu1 }
 0x117   :  { %v823_v26 = vmax.f32 %v569_v20, 0.0  ;;  %v855_v27 = vmax.f32 %v697_v21, 0.0  ;;  %v572_v28 = vadd.f32 %v1477_v17, %v571_v24  ;;  %v700_v29 = vadd.f32 %v1477_v17, %v699_v25  ;;  %v573_v30 = vpop.f32.mrb[3].mxu0  ;;  %v701_v31 = vpop.f32.mrb[3].mxu1 }
 0x119   :  { %887 = vst [vmem:[%s1738_s3] sm:$0xff] %v823_v26  ;;  %919 = vst [vmem:[%s1738_s3 + $0x100] sm:$0xff] %v855_v27  ;;  %v824_v32 = vmax.f32 %v572_v28, 0.0  ;;  %v856_v33 = vmax.f32 %v700_v29, 0.0 }
 0x11b   :  { %888 = vst [vmem:[%s1738_s3 + $0x8] sm:$0xff] %v824_v32  ;;  %920 = vst [vmem:[%s1738_s3 + $0x108] sm:$0xff] %v856_v33 }
 0x11c   :  { %v576_v34 = vpop.f32.mrb[4].mxu0  ;;  %v704_v35 = vpop.f32.mrb[4].mxu1 }
 0x11d   :  { %v577_v36 = vadd.f32 %v1477_v17, %v576_v34  ;;  %v705_v37 = vadd.f32 %v1477_v17, %v704_v35  ;;  %v578_v38 = vpop.f32.mrb[5].mxu0  ;;  %v706_v39 = vpop.f32.mrb[5].mxu1 }
 0x11e   :  { %v579_v40 = vpop.f32.mrb[6].mxu0  ;;  %v707_v41 = vpop.f32.mrb[6].mxu1 }
 0x11f   :  { %v825_v42 = vmax.f32 %v577_v36, 0.0  ;;  %v857_v43 = vmax.f32 %v705_v37, 0.0  ;;  %v580_v44 = vadd.f32 %v1477_v17, %v579_v40  ;;  %v708_v45 = vadd.f32 %v1477_v17, %v707_v41  ;;  %v581_v46 = vpop.f32.mrb[7].mxu0  ;;  %v709_v47 = vpop.f32.mrb[7].mxu1 }
 0x121   :  { %889 = vst [vmem:[%s1738_s3 + $0x10] sm:$0xff] %v825_v42  ;;  %921 = vst [vmem:[%s1738_s3 + $0x110] sm:$0xff] %v857_v43  ;;  %v826_v48 = vmax.f32 %v580_v44, 0.0  ;;  %v858_v49 = vmax.f32 %v708_v45, 0.0 }
 0x123   :  { %890 = vst [vmem:[%s1738_s3 + $0x18] sm:$0xff] %v826_v48  ;;  %922 = vst [vmem:[%s1738_s3 + $0x118] sm:$0xff] %v858_v49 }
 0x124   :  { %v584_v50 = vpop.f32.mrb[8].mxu0  ;;  %v712_v51 = vpop.f32.mrb[8].mxu1 }
 0x125   :  { %v585_v52 = vadd.f32 %v1477_v17, %v584_v50  ;;  %v713_v53 = vadd.f32 %v1477_v17, %v712_v51  ;;  %v586_v54 = vpop.f32.mrb[9].mxu0  ;;  %v714_v55 = vpop.f32.mrb[9].mxu1 }
 0x126   :  { %v587_v56 = vpop.f32.mrb[10].mxu0  ;;  %v715_v57 = vpop.f32.mrb[10].mxu1 }
 0x127   :  { %v827_v58 = vmax.f32 %v585_v52, 0.0  ;;  %v859_v59 = vmax.f32 %v713_v53, 0.0  ;;  %v588_v60 = vadd.f32 %v1477_v17, %v587_v56  ;;  %v716_v61 = vadd.f32 %v1477_v17, %v715_v57  ;;  %v589_v62 = vpop.f32.mrb[11].mxu0  ;;  %v717_v63 = vpop.f32.mrb[11].mxu1 }
 0x129   :  { %891 = vst [vmem:[%s1738_s3 + $0x20] sm:$0xff] %v827_v58  ;;  %923 = vst [vmem:[%s1738_s3 + $0x120] sm:$0xff] %v859_v59  ;;  %v828_v0 = vmax.f32 %v588_v60, 0.0  ;;  %v860_v1 = vmax.f32 %v716_v61, 0.0 }
 0x12b   :  { %892 = vst [vmem:[%s1738_s3 + $0x28] sm:$0xff] %v828_v0  ;;  %924 = vst [vmem:[%s1738_s3 + $0x128] sm:$0xff] %v860_v1 }
 0x12c   :  { %v592_v2 = vpop.f32.mrb[12].mxu0  ;;  %v720_v3 = vpop.f32.mrb[12].mxu1 }
 0x12d   :  { %v593_v4 = vadd.f32 %v1477_v17, %v592_v2  ;;  %v721_v5 = vadd.f32 %v1477_v17, %v720_v3  ;;  %v594_v6 = vpop.f32.mrb[13].mxu0  ;;  %v722_v7 = vpop.f32.mrb[13].mxu1 }
 0x12e   :  { %v595_v8 = vpop.f32.mrb[14].mxu0  ;;  %v723_v9 = vpop.f32.mrb[14].mxu1 }
 0x12f   :  { %v829_v10 = vmax.f32 %v593_v4, 0.0  ;;  %v861_v11 = vmax.f32 %v721_v5, 0.0  ;;  %v596_v12 = vadd.f32 %v1477_v17, %v595_v8  ;;  %v724_v13 = vadd.f32 %v1477_v17, %v723_v9  ;;  %v597_v14 = vpop.f32.mrb[15].mxu0  ;;  %v725_v15 = vpop.f32.mrb[15].mxu1 }
 0x131   :  { %893 = vst [vmem:[%s1738_s3 + $0x30] sm:$0xff] %v829_v10  ;;  %925 = vst [vmem:[%s1738_s3 + $0x130] sm:$0xff] %v861_v11  ;;  %v830_v16 = vmax.f32 %v596_v12, 0.0  ;;  %v862_v18 = vmax.f32 %v724_v13, 0.0 }
 0x133   :  { %894 = vst [vmem:[%s1738_s3 + $0x38] sm:$0xff] %v830_v16  ;;  %926 = vst [vmem:[%s1738_s3 + $0x138] sm:$0xff] %v862_v18 }
 0x134   :  { %v600_v19 = vpop.f32.mrb[16].mxu0  ;;  %v728_v20 = vpop.f32.mrb[16].mxu1 }
 0x135   :  { %v601_v21 = vadd.f32 %v1477_v17, %v600_v19  ;;  %v729_v22 = vadd.f32 %v1477_v17, %v728_v20  ;;  %v602_v23 = vpop.f32.mrb[17].mxu0  ;;  %v730_v24 = vpop.f32.mrb[17].mxu1 }
 0x136   :  { %v603_v25 = vpop.f32.mrb[18].mxu0  ;;  %v731_v26 = vpop.f32.mrb[18].mxu1 }
 0x137   :  { %v831_v27 = vmax.f32 %v601_v21, 0.0  ;;  %v863_v28 = vmax.f32 %v729_v22, 0.0  ;;  %v604_v29 = vadd.f32 %v1477_v17, %v603_v25  ;;  %v732_v30 = vadd.f32 %v1477_v17, %v731_v26  ;;  %v605_v31 = vpop.f32.mrb[19].mxu0  ;;  %v733_v32 = vpop.f32.mrb[19].mxu1 }
 0x139   :  { %895 = vst [vmem:[%s1738_s3 + $0x40] sm:$0xff] %v831_v27  ;;  %927 = vst [vmem:[%s1738_s3 + $0x140] sm:$0xff] %v863_v28  ;;  %v832_v33 = vmax.f32 %v604_v29, 0.0  ;;  %v864_v34 = vmax.f32 %v732_v30, 0.0 }
 0x13b   :  { %896 = vst [vmem:[%s1738_s3 + $0x48] sm:$0xff] %v832_v33  ;;  %928 = vst [vmem:[%s1738_s3 + $0x148] sm:$0xff] %v864_v34 }
 0x13c   :  { %v608_v35 = vpop.f32.mrb[20].mxu0  ;;  %v736_v36 = vpop.f32.mrb[20].mxu1 }
 0x13d   :  { %v609_v37 = vadd.f32 %v1477_v17, %v608_v35  ;;  %v737_v38 = vadd.f32 %v1477_v17, %v736_v36  ;;  %v610_v39 = vpop.f32.mrb[21].mxu0  ;;  %v738_v40 = vpop.f32.mrb[21].mxu1 }
 0x13e   :  { %v611_v41 = vpop.f32.mrb[22].mxu0  ;;  %v739_v42 = vpop.f32.mrb[22].mxu1 }
 0x13f   :  { %v833_v43 = vmax.f32 %v609_v37, 0.0  ;;  %v865_v44 = vmax.f32 %v737_v38, 0.0  ;;  %v612_v45 = vadd.f32 %v1477_v17, %v611_v41  ;;  %v740_v46 = vadd.f32 %v1477_v17, %v739_v42  ;;  %v613_v47 = vpop.f32.mrb[23].mxu0  ;;  %v741_v48 = vpop.f32.mrb[23].mxu1 }
 0x141   :  { %897 = vst [vmem:[%s1738_s3 + $0x50] sm:$0xff] %v833_v43  ;;  %929 = vst [vmem:[%s1738_s3 + $0x150] sm:$0xff] %v865_v44  ;;  %v834_v49 = vmax.f32 %v612_v45, 0.0  ;;  %v866_v50 = vmax.f32 %v740_v46, 0.0 }
 0x143   :  { %898 = vst [vmem:[%s1738_s3 + $0x58] sm:$0xff] %v834_v49  ;;  %930 = vst [vmem:[%s1738_s3 + $0x158] sm:$0xff] %v866_v50 }
 0x144   :  { %v616_v51 = vpop.f32.mrb[24].mxu0  ;;  %v744_v52 = vpop.f32.mrb[24].mxu1 }
 0x145   :  { %v617_v53 = vadd.f32 %v1477_v17, %v616_v51  ;;  %v745_v54 = vadd.f32 %v1477_v17, %v744_v52  ;;  %v618_v55 = vpop.f32.mrb[25].mxu0  ;;  %v746_v56 = vpop.f32.mrb[25].mxu1 }
 0x146   :  { %v619_v57 = vpop.f32.mrb[26].mxu0  ;;  %v747_v58 = vpop.f32.mrb[26].mxu1 }
 0x147   :  { %v835_v59 = vmax.f32 %v617_v53, 0.0  ;;  %v867_v60 = vmax.f32 %v745_v54, 0.0  ;;  %v620_v61 = vadd.f32 %v1477_v17, %v619_v57  ;;  %v748_v62 = vadd.f32 %v1477_v17, %v747_v58  ;;  %v621_v63 = vpop.f32.mrb[27].mxu0  ;;  %v749_v0 = vpop.f32.mrb[27].mxu1 }
 0x149   :  { %899 = vst [vmem:[%s1738_s3 + $0x60] sm:$0xff] %v835_v59  ;;  %931 = vst [vmem:[%s1738_s3 + $0x160] sm:$0xff] %v867_v60  ;;  %v836_v1 = vmax.f32 %v620_v61, 0.0  ;;  %v868_v2 = vmax.f32 %v748_v62, 0.0 }
 0x14b   :  { %900 = vst [vmem:[%s1738_s3 + $0x68] sm:$0xff] %v836_v1  ;;  %932 = vst [vmem:[%s1738_s3 + $0x168] sm:$0xff] %v868_v2 }
 0x14c   :  { %v624_v3 = vpop.f32.mrb[28].mxu0  ;;  %v752_v4 = vpop.f32.mrb[28].mxu1 }
 0x14d   :  { %v625_v5 = vadd.f32 %v1477_v17, %v624_v3  ;;  %v753_v6 = vadd.f32 %v1477_v17, %v752_v4  ;;  %v626_v7 = vpop.f32.mrb[29].mxu0  ;;  %v754_v8 = vpop.f32.mrb[29].mxu1 }
 0x14e   :  { %v627_v9 = vpop.f32.mrb[30].mxu0  ;;  %v755_v10 = vpop.f32.mrb[30].mxu1 }
 0x14f   :  { %v837_v11 = vmax.f32 %v625_v5, 0.0  ;;  %v869_v12 = vmax.f32 %v753_v6, 0.0  ;;  %v628_v13 = vadd.f32 %v1477_v17, %v627_v9  ;;  %v756_v14 = vadd.f32 %v1477_v17, %v755_v10  ;;  %v629_v15 = vpop.f32.mrb[31].mxu0  ;;  %v757_v16 = vpop.f32.mrb[31].mxu1 }
 0x151   :  { %901 = vst [vmem:[%s1738_s3 + $0x70] sm:$0xff] %v837_v11  ;;  %933 = vst [vmem:[%s1738_s3 + $0x170] sm:$0xff] %v869_v12  ;;  %v838_v18 = vmax.f32 %v628_v13, 0.0  ;;  %v870_v19 = vmax.f32 %v756_v14, 0.0 }
 0x153   :  { %902 = vst [vmem:[%s1738_s3 + $0x78] sm:$0xff] %v838_v18  ;;  %934 = vst [vmem:[%s1738_s3 + $0x178] sm:$0xff] %v870_v19 }
 0x154   :  { %v632_v20 = vpop.f32.mrb[32].mxu0  ;;  %v760_v21 = vpop.f32.mrb[32].mxu1 }
 0x155   :  { %v633_v22 = vadd.f32 %v1477_v17, %v632_v20  ;;  %v761_v23 = vadd.f32 %v1477_v17, %v760_v21  ;;  %v634_v24 = vpop.f32.mrb[33].mxu0  ;;  %v762_v25 = vpop.f32.mrb[33].mxu1 }
 0x156   :  { %v635_v26 = vpop.f32.mrb[34].mxu0  ;;  %v763_v27 = vpop.f32.mrb[34].mxu1 }
 0x157   :  { %v839_v28 = vmax.f32 %v633_v22, 0.0  ;;  %v871_v29 = vmax.f32 %v761_v23, 0.0  ;;  %v636_v30 = vadd.f32 %v1477_v17, %v635_v26  ;;  %v764_v31 = vadd.f32 %v1477_v17, %v763_v27  ;;  %v637_v32 = vpop.f32.mrb[35].mxu0  ;;  %v765_v33 = vpop.f32.mrb[35].mxu1 }
 0x159   :  { %903 = vst [vmem:[%s1738_s3 + $0x80] sm:$0xff] %v839_v28  ;;  %935 = vst [vmem:[%s1738_s3 + $0x180] sm:$0xff] %v871_v29  ;;  %v840_v34 = vmax.f32 %v636_v30, 0.0  ;;  %v872_v35 = vmax.f32 %v764_v31, 0.0 }
 0x15b   :  { %904 = vst [vmem:[%s1738_s3 + $0x88] sm:$0xff] %v840_v34  ;;  %936 = vst [vmem:[%s1738_s3 + $0x188] sm:$0xff] %v872_v35 }
 0x15c   :  { %v640_v36 = vpop.f32.mrb[36].mxu0  ;;  %v768_v37 = vpop.f32.mrb[36].mxu1 }
 0x15d   :  { %v641_v38 = vadd.f32 %v1477_v17, %v640_v36  ;;  %v769_v39 = vadd.f32 %v1477_v17, %v768_v37  ;;  %v642_v40 = vpop.f32.mrb[37].mxu0  ;;  %v770_v41 = vpop.f32.mrb[37].mxu1 }
 0x15e   :  { %v643_v42 = vpop.f32.mrb[38].mxu0  ;;  %v771_v43 = vpop.f32.mrb[38].mxu1 }
 0x15f   :  { %v841_v44 = vmax.f32 %v641_v38, 0.0  ;;  %v873_v45 = vmax.f32 %v769_v39, 0.0  ;;  %v644_v46 = vadd.f32 %v1477_v17, %v643_v42  ;;  %v772_v47 = vadd.f32 %v1477_v17, %v771_v43  ;;  %v645_v48 = vpop.f32.mrb[39].mxu0  ;;  %v773_v49 = vpop.f32.mrb[39].mxu1 }
 0x161   :  { %905 = vst [vmem:[%s1738_s3 + $0x90] sm:$0xff] %v841_v44  ;;  %937 = vst [vmem:[%s1738_s3 + $0x190] sm:$0xff] %v873_v45  ;;  %v842_v50 = vmax.f32 %v644_v46, 0.0  ;;  %v874_v51 = vmax.f32 %v772_v47, 0.0 }
 0x163   :  { %906 = vst [vmem:[%s1738_s3 + $0x98] sm:$0xff] %v842_v50  ;;  %938 = vst [vmem:[%s1738_s3 + $0x198] sm:$0xff] %v874_v51 }
 0x164   :  { %v648_v52 = vpop.f32.mrb[40].mxu0  ;;  %v776_v53 = vpop.f32.mrb[40].mxu1 }
 0x165   :  { %v649_v54 = vadd.f32 %v1477_v17, %v648_v52  ;;  %v777_v55 = vadd.f32 %v1477_v17, %v776_v53  ;;  %v650_v56 = vpop.f32.mrb[41].mxu0  ;;  %v778_v57 = vpop.f32.mrb[41].mxu1 }
 0x166   :  { %v651_v58 = vpop.f32.mrb[42].mxu0  ;;  %v779_v59 = vpop.f32.mrb[42].mxu1 }
 0x167   :  { %v843_v60 = vmax.f32 %v649_v54, 0.0  ;;  %v875_v61 = vmax.f32 %v777_v55, 0.0  ;;  %v652_v62 = vadd.f32 %v1477_v17, %v651_v58  ;;  %v780_v63 = vadd.f32 %v1477_v17, %v779_v59  ;;  %v653_v0 = vpop.f32.mrb[43].mxu0  ;;  %v781_v1 = vpop.f32.mrb[43].mxu1 }
 0x169   :  { %907 = vst [vmem:[%s1738_s3 + $0xa0] sm:$0xff] %v843_v60  ;;  %939 = vst [vmem:[%s1738_s3 + $0x1a0] sm:$0xff] %v875_v61  ;;  %v844_v2 = vmax.f32 %v652_v62, 0.0  ;;  %v876_v3 = vmax.f32 %v780_v63, 0.0 }
 0x16b   :  { %908 = vst [vmem:[%s1738_s3 + $0xa8] sm:$0xff] %v844_v2  ;;  %940 = vst [vmem:[%s1738_s3 + $0x1a8] sm:$0xff] %v876_v3 }
 0x16c   :  { %v656_v4 = vpop.f32.mrb[44].mxu0  ;;  %v784_v5 = vpop.f32.mrb[44].mxu1 }
 0x16d   :  { %v657_v6 = vadd.f32 %v1477_v17, %v656_v4  ;;  %v785_v7 = vadd.f32 %v1477_v17, %v784_v5  ;;  %v658_v8 = vpop.f32.mrb[45].mxu0  ;;  %v786_v9 = vpop.f32.mrb[45].mxu1 }
 0x16e   :  { %v659_v10 = vpop.f32.mrb[46].mxu0  ;;  %v787_v11 = vpop.f32.mrb[46].mxu1 }
 0x16f   :  { %v845_v12 = vmax.f32 %v657_v6, 0.0  ;;  %v877_v13 = vmax.f32 %v785_v7, 0.0  ;;  %v660_v14 = vadd.f32 %v1477_v17, %v659_v10  ;;  %v788_v15 = vadd.f32 %v1477_v17, %v787_v11  ;;  %v661_v16 = vpop.f32.mrb[47].mxu0  ;;  %v789_v18 = vpop.f32.mrb[47].mxu1 }
 0x171   :  { %909 = vst [vmem:[%s1738_s3 + $0xb0] sm:$0xff] %v845_v12  ;;  %941 = vst [vmem:[%s1738_s3 + $0x1b0] sm:$0xff] %v877_v13  ;;  %v846_v19 = vmax.f32 %v660_v14, 0.0  ;;  %v878_v20 = vmax.f32 %v788_v15, 0.0 }
 0x173   :  { %910 = vst [vmem:[%s1738_s3 + $0xb8] sm:$0xff] %v846_v19  ;;  %942 = vst [vmem:[%s1738_s3 + $0x1b8] sm:$0xff] %v878_v20 }
 0x174   :  { %v664_v21 = vpop.f32.mrb[48].mxu0  ;;  %v792_v22 = vpop.f32.mrb[48].mxu1 }
 0x175   :  { %v665_v23 = vadd.f32 %v1477_v17, %v664_v21  ;;  %v793_v24 = vadd.f32 %v1477_v17, %v792_v22  ;;  %v666_v25 = vpop.f32.mrb[49].mxu0  ;;  %v794_v26 = vpop.f32.mrb[49].mxu1 }
 0x176   :  { %v667_v27 = vpop.f32.mrb[50].mxu0  ;;  %v795_v28 = vpop.f32.mrb[50].mxu1 }
 0x177   :  { %v847_v29 = vmax.f32 %v665_v23, 0.0  ;;  %v879_v30 = vmax.f32 %v793_v24, 0.0  ;;  %v668_v31 = vadd.f32 %v1477_v17, %v667_v27  ;;  %v796_v32 = vadd.f32 %v1477_v17, %v795_v28  ;;  %v669_v33 = vpop.f32.mrb[51].mxu0  ;;  %v797_v34 = vpop.f32.mrb[51].mxu1 }
 0x179   :  { %911 = vst [vmem:[%s1738_s3 + $0xc0] sm:$0xff] %v847_v29  ;;  %943 = vst [vmem:[%s1738_s3 + $0x1c0] sm:$0xff] %v879_v30  ;;  %v848_v35 = vmax.f32 %v668_v31, 0.0  ;;  %v880_v36 = vmax.f32 %v796_v32, 0.0 }
 0x17b   :  { %912 = vst [vmem:[%s1738_s3 + $0xc8] sm:$0xff] %v848_v35  ;;  %944 = vst [vmem:[%s1738_s3 + $0x1c8] sm:$0xff] %v880_v36 }
 0x17c   :  { %v672_v37 = vpop.f32.mrb[52].mxu0  ;;  %v800_v38 = vpop.f32.mrb[52].mxu1 }
 0x17d   :  { %v673_v39 = vadd.f32 %v1477_v17, %v672_v37  ;;  %v801_v40 = vadd.f32 %v1477_v17, %v800_v38  ;;  %v674_v41 = vpop.f32.mrb[53].mxu0  ;;  %v802_v42 = vpop.f32.mrb[53].mxu1 }
 0x17e   :  { %v675_v43 = vpop.f32.mrb[54].mxu0  ;;  %v803_v44 = vpop.f32.mrb[54].mxu1 }
 0x17f   :  { %v849_v45 = vmax.f32 %v673_v39, 0.0  ;;  %v881_v46 = vmax.f32 %v801_v40, 0.0  ;;  %v676_v47 = vadd.f32 %v1477_v17, %v675_v43  ;;  %v804_v48 = vadd.f32 %v1477_v17, %v803_v44  ;;  %v677_v49 = vpop.f32.mrb[55].mxu0  ;;  %v805_v50 = vpop.f32.mrb[55].mxu1 }
 0x181   :  { %913 = vst [vmem:[%s1738_s3 + $0xd0] sm:$0xff] %v849_v45  ;;  %945 = vst [vmem:[%s1738_s3 + $0x1d0] sm:$0xff] %v881_v46  ;;  %v850_v51 = vmax.f32 %v676_v47, 0.0  ;;  %v882_v52 = vmax.f32 %v804_v48, 0.0 }
 0x183   :  { %914 = vst [vmem:[%s1738_s3 + $0xd8] sm:$0xff] %v850_v51  ;;  %946 = vst [vmem:[%s1738_s3 + $0x1d8] sm:$0xff] %v882_v52 }
 0x184   :  { %v680_v53 = vpop.f32.mrb[56].mxu0  ;;  %v808_v54 = vpop.f32.mrb[56].mxu1 }
 0x185   :  { %v681_v55 = vadd.f32 %v1477_v17, %v680_v53  ;;  %v809_v56 = vadd.f32 %v1477_v17, %v808_v54  ;;  %v682_v57 = vpop.f32.mrb[57].mxu0  ;;  %v810_v58 = vpop.f32.mrb[57].mxu1 }
 0x186   :  { %v683_v59 = vpop.f32.mrb[58].mxu0  ;;  %v811_v60 = vpop.f32.mrb[58].mxu1 }
 0x187   :  { %v851_v61 = vmax.f32 %v681_v55, 0.0  ;;  %v883_v62 = vmax.f32 %v809_v56, 0.0  ;;  %v684_v63 = vadd.f32 %v1477_v17, %v683_v59  ;;  %v812_v0 = vadd.f32 %v1477_v17, %v811_v60  ;;  %v685_v1 = vpop.f32.mrb[59].mxu0  ;;  %v813_v2 = vpop.f32.mrb[59].mxu1 }
 0x189   :  { %915 = vst [vmem:[%s1738_s3 + $0xe0] sm:$0xff] %v851_v61  ;;  %947 = vst [vmem:[%s1738_s3 + $0x1e0] sm:$0xff] %v883_v62  ;;  %v852_v3 = vmax.f32 %v684_v63, 0.0  ;;  %v884_v4 = vmax.f32 %v812_v0, 0.0 }
 0x18b   :  { %916 = vst [vmem:[%s1738_s3 + $0xe8] sm:$0xff] %v852_v3  ;;  %948 = vst [vmem:[%s1738_s3 + $0x1e8] sm:$0xff] %v884_v4 }
 0x18c   :  { %v688_v5 = vpop.f32.mrb[60].mxu0  ;;  %v816_v6 = vpop.f32.mrb[60].mxu1 }
 0x18d   :  { %v689_v7 = vadd.f32 %v1477_v17, %v688_v5  ;;  %v817_v8 = vadd.f32 %v1477_v17, %v816_v6  ;;  %v690_v9 = vpop.f32.mrb[61].mxu0  ;;  %v818_v10 = vpop.f32.mrb[61].mxu1 }
 0x18e   :  { %v691_v11 = vpop.f32.mrb[62].mxu0  ;;  %v819_v12 = vpop.f32.mrb[62].mxu1 }
 0x18f   :  { %v853_v13 = vmax.f32 %v689_v7, 0.0  ;;  %v885_v14 = vmax.f32 %v817_v8, 0.0  ;;  %v692_v15 = vadd.f32 %v1477_v17, %v691_v11  ;;  %v820_v16 = vadd.f32 %v1477_v17, %v819_v12  ;;  %v693_v18 = vpop.f32.mrb[63].mxu0  ;;  %v821_v19 = vpop.f32.mrb[63].mxu1 }
 0x191   :  { %917 = vst [vmem:[%s1738_s3 + $0xf0] sm:$0xff] %v853_v13  ;;  %949 = vst [vmem:[%s1738_s3 + $0x1f0] sm:$0xff] %v885_v14  ;;  %v854_v20 = vmax.f32 %v692_v15, 0.0  ;;  %v886_v21 = vmax.f32 %v820_v16, 0.0 }
 0x193   :  { %918 = vst [vmem:[%s1738_s3 + $0xf8] sm:$0xff] %v854_v20  ;;  %950 = vst [vmem:[%s1738_s3 + $0x1f8] sm:$0xff] %v886_v21 }

// kernel: resnet_backbone.19
= control target key start
LH: loop header
LB: loop body
LE: loop exit
PB: predicated region body
PF: predicated region fallthrough
CT: control target
= control target key end

     0   :  { %s790_s0 = inlined_call_operand.vmem [shape: f32[9,128,128], index: 0, kind: input, shape index: {}]   ;;  %s791_s1 = inlined_call_operand.vmem [shape: f32[128,128], index: 1, kind: output, shape index: {}]  }
   0x1   :  { %v8_v0 = vld [vmem:[%s790_s0] sm:$0xff]  ;;  %v9_v6 = vld [vmem:[%s790_s0 + $0x8] sm:$0xff]  ;;  %v10_v15 = vld [vmem:[%s790_s0 + $0x10] sm:$0xff] }
   0x2   :  { %v24_v1 = vld [vmem:[%s790_s0 + $0x80] sm:$0xff]  ;;  %v25_v7 = vld [vmem:[%s790_s0 + $0x88] sm:$0xff]  ;;  %v26_v16 = vld [vmem:[%s790_s0 + $0x90] sm:$0xff] }
   0x3   :  { %v40_v2 = vld [vmem:[%s790_s0 + $0x100] sm:$0xff]  ;;  %v152_v3 = vmax.f32 %v8_v0, %v24_v1  ;;  %v41_v8 = vld [vmem:[%s790_s0 + $0x108] sm:$0xff]  ;;  %v160_v10 = vmax.f32 %v9_v6, %v25_v7  ;;  %v42_v17 = vld [vmem:[%s790_s0 + $0x110] sm:$0xff]  ;;  %v168_v20 = vmax.f32 %v10_v15, %v26_v16 }
   0x4   :  { %v56_v4 = vld [vmem:[%s790_s0 + $0x180] sm:$0xff]  ;;  %v57_v13 = vld [vmem:[%s790_s0 + $0x188] sm:$0xff]  ;;  %v58_v24 = vld [vmem:[%s790_s0 + $0x190] sm:$0xff] }
   0x5   :  { %v153_v5 = vmax.f32 %v152_v3, %v40_v2  ;;  %v72_v9 = vld [vmem:[%s790_s0 + $0x200] sm:$0xff]  ;;  %v161_v14 = vmax.f32 %v160_v10, %v41_v8  ;;  %v73_v19 = vld [vmem:[%s790_s0 + $0x208] sm:$0xff]  ;;  %v169_v26 = vmax.f32 %v168_v20, %v42_v17  ;;  %v11_v27 = vld [vmem:[%s790_s0 + $0x18] sm:$0xff] }
   0x6   :  { %v88_v11 = vld [vmem:[%s790_s0 + $0x280] sm:$0xff]  ;;  %v89_v22 = vld [vmem:[%s790_s0 + $0x288] sm:$0xff]  ;;  %v27_v28 = vld [vmem:[%s790_s0 + $0x98] sm:$0xff] }
   0x7   :  { %v154_v12 = vmax.f32 %v153_v5, %v56_v4  ;;  %v104_v21 = vld [vmem:[%s790_s0 + $0x300] sm:$0xff]  ;;  %v162_v23 = vmax.f32 %v161_v14, %v57_v13  ;;  %v43_v29 = vld [vmem:[%s790_s0 + $0x118] sm:$0xff]  ;;  %v74_v33 = vld [vmem:[%s790_s0 + $0x210] sm:$0xff]  ;;  %v176_v34 = vmax.f32 %v11_v27, %v27_v28  ;;  %v170_v38 = vmax.f32 %v169_v26, %v58_v24 }
   0x8   :  { %v120_v30 = vld [vmem:[%s790_s0 + $0x380] sm:$0xff]  ;;  %v105_v36 = vld [vmem:[%s790_s0 + $0x308] sm:$0xff]  ;;  %v90_v37 = vld [vmem:[%s790_s0 + $0x290] sm:$0xff] }
   0x9   :  { %v155_v18 = vmax.f32 %v154_v12, %v72_v9  ;;  %v136_v31 = vld [vmem:[%s790_s0 + $0x400] sm:$0xff]  ;;  %v163_v32 = vmax.f32 %v162_v23, %v73_v19  ;;  %v59_v39 = vld [vmem:[%s790_s0 + $0x198] sm:$0xff]  ;;  %v177_v41 = vmax.f32 %v176_v34, %v43_v29  ;;  %v121_v46 = vld [vmem:[%s790_s0 + $0x388] sm:$0xff]  ;;  %v171_v48 = vmax.f32 %v170_v38, %v74_v33 }
   0xa   :  { %v12_v42 = vld [vmem:[%s790_s0 + $0x20] sm:$0xff]  ;;  %v137_v47 = vld [vmem:[%s790_s0 + $0x408] sm:$0xff]  ;;  %v75_v49 = vld [vmem:[%s790_s0 + $0x218] sm:$0xff] }
   0xb   :  { %v156_v25 = vmax.f32 %v155_v18, %v88_v11  ;;  %v164_v40 = vmax.f32 %v163_v32, %v89_v22  ;;  %v28_v43 = vld [vmem:[%s790_s0 + $0xa0] sm:$0xff]  ;;  %v106_v52 = vld [vmem:[%s790_s0 + $0x310] sm:$0xff]  ;;  %v91_v53 = vld [vmem:[%s790_s0 + $0x298] sm:$0xff]  ;;  %v178_v54 = vmax.f32 %v177_v41, %v59_v39  ;;  %v172_v57 = vmax.f32 %v171_v48, %v90_v37 }
   0xc   :  { %v44_v44 = vld [vmem:[%s790_s0 + $0x120] sm:$0xff]  ;;  %v184_v50 = vmax.f32 %v12_v42, %v28_v43  ;;  %v13_v59 = vld [vmem:[%s790_s0 + $0x28] sm:$0xff]  ;;  %v122_v63 = vld [vmem:[%s790_s0 + $0x390] sm:$0xff] }
   0xd   :  { %v157_v35 = vmax.f32 %v156_v25, %v104_v21  ;;  %v165_v51 = vmax.f32 %v164_v40, %v105_v36  ;;  %v60_v55 = vld [vmem:[%s790_s0 + $0x1a0] sm:$0xff]  ;;  %v29_v60 = vld [vmem:[%s790_s0 + $0xa8] sm:$0xff]  ;;  %v138_v0 = vld [vmem:[%s790_s0 + $0x410] sm:$0xff]  ;;  %v179_v1 = vmax.f32 %v178_v54, %v75_v49  ;;  %v173_v4 = vmax.f32 %v172_v57, %v106_v52 }
   0xe   :  { %v185_v58 = vmax.f32 %v184_v50, %v44_v44  ;;  %v45_v61 = vld [vmem:[%s790_s0 + $0x128] sm:$0xff]  ;;  %v76_v2 = vld [vmem:[%s790_s0 + $0x220] sm:$0xff]  ;;  %v192_v3 = vmax.f32 %v13_v59, %v29_v60  ;;  %v107_v5 = vld [vmem:[%s790_s0 + $0x318] sm:$0xff] }
   0xf   :  { %v158_v45 = vmax.f32 %v157_v35, %v120_v30  ;;  %v166_v62 = vmax.f32 %v165_v51, %v121_v46  ;;  %v92_v6 = vld [vmem:[%s790_s0 + $0x2a0] sm:$0xff]  ;;  %v61_v8 = vld [vmem:[%s790_s0 + $0x1a8] sm:$0xff]  ;;  %v180_v10 = vmax.f32 %v179_v1, %v91_v53  ;;  %v14_v12 = vld [vmem:[%s790_s0 + $0x30] sm:$0xff]  ;;  %v174_v15 = vmax.f32 %v173_v4, %v122_v63 }
  0x10   :  { %v186_v7 = vmax.f32 %v185_v58, %v60_v55  ;;  %v193_v11 = vmax.f32 %v192_v3, %v45_v61  ;;  %v30_v13 = vld [vmem:[%s790_s0 + $0xb0] sm:$0xff]  ;;  %v123_v16 = vld [vmem:[%s790_s0 + $0x398] sm:$0xff]  ;;  %v77_v19 = vld [vmem:[%s790_s0 + $0x228] sm:$0xff] }
  0x11   :  { %v159_v56 = vmax.f32 %v158_v45, %v136_v31  ;;  %v167_v9 = vmax.f32 %v166_v62, %v137_v47  ;;  %v46_v14 = vld [vmem:[%s790_s0 + $0x130] sm:$0xff]  ;;  %v139_v17 = vld [vmem:[%s790_s0 + $0x418] sm:$0xff]  ;;  %v200_v20 = vmax.f32 %v14_v12, %v30_v13  ;;  %v181_v21 = vmax.f32 %v180_v10, %v107_v5  ;;  %v108_v22 = vld [vmem:[%s790_s0 + $0x320] sm:$0xff] }
  0x12   :  { %v187_v18 = vmax.f32 %v186_v7, %v76_v2  ;;  %v93_v23 = vld [vmem:[%s790_s0 + $0x2a8] sm:$0xff]  ;;  %v194_v24 = vmax.f32 %v193_v11, %v61_v8  ;;  %v62_v25 = vld [vmem:[%s790_s0 + $0x1b0] sm:$0xff]  ;;  %v175_v26 = vmax.f32 %v174_v15, %v138_v0  ;;  %v15_v29 = vld [vmem:[%s790_s0 + $0x38] sm:$0xff] }
  0x13   :  { %280 = vst [vmem:[%s791_s1] sm:$0xff] %v159_v56  ;;  %281 = vst [vmem:[%s791_s1 + $0x8] sm:$0xff] %v167_v9  ;;  %v201_v28 = vmax.f32 %v200_v20, %v46_v14  ;;  %v31_v30 = vld [vmem:[%s790_s0 + $0xb8] sm:$0xff]  ;;  %v182_v32 = vmax.f32 %v181_v21, %v123_v16  ;;  %v124_v33 = vld [vmem:[%s790_s0 + $0x3a0] sm:$0xff] }
  0x14   :  { %v188_v27 = vmax.f32 %v187_v18, %v92_v6  ;;  %v47_v31 = vld [vmem:[%s790_s0 + $0x138] sm:$0xff]  ;;  %v140_v34 = vld [vmem:[%s790_s0 + $0x420] sm:$0xff]  ;;  %v195_v35 = vmax.f32 %v194_v24, %v77_v19  ;;  %v78_v36 = vld [vmem:[%s790_s0 + $0x230] sm:$0xff]  ;;  %v208_v37 = vmax.f32 %v15_v29, %v31_v30  ;;  %282 = vst [vmem:[%s791_s1 + $0x10] sm:$0xff] %v175_v26 }
  0x15   :  { %v109_v39 = vld [vmem:[%s790_s0 + $0x328] sm:$0xff]  ;;  %v94_v40 = vld [vmem:[%s790_s0 + $0x2b0] sm:$0xff]  ;;  %v202_v41 = vmax.f32 %v201_v28, %v62_v25  ;;  %v63_v42 = vld [vmem:[%s790_s0 + $0x1b8] sm:$0xff]  ;;  %v183_v43 = vmax.f32 %v182_v32, %v139_v17 }
  0x16   :  { %v189_v38 = vmax.f32 %v188_v27, %v108_v22  ;;  %v196_v44 = vmax.f32 %v195_v35, %v93_v23  ;;  %v209_v45 = vmax.f32 %v208_v37, %v47_v31  ;;  %v16_v46 = vld [vmem:[%s790_s0 + $0x40] sm:$0xff]  ;;  %v125_v50 = vld [vmem:[%s790_s0 + $0x3a8] sm:$0xff]  ;;  %v79_v53 = vld [vmem:[%s790_s0 + $0x238] sm:$0xff] }
  0x17   :  { %v32_v47 = vld [vmem:[%s790_s0 + $0xc0] sm:$0xff]  ;;  %v141_v51 = vld [vmem:[%s790_s0 + $0x428] sm:$0xff]  ;;  %v203_v52 = vmax.f32 %v202_v41, %v78_v36  ;;  %283 = vst [vmem:[%s791_s1 + $0x18] sm:$0xff] %v183_v43  ;;  %v110_v56 = vld [vmem:[%s790_s0 + $0x330] sm:$0xff] }
  0x18   :  { %v48_v48 = vld [vmem:[%s790_s0 + $0x140] sm:$0xff]  ;;  %v190_v49 = vmax.f32 %v189_v38, %v124_v33  ;;  %v216_v54 = vmax.f32 %v16_v46, %v32_v47  ;;  %v197_v55 = vmax.f32 %v196_v44, %v109_v39  ;;  %v95_v57 = vld [vmem:[%s790_s0 + $0x2b8] sm:$0xff]  ;;  %v210_v58 = vmax.f32 %v209_v45, %v63_v42  ;;  %v17_v63 = vld [vmem:[%s790_s0 + $0x48] sm:$0xff] }
  0x19   :  { %v64_v59 = vld [vmem:[%s790_s0 + $0x1c0] sm:$0xff]  ;;  %v204_v61 = vmax.f32 %v203_v52, %v94_v40  ;;  %v33_v0 = vld [vmem:[%s790_s0 + $0xc8] sm:$0xff]  ;;  %v126_v3 = vld [vmem:[%s790_s0 + $0x3b0] sm:$0xff] }
  0x1a   :  { %v191_v60 = vmax.f32 %v190_v49, %v140_v34  ;;  %v217_v62 = vmax.f32 %v216_v54, %v48_v48  ;;  %v49_v1 = vld [vmem:[%s790_s0 + $0x148] sm:$0xff]  ;;  %v198_v2 = vmax.f32 %v197_v55, %v125_v50  ;;  %v142_v4 = vld [vmem:[%s790_s0 + $0x430] sm:$0xff]  ;;  %v211_v5 = vmax.f32 %v210_v58, %v79_v53  ;;  %v80_v6 = vld [vmem:[%s790_s0 + $0x240] sm:$0xff] }
  0x1b   :  { %v224_v7 = vmax.f32 %v17_v63, %v33_v0  ;;  %v205_v8 = vmax.f32 %v204_v61, %v110_v56  ;;  %v111_v9 = vld [vmem:[%s790_s0 + $0x338] sm:$0xff]  ;;  %v96_v10 = vld [vmem:[%s790_s0 + $0x2c0] sm:$0xff]  ;;  %v65_v12 = vld [vmem:[%s790_s0 + $0x1c8] sm:$0xff] }
  0x1c   :  { %284 = vst [vmem:[%s791_s1 + $0x20] sm:$0xff] %v191_v60  ;;  %v218_v11 = vmax.f32 %v217_v62, %v64_v59  ;;  %v199_v13 = vmax.f32 %v198_v2, %v141_v51  ;;  %v212_v14 = vmax.f32 %v211_v5, %v95_v57  ;;  %v18_v16 = vld [vmem:[%s790_s0 + $0x50] sm:$0xff]  ;;  %v127_v20 = vld [vmem:[%s790_s0 + $0x3b8] sm:$0xff]  ;;  %v81_v23 = vld [vmem:[%s790_s0 + $0x248] sm:$0xff] }
  0x1d   :  { %v225_v15 = vmax.f32 %v224_v7, %v49_v1  ;;  %v34_v17 = vld [vmem:[%s790_s0 + $0xd0] sm:$0xff]  ;;  %v206_v19 = vmax.f32 %v205_v8, %v126_v3  ;;  %v143_v21 = vld [vmem:[%s790_s0 + $0x438] sm:$0xff]  ;;  %v112_v26 = vld [vmem:[%s790_s0 + $0x340] sm:$0xff] }
  0x1e   :  { %v50_v18 = vld [vmem:[%s790_s0 + $0x150] sm:$0xff]  ;;  %v219_v22 = vmax.f32 %v218_v11, %v80_v6  ;;  %v232_v24 = vmax.f32 %v18_v16, %v34_v17  ;;  %285 = vst [vmem:[%s791_s1 + $0x28] sm:$0xff] %v199_v13  ;;  %v213_v25 = vmax.f32 %v212_v14, %v111_v9  ;;  %v97_v27 = vld [vmem:[%s790_s0 + $0x2c8] sm:$0xff]  ;;  %v19_v33 = vld [vmem:[%s790_s0 + $0x58] sm:$0xff] }
  0x1f   :  { %v226_v28 = vmax.f32 %v225_v15, %v65_v12  ;;  %v66_v29 = vld [vmem:[%s790_s0 + $0x1d0] sm:$0xff]  ;;  %v207_v30 = vmax.f32 %v206_v19, %v142_v4  ;;  %v35_v34 = vld [vmem:[%s790_s0 + $0xd8] sm:$0xff]  ;;  %v128_v37 = vld [vmem:[%s790_s0 + $0x3c0] sm:$0xff] }
  0x20   :  { %v220_v31 = vmax.f32 %v219_v22, %v96_v10  ;;  %v233_v32 = vmax.f32 %v232_v24, %v50_v18  ;;  %v51_v35 = vld [vmem:[%s790_s0 + $0x158] sm:$0xff]  ;;  %v214_v36 = vmax.f32 %v213_v25, %v127_v20  ;;  %v144_v38 = vld [vmem:[%s790_s0 + $0x440] sm:$0xff]  ;;  %v82_v40 = vld [vmem:[%s790_s0 + $0x250] sm:$0xff]  ;;  %v240_v41 = vmax.f32 %v19_v33, %v35_v34 }
  0x21   :  { %v227_v39 = vmax.f32 %v226_v28, %v81_v23  ;;  %286 = vst [vmem:[%s791_s1 + $0x30] sm:$0xff] %v207_v30  ;;  %v113_v43 = vld [vmem:[%s790_s0 + $0x348] sm:$0xff]  ;;  %v98_v44 = vld [vmem:[%s790_s0 + $0x2d0] sm:$0xff]  ;;  %v67_v46 = vld [vmem:[%s790_s0 + $0x1d8] sm:$0xff] }
  0x22   :  { %v221_v42 = vmax.f32 %v220_v31, %v112_v26  ;;  %v234_v45 = vmax.f32 %v233_v32, %v66_v29  ;;  %v215_v47 = vmax.f32 %v214_v36, %v143_v21  ;;  %v241_v49 = vmax.f32 %v240_v41, %v51_v35  ;;  %v20_v50 = vld [vmem:[%s790_s0 + $0x60] sm:$0xff]  ;;  %v129_v54 = vld [vmem:[%s790_s0 + $0x3c8] sm:$0xff]  ;;  %v83_v57 = vld [vmem:[%s790_s0 + $0x258] sm:$0xff] }
  0x23   :  { %v228_v48 = vmax.f32 %v227_v39, %v97_v27  ;;  %v36_v51 = vld [vmem:[%s790_s0 + $0xe0] sm:$0xff]  ;;  %v145_v55 = vld [vmem:[%s790_s0 + $0x448] sm:$0xff]  ;;  %v114_v60 = vld [vmem:[%s790_s0 + $0x350] sm:$0xff] }
  0x24   :  { %v52_v52 = vld [vmem:[%s790_s0 + $0x160] sm:$0xff]  ;;  %v222_v53 = vmax.f32 %v221_v42, %v128_v37  ;;  %v235_v56 = vmax.f32 %v234_v45, %v82_v40  ;;  %v248_v58 = vmax.f32 %v20_v50, %v36_v51  ;;  %287 = vst [vmem:[%s791_s1 + $0x38] sm:$0xff] %v215_v47  ;;  %v99_v61 = vld [vmem:[%s790_s0 + $0x2d8] sm:$0xff]  ;;  %v242_v62 = vmax.f32 %v241_v49, %v67_v46  ;;  %v21_v3 = vld [vmem:[%s790_s0 + $0x68] sm:$0xff] }
  0x25   :  { %v229_v59 = vmax.f32 %v228_v48, %v113_v43  ;;  %v68_v63 = vld [vmem:[%s790_s0 + $0x1e0] sm:$0xff]  ;;  %v37_v4 = vld [vmem:[%s790_s0 + $0xe8] sm:$0xff]  ;;  %v130_v7 = vld [vmem:[%s790_s0 + $0x3d0] sm:$0xff] }
  0x26   :  { %v223_v0 = vmax.f32 %v222_v53, %v144_v38  ;;  %v236_v1 = vmax.f32 %v235_v56, %v98_v44  ;;  %v249_v2 = vmax.f32 %v248_v58, %v52_v52  ;;  %v53_v5 = vld [vmem:[%s790_s0 + $0x168] sm:$0xff]  ;;  %v146_v8 = vld [vmem:[%s790_s0 + $0x450] sm:$0xff]  ;;  %v243_v9 = vmax.f32 %v242_v62, %v83_v57  ;;  %v84_v10 = vld [vmem:[%s790_s0 + $0x260] sm:$0xff] }
  0x27   :  { %v230_v6 = vmax.f32 %v229_v59, %v129_v54  ;;  %v256_v11 = vmax.f32 %v21_v3, %v37_v4  ;;  %v115_v13 = vld [vmem:[%s790_s0 + $0x358] sm:$0xff]  ;;  %v100_v14 = vld [vmem:[%s790_s0 + $0x2e0] sm:$0xff]  ;;  %v69_v16 = vld [vmem:[%s790_s0 + $0x1e8] sm:$0xff] }
  0x28   :  { %288 = vst [vmem:[%s791_s1 + $0x40] sm:$0xff] %v223_v0  ;;  %v237_v12 = vmax.f32 %v236_v1, %v114_v60  ;;  %v250_v15 = vmax.f32 %v249_v2, %v68_v63  ;;  %v244_v18 = vmax.f32 %v243_v9, %v99_v61  ;;  %v22_v20 = vld [vmem:[%s790_s0 + $0x70] sm:$0xff]  ;;  %v131_v24 = vld [vmem:[%s790_s0 + $0x3d8] sm:$0xff]  ;;  %v85_v27 = vld [vmem:[%s790_s0 + $0x268] sm:$0xff] }
  0x29   :  { %v231_v17 = vmax.f32 %v230_v6, %v145_v55  ;;  %v257_v19 = vmax.f32 %v256_v11, %v53_v5  ;;  %v38_v21 = vld [vmem:[%s790_s0 + $0xf0] sm:$0xff]  ;;  %v147_v25 = vld [vmem:[%s790_s0 + $0x458] sm:$0xff]  ;;  %v116_v30 = vld [vmem:[%s790_s0 + $0x360] sm:$0xff] }
  0x2a   :  { %v54_v22 = vld [vmem:[%s790_s0 + $0x170] sm:$0xff]  ;;  %v238_v23 = vmax.f32 %v237_v12, %v130_v7  ;;  %v251_v26 = vmax.f32 %v250_v15, %v84_v10  ;;  %v264_v28 = vmax.f32 %v22_v20, %v38_v21  ;;  %v245_v29 = vmax.f32 %v244_v18, %v115_v13  ;;  %v101_v31 = vld [vmem:[%s790_s0 + $0x2e8] sm:$0xff]  ;;  %v23_v37 = vld [vmem:[%s790_s0 + $0x78] sm:$0xff] }
  0x2b   :  { %289 = vst [vmem:[%s791_s1 + $0x48] sm:$0xff] %v231_v17  ;;  %v258_v32 = vmax.f32 %v257_v19, %v69_v16  ;;  %v70_v33 = vld [vmem:[%s790_s0 + $0x1f0] sm:$0xff]  ;;  %v39_v38 = vld [vmem:[%s790_s0 + $0xf8] sm:$0xff]  ;;  %v132_v41 = vld [vmem:[%s790_s0 + $0x3e0] sm:$0xff] }
  0x2c   :  { %v239_v34 = vmax.f32 %v238_v23, %v146_v8  ;;  %v252_v35 = vmax.f32 %v251_v26, %v100_v14  ;;  %v265_v36 = vmax.f32 %v264_v28, %v54_v22  ;;  %v55_v39 = vld [vmem:[%s790_s0 + $0x178] sm:$0xff]  ;;  %v246_v40 = vmax.f32 %v245_v29, %v131_v24  ;;  %v86_v43 = vld [vmem:[%s790_s0 + $0x270] sm:$0xff]  ;;  %v117_v46 = vld [vmem:[%s790_s0 + $0x368] sm:$0xff] }
  0x2d   :  { %v259_v42 = vmax.f32 %v258_v32, %v85_v27  ;;  %v272_v44 = vmax.f32 %v23_v37, %v39_v38  ;;  %v71_v48 = vld [vmem:[%s790_s0 + $0x1f8] sm:$0xff]  ;;  %v148_v50 = vld [vmem:[%s790_s0 + $0x460] sm:$0xff]  ;;  %v102_v52 = vld [vmem:[%s790_s0 + $0x2f0] sm:$0xff] }
  0x2e   :  { %290 = vst [vmem:[%s791_s1 + $0x50] sm:$0xff] %v239_v34  ;;  %v253_v45 = vmax.f32 %v252_v35, %v116_v30  ;;  %v266_v47 = vmax.f32 %v265_v36, %v70_v33  ;;  %v247_v49 = vmax.f32 %v246_v40, %v147_v25  ;;  %v133_v55 = vld [vmem:[%s790_s0 + $0x3e8] sm:$0xff]  ;;  %v87_v57 = vld [vmem:[%s790_s0 + $0x278] sm:$0xff]  ;;  %v118_v59 = vld [vmem:[%s790_s0 + $0x370] sm:$0xff] }
  0x2f   :  { %v260_v51 = vmax.f32 %v259_v42, %v101_v31  ;;  %v273_v53 = vmax.f32 %v272_v44, %v55_v39  ;;  %v149_v62 = vld [vmem:[%s790_s0 + $0x468] sm:$0xff]  ;;  %v103_v0 = vld [vmem:[%s790_s0 + $0x2f8] sm:$0xff]  ;;  %v134_v2 = vld [vmem:[%s790_s0 + $0x3f0] sm:$0xff] }
  0x30   :  { %v254_v54 = vmax.f32 %v253_v45, %v132_v41  ;;  %v267_v56 = vmax.f32 %v266_v47, %v86_v43  ;;  %291 = vst [vmem:[%s791_s1 + $0x58] sm:$0xff] %v247_v49  ;;  %v119_v5 = vld [vmem:[%s790_s0 + $0x378] sm:$0xff]  ;;  %v150_v7 = vld [vmem:[%s790_s0 + $0x470] sm:$0xff] }
  0x31   :  { %v261_v58 = vmax.f32 %v260_v51, %v117_v46  ;;  %v274_v60 = vmax.f32 %v273_v53, %v71_v48  ;;  %v135_v10 = vld [vmem:[%s790_s0 + $0x3f8] sm:$0xff] }
  0x32   :  { %v255_v61 = vmax.f32 %v254_v54, %v148_v50  ;;  %v268_v63 = vmax.f32 %v267_v56, %v102_v52  ;;  %v151_v13 = vld [vmem:[%s790_s0 + $0x478] sm:$0xff] }
  0x33   :  { %v262_v1 = vmax.f32 %v261_v58, %v133_v55  ;;  %v275_v3 = vmax.f32 %v274_v60, %v87_v57 }
  0x34   :  { %292 = vst [vmem:[%s791_s1 + $0x60] sm:$0xff] %v255_v61  ;;  %v269_v4 = vmax.f32 %v268_v63, %v118_v59 }
  0x35   :  { %v263_v6 = vmax.f32 %v262_v1, %v149_v62  ;;  %v276_v8 = vmax.f32 %v275_v3, %v103_v0 }
  0x36   :  { %v270_v9 = vmax.f32 %v269_v4, %v134_v2 }
  0x37   :  { %293 = vst [vmem:[%s791_s1 + $0x68] sm:$0xff] %v263_v6  ;;  %v277_v11 = vmax.f32 %v276_v8, %v119_v5 }
  0x38   :  { %v271_v12 = vmax.f32 %v270_v9, %v150_v7 }
  0x39   :  { %v278_v14 = vmax.f32 %v277_v11, %v135_v10 }
  0x3a   :  { %294 = vst [vmem:[%s791_s1 + $0x70] sm:$0xff] %v271_v12 }
  0x3b   :  { %v279_v15 = vmax.f32 %v278_v14, %v151_v13 }
  0x3d   :  { %295 = vst [vmem:[%s791_s1 + $0x78] sm:$0xff] %v279_v15 }

// kernel: resnet_backbone.20
= control target key start
LH: loop header
LB: loop body
LE: loop exit
PB: predicated region body
PF: predicated region fallthrough
CT: control target
= control target key end

     0   :  { %s717_s1 = inlined_call_operand.vmem [shape: bf16[256,128], index: 1, kind: input, shape index: {}]   ;;  %s718_s0 = inlined_call_operand.vmem [shape: bf16[128,256], index: 0, kind: input, shape index: {}]   ;;  %s719_s2 = inlined_call_operand.vmem [shape: f32[1,128], index: 2, kind: input, shape index: {}]   ;;  %s720_s3 = inlined_call_operand.vmem [shape: f32[128,128], index: 3, kind: output, shape index: {}]  }
   0x1   :  { %v492_v0 = vld [vmem:[%s717_s1 + $0x40] sm:$0xff]   ;;  %v494_v2 = vld [vmem:[%s717_s1 + $0x48] sm:$0xff]   ;;  %v496_v4 = vld [vmem:[%s717_s1 + $0x50] sm:$0xff]  }
   0x2   :  { %v493_v1 = vld [vmem:[%s717_s1] sm:$0xff]   ;;  %412 = vmatprep.subr.bf16.mxu0 %v492_v0  ;;  %476 = vmatprep.subr.bf16.mxu1 %v492_v0  ;;  %v495_v3 = vld [vmem:[%s717_s1 + $0x8] sm:$0xff]   ;;  %v497_v5 = vld [vmem:[%s717_s1 + $0x10] sm:$0xff]  }
   0x3   :  { %413 = vmatpush3.bf16.msra.mxu0 %v493_v1  ;;  %484 = vmatpush3.bf16.msra.mxu1 %v493_v1  ;;  %v498_v6 = vld [vmem:[%s717_s1 + $0x58] sm:$0xff]   ;;  %v500_v8 = vld [vmem:[%s717_s1 + $0x60] sm:$0xff]   ;;  %v502_v10 = vld [vmem:[%s717_s1 + $0x68] sm:$0xff]  }
   0x4   :  { %414 = vmatprep.subr.bf16.mxu0 %v494_v2  ;;  %477 = vmatprep.subr.bf16.mxu1 %v494_v2  ;;  %v499_v7 = vld [vmem:[%s717_s1 + $0x18] sm:$0xff]   ;;  %v501_v9 = vld [vmem:[%s717_s1 + $0x20] sm:$0xff]   ;;  %v503_v13 = vld [vmem:[%s717_s1 + $0x28] sm:$0xff]  }
   0x5   :  { %v510_v11 = vld [vmem:[%s718_s0 + $0x4] ss:$8 sps:$4 sm:$0xff]   ;;  %v504_v14 = vld [vmem:[%s717_s1 + $0x70] sm:$0xff]   ;;  %v506_v16 = vld [vmem:[%s717_s1 + $0x78] sm:$0xff]  }
   0x6   :  { %v513_v12 = vld [vmem:[%s718_s0 + $0x44] ss:$8 sps:$4 sm:$0xff]   ;;  %278 = vmatprep.mubr.bf16.mxu0 %v510_v11  ;;  %v505_v15 = vld [vmem:[%s717_s1 + $0x30] sm:$0xff]   ;;  %v507_v17 = vld [vmem:[%s717_s1 + $0x38] sm:$0xff]  }
   0x7   :  { %415 = vmatpush3.bf16.msra.mxu0 %v495_v3  ;;  %485 = vmatpush3.bf16.msra.mxu1 %v495_v3  ;;  %v508_v18 = vld [vmem:[%s718_s0] ss:$8 sps:$4 sm:$0xff]   ;;  %v514_v20 = vld [vmem:[%s718_s0 + $0x14] ss:$8 sps:$4 sm:$0xff]   ;;  %v518_v22 = vld [vmem:[%s718_s0 + $0x10] ss:$8 sps:$4 sm:$0xff]  }
   0x8   :  { %416 = vmatprep.subr.bf16.mxu0 %v496_v4  ;;  %478 = vmatprep.subr.bf16.mxu1 %v496_v4  ;;  %v511_v19 = vld [vmem:[%s718_s0 + $0x40] ss:$8 sps:$4 sm:$0xff]   ;;  %v516_v21 = vld [vmem:[%s718_s0 + $0x54] ss:$8 sps:$4 sm:$0xff]   ;;  %v519_v23 = vld [vmem:[%s718_s0 + $0x50] ss:$8 sps:$4 sm:$0xff]  }
   0x9   :  { %310 = vmatprep.mubr.bf16.mxu1 %v513_v12  ;;  %v520_v24 = vld [vmem:[%s718_s0 + $0x24] ss:$8 sps:$4 sm:$0xff]   ;;  %v524_v26 = vld [vmem:[%s718_s0 + $0x20] ss:$8 sps:$4 sm:$0xff]   ;;  %v526_v28 = vld [vmem:[%s718_s0 + $0x34] ss:$8 sps:$4 sm:$0xff]  }
   0xa   :  { %v522_v25 = vld [vmem:[%s718_s0 + $0x64] ss:$8 sps:$4 sm:$0xff]   ;;  %v525_v27 = vld [vmem:[%s718_s0 + $0x60] ss:$8 sps:$4 sm:$0xff]   ;;  %v528_v29 = vld [vmem:[%s718_s0 + $0x74] ss:$8 sps:$4 sm:$0xff]  }
   0xb   :  { %417 = vmatpush3.bf16.msra.mxu0 %v497_v5  ;;  %486 = vmatpush3.bf16.msra.mxu1 %v497_v5  ;;  %v530_v30 = vld [vmem:[%s718_s0 + $0x30] ss:$8 sps:$4 sm:$0xff]   ;;  %v651_v34 = vld [vmem:[%s719_s2] ss:$0 sm:$0xff] }
   0xc   :  { %418 = vmatprep.subr.bf16.mxu0 %v498_v6  ;;  %479 = vmatprep.subr.bf16.mxu1 %v498_v6  ;;  %v531_v31 = vld [vmem:[%s718_s0 + $0x70] ss:$8 sps:$4 sm:$0xff]  }
   0xf   :  { %419 = vmatpush3.bf16.msra.mxu0 %v499_v7  ;;  %487 = vmatpush3.bf16.msra.mxu1 %v499_v7 }
  0x10   :  { %420 = vmatprep.subr.bf16.mxu0 %v500_v8  ;;  %480 = vmatprep.subr.bf16.mxu1 %v500_v8 }
  0x13   :  { %421 = vmatpush3.bf16.msra.mxu0 %v501_v9  ;;  %488 = vmatpush3.bf16.msra.mxu1 %v501_v9 }
  0x14   :  { %422 = vmatprep.subr.bf16.mxu0 %v502_v10  ;;  %481 = vmatprep.subr.bf16.mxu1 %v502_v10 }
  0x17   :  { %423 = vmatpush3.bf16.msra.mxu0 %v503_v13  ;;  %489 = vmatpush3.bf16.msra.mxu1 %v503_v13 }
  0x18   :  { %424 = vmatprep.subr.bf16.mxu0 %v504_v14  ;;  %482 = vmatprep.subr.bf16.mxu1 %v504_v14 }
  0x1b   :  { %425 = vmatpush3.bf16.msra.mxu0 %v505_v15  ;;  %490 = vmatpush3.bf16.msra.mxu1 %v505_v15 }
  0x1c   :  { %426 = vmatprep.subr.bf16.mxu0 %v506_v16  ;;  %483 = vmatprep.subr.bf16.mxu1 %v506_v16 }
  0x1f   :  { %427 = vmatpush3.bf16.msra.mxu0 %v507_v17  ;;  %491 = vmatpush3.bf16.msra.mxu1 %v507_v17 }
  0x22   :  { %279 = vmatmul.mubr.bf16.vlgmr.msra.gmra.mrb[0].mxu0 %v508_v18  ;;  %311 = vmatmul.mubr.bf16.vlgmr.msra.gmra.mrb[0].mxu1 %v511_v19 }
  0x23   :  { %286 = vmatprep.mubr.bf16.mxu0 %v514_v20  ;;  %318 = vmatprep.mubr.bf16.mxu1 %v516_v21 }
  0x2a   :  { %287 = vmatmul.mubr.bf16.gmra.mrb[4].mxu0 %v518_v22  ;;  %319 = vmatmul.mubr.bf16.gmra.mrb[4].mxu1 %v519_v23 }
  0x2b   :  { %294 = vmatprep.mubr.bf16.mxu0 %v520_v24  ;;  %326 = vmatprep.mubr.bf16.mxu1 %v522_v25 }
  0x32   :  { %295 = vmatmul.mubr.bf16.gmra.mrb[8].mxu0 %v524_v26  ;;  %327 = vmatmul.mubr.bf16.gmra.mrb[8].mxu1 %v525_v27 }
  0x33   :  { %302 = vmatprep.mubr.bf16.mxu0 %v526_v28  ;;  %334 = vmatprep.mubr.bf16.mxu1 %v528_v29 }
  0x3a   :  { %303 = vmatmul.mubr.bf16.gmra.mrb[12].mxu0 %v530_v30  ;;  %335 = vmatmul.mubr.bf16.gmra.mrb[12].mxu1 %v531_v31 }
  0xf5   :  { %v428_v32 = vpop.f32.mrb[0].mxu0  ;;  %v452_v33 = vpop.f32.mrb[0].mxu1 }
  0xf6   :  { %v429_v35 = vpop.f32.mrb[1].mxu0  ;;  %v453_v36 = vpop.f32.mrb[1].mxu1 }
  0xf7   :  { %v430_v37 = vadd.f32 %v429_v35, %v428_v32  ;;  %v454_v38 = vadd.f32 %v453_v36, %v452_v33  ;;  %v431_v39 = vpop.f32.mrb[2].mxu0  ;;  %v455_v40 = vpop.f32.mrb[2].mxu1 }
  0xf8   :  { %v432_v41 = vpop.f32.mrb[3].mxu0  ;;  %v456_v42 = vpop.f32.mrb[3].mxu1 }
  0xf9   :  { %v281_v43 = vadd.f32 %v430_v37, %v651_v34  ;;  %v313_v44 = vadd.f32 %v454_v38, %v651_v34  ;;  %v433_v45 = vadd.f32 %v432_v41, %v431_v39  ;;  %v457_v46 = vadd.f32 %v456_v42, %v455_v40 }
  0xfb   :  { %v343_v47 = vmax.f32 %v281_v43, 0.0  ;;  %v351_v48 = vmax.f32 %v313_v44, 0.0  ;;  %v284_v49 = vadd.f32 %v433_v45, %v651_v34  ;;  %v316_v50 = vadd.f32 %v457_v46, %v651_v34 }
  0xfd   :  { %359 = vst [vmem:[%s720_s3] sm:$0xff] %v343_v47  ;;  %367 = vst [vmem:[%s720_s3 + $0x40] sm:$0xff] %v351_v48  ;;  %v344_v51 = vmax.f32 %v284_v49, 0.0  ;;  %v352_v52 = vmax.f32 %v316_v50, 0.0  ;;  %v434_v53 = vpop.f32.mrb[4].mxu0  ;;  %v458_v54 = vpop.f32.mrb[4].mxu1 }
  0xfe   :  { %v435_v55 = vpop.f32.mrb[5].mxu0  ;;  %v459_v56 = vpop.f32.mrb[5].mxu1 }
  0xff   :  { %360 = vst [vmem:[%s720_s3 + $0x8] sm:$0xff] %v344_v51  ;;  %368 = vst [vmem:[%s720_s3 + $0x48] sm:$0xff] %v352_v52  ;;  %v436_v57 = vadd.f32 %v435_v55, %v434_v53  ;;  %v460_v58 = vadd.f32 %v459_v56, %v458_v54  ;;  %v437_v59 = vpop.f32.mrb[6].mxu0  ;;  %v461_v60 = vpop.f32.mrb[6].mxu1 }
 0x100   :  { %v438_v61 = vpop.f32.mrb[7].mxu0  ;;  %v462_v62 = vpop.f32.mrb[7].mxu1 }
 0x101   :  { %v289_v63 = vadd.f32 %v436_v57, %v651_v34  ;;  %v321_v0 = vadd.f32 %v460_v58, %v651_v34  ;;  %v439_v1 = vadd.f32 %v438_v61, %v437_v59  ;;  %v463_v2 = vadd.f32 %v462_v62, %v461_v60 }
 0x103   :  { %v345_v3 = vmax.f32 %v289_v63, 0.0  ;;  %v353_v4 = vmax.f32 %v321_v0, 0.0  ;;  %v292_v5 = vadd.f32 %v439_v1, %v651_v34  ;;  %v324_v6 = vadd.f32 %v463_v2, %v651_v34 }
 0x105   :  { %361 = vst [vmem:[%s720_s3 + $0x10] sm:$0xff] %v345_v3  ;;  %369 = vst [vmem:[%s720_s3 + $0x50] sm:$0xff] %v353_v4  ;;  %v346_v7 = vmax.f32 %v292_v5, 0.0  ;;  %v354_v8 = vmax.f32 %v324_v6, 0.0  ;;  %v440_v9 = vpop.f32.mrb[8].mxu0  ;;  %v464_v10 = vpop.f32.mrb[8].mxu1 }
 0x106   :  { %v441_v11 = vpop.f32.mrb[9].mxu0  ;;  %v465_v12 = vpop.f32.mrb[9].mxu1 }
 0x107   :  { %362 = vst [vmem:[%s720_s3 + $0x18] sm:$0xff] %v346_v7  ;;  %370 = vst [vmem:[%s720_s3 + $0x58] sm:$0xff] %v354_v8  ;;  %v442_v13 = vadd.f32 %v441_v11, %v440_v9  ;;  %v466_v14 = vadd.f32 %v465_v12, %v464_v10  ;;  %v443_v15 = vpop.f32.mrb[10].mxu0  ;;  %v467_v16 = vpop.f32.mrb[10].mxu1 }
 0x108   :  { %v444_v17 = vpop.f32.mrb[11].mxu0  ;;  %v468_v18 = vpop.f32.mrb[11].mxu1 }
 0x109   :  { %v297_v19 = vadd.f32 %v442_v13, %v651_v34  ;;  %v329_v20 = vadd.f32 %v466_v14, %v651_v34  ;;  %v445_v21 = vadd.f32 %v444_v17, %v443_v15  ;;  %v469_v22 = vadd.f32 %v468_v18, %v467_v16 }
 0x10b   :  { %v347_v23 = vmax.f32 %v297_v19, 0.0  ;;  %v355_v24 = vmax.f32 %v329_v20, 0.0  ;;  %v300_v25 = vadd.f32 %v445_v21, %v651_v34  ;;  %v332_v26 = vadd.f32 %v469_v22, %v651_v34 }
 0x10d   :  { %363 = vst [vmem:[%s720_s3 + $0x20] sm:$0xff] %v347_v23  ;;  %371 = vst [vmem:[%s720_s3 + $0x60] sm:$0xff] %v355_v24  ;;  %v348_v27 = vmax.f32 %v300_v25, 0.0  ;;  %v356_v28 = vmax.f32 %v332_v26, 0.0  ;;  %v446_v29 = vpop.f32.mrb[12].mxu0  ;;  %v470_v30 = vpop.f32.mrb[12].mxu1 }
 0x10e   :  { %v447_v31 = vpop.f32.mrb[13].mxu0  ;;  %v471_v32 = vpop.f32.mrb[13].mxu1 }
 0x10f   :  { %364 = vst [vmem:[%s720_s3 + $0x28] sm:$0xff] %v348_v27  ;;  %372 = vst [vmem:[%s720_s3 + $0x68] sm:$0xff] %v356_v28  ;;  %v448_v33 = vadd.f32 %v447_v31, %v446_v29  ;;  %v472_v35 = vadd.f32 %v471_v32, %v470_v30  ;;  %v449_v36 = vpop.f32.mrb[14].mxu0  ;;  %v473_v37 = vpop.f32.mrb[14].mxu1 }
 0x110   :  { %v450_v38 = vpop.f32.mrb[15].mxu0  ;;  %v474_v39 = vpop.f32.mrb[15].mxu1 }
 0x111   :  { %v305_v40 = vadd.f32 %v448_v33, %v651_v34  ;;  %v337_v41 = vadd.f32 %v472_v35, %v651_v34  ;;  %v451_v42 = vadd.f32 %v450_v38, %v449_v36  ;;  %v475_v43 = vadd.f32 %v474_v39, %v473_v37 }
 0x113   :  { %v349_v44 = vmax.f32 %v305_v40, 0.0  ;;  %v357_v45 = vmax.f32 %v337_v41, 0.0  ;;  %v308_v46 = vadd.f32 %v451_v42, %v651_v34  ;;  %v340_v47 = vadd.f32 %v475_v43, %v651_v34 }
 0x115   :  { %365 = vst [vmem:[%s720_s3 + $0x30] sm:$0xff] %v349_v44  ;;  %373 = vst [vmem:[%s720_s3 + $0x70] sm:$0xff] %v357_v45  ;;  %v350_v48 = vmax.f32 %v308_v46, 0.0  ;;  %v358_v49 = vmax.f32 %v340_v47, 0.0 }
 0x117   :  { %366 = vst [vmem:[%s720_s3 + $0x38] sm:$0xff] %v350_v48  ;;  %374 = vst [vmem:[%s720_s3 + $0x78] sm:$0xff] %v358_v49 }

// kernel: resnet_backbone.21
= control target key start
LH: loop header
LB: loop body
LE: loop exit
PB: predicated region body
PF: predicated region fallthrough
CT: control target
= control target key end

     0   :  { %s805_s1 = inlined_call_operand.vmem [shape: bf16[256,128], index: 1, kind: input, shape index: {}]   ;;  %s806_s0 = inlined_call_operand.vmem [shape: bf16[128,256], index: 0, kind: input, shape index: {}]   ;;  %s807_s2 = inlined_call_operand.vmem [shape: f32[1,128], index: 2, kind: input, shape index: {}]   ;;  %s808_s3 = inlined_call_operand.vmem [shape: f32[128,128], index: 3, kind: input, shape index: {}]   ;;  %s809_s4 = inlined_call_operand.vmem [shape: f32[128,128], index: 4, kind: output, shape index: {}]  }
   0x1   :  { %v527_v0 = vld [vmem:[%s805_s1 + $0x40] sm:$0xff]   ;;  %v529_v2 = vld [vmem:[%s805_s1 + $0x48] sm:$0xff]   ;;  %v531_v4 = vld [vmem:[%s805_s1 + $0x50] sm:$0xff]  }
   0x2   :  { %v528_v1 = vld [vmem:[%s805_s1] sm:$0xff]   ;;  %447 = vmatprep.subr.bf16.mxu0 %v527_v0  ;;  %511 = vmatprep.subr.bf16.mxu1 %v527_v0  ;;  %v530_v3 = vld [vmem:[%s805_s1 + $0x8] sm:$0xff]   ;;  %v532_v5 = vld [vmem:[%s805_s1 + $0x10] sm:$0xff]  }
   0x3   :  { %448 = vmatpush3.bf16.msra.mxu0 %v528_v1  ;;  %519 = vmatpush3.bf16.msra.mxu1 %v528_v1  ;;  %v533_v6 = vld [vmem:[%s805_s1 + $0x58] sm:$0xff]   ;;  %v535_v8 = vld [vmem:[%s805_s1 + $0x60] sm:$0xff]   ;;  %v537_v10 = vld [vmem:[%s805_s1 + $0x68] sm:$0xff]  }
   0x4   :  { %449 = vmatprep.subr.bf16.mxu0 %v529_v2  ;;  %512 = vmatprep.subr.bf16.mxu1 %v529_v2  ;;  %v534_v7 = vld [vmem:[%s805_s1 + $0x18] sm:$0xff]   ;;  %v536_v9 = vld [vmem:[%s805_s1 + $0x20] sm:$0xff]   ;;  %v538_v13 = vld [vmem:[%s805_s1 + $0x28] sm:$0xff]  }
   0x5   :  { %v545_v11 = vld [vmem:[%s806_s0 + $0x4] ss:$8 sps:$4 sm:$0xff]   ;;  %v539_v14 = vld [vmem:[%s805_s1 + $0x70] sm:$0xff]   ;;  %v541_v16 = vld [vmem:[%s805_s1 + $0x78] sm:$0xff]  }
   0x6   :  { %v548_v12 = vld [vmem:[%s806_s0 + $0x44] ss:$8 sps:$4 sm:$0xff]   ;;  %281 = vmatprep.mubr.bf16.mxu0 %v545_v11  ;;  %v540_v15 = vld [vmem:[%s805_s1 + $0x30] sm:$0xff]   ;;  %v542_v17 = vld [vmem:[%s805_s1 + $0x38] sm:$0xff]  }
   0x7   :  { %450 = vmatpush3.bf16.msra.mxu0 %v530_v3  ;;  %520 = vmatpush3.bf16.msra.mxu1 %v530_v3  ;;  %v543_v18 = vld [vmem:[%s806_s0] ss:$8 sps:$4 sm:$0xff]   ;;  %v549_v20 = vld [vmem:[%s806_s0 + $0x14] ss:$8 sps:$4 sm:$0xff]   ;;  %v553_v22 = vld [vmem:[%s806_s0 + $0x10] ss:$8 sps:$4 sm:$0xff]  }
   0x8   :  { %451 = vmatprep.subr.bf16.mxu0 %v531_v4  ;;  %513 = vmatprep.subr.bf16.mxu1 %v531_v4  ;;  %v546_v19 = vld [vmem:[%s806_s0 + $0x40] ss:$8 sps:$4 sm:$0xff]   ;;  %v551_v21 = vld [vmem:[%s806_s0 + $0x54] ss:$8 sps:$4 sm:$0xff]   ;;  %v554_v23 = vld [vmem:[%s806_s0 + $0x50] ss:$8 sps:$4 sm:$0xff]  }
   0x9   :  { %313 = vmatprep.mubr.bf16.mxu1 %v548_v12  ;;  %v555_v24 = vld [vmem:[%s806_s0 + $0x24] ss:$8 sps:$4 sm:$0xff]   ;;  %v559_v26 = vld [vmem:[%s806_s0 + $0x20] ss:$8 sps:$4 sm:$0xff]   ;;  %v561_v28 = vld [vmem:[%s806_s0 + $0x34] ss:$8 sps:$4 sm:$0xff]  }
   0xa   :  { %v557_v25 = vld [vmem:[%s806_s0 + $0x64] ss:$8 sps:$4 sm:$0xff]   ;;  %v560_v27 = vld [vmem:[%s806_s0 + $0x60] ss:$8 sps:$4 sm:$0xff]   ;;  %v563_v29 = vld [vmem:[%s806_s0 + $0x74] ss:$8 sps:$4 sm:$0xff]  }
   0xb   :  { %452 = vmatpush3.bf16.msra.mxu0 %v532_v5  ;;  %521 = vmatpush3.bf16.msra.mxu1 %v532_v5  ;;  %v565_v30 = vld [vmem:[%s806_s0 + $0x30] ss:$8 sps:$4 sm:$0xff]   ;;  %v691_v34 = vld [vmem:[%s807_s2] ss:$0 sm:$0xff]  ;;  %v347_v49 = vld [vmem:[%s808_s3 + $0x8] sm:$0xff] }
   0xc   :  { %453 = vmatprep.subr.bf16.mxu0 %v533_v6  ;;  %514 = vmatprep.subr.bf16.mxu1 %v533_v6  ;;  %v566_v31 = vld [vmem:[%s806_s0 + $0x70] ss:$8 sps:$4 sm:$0xff]   ;;  %v346_v41 = vld [vmem:[%s808_s3] sm:$0xff]  ;;  %v355_v50 = vld [vmem:[%s808_s3 + $0x48] sm:$0xff] }
   0xd   :  { %v354_v42 = vld [vmem:[%s808_s3 + $0x40] sm:$0xff]  ;;  %v348_v5 = vld [vmem:[%s808_s3 + $0x10] sm:$0xff] }
   0xe   :  { %v356_v6 = vld [vmem:[%s808_s3 + $0x50] sm:$0xff] }
   0xf   :  { %454 = vmatpush3.bf16.msra.mxu0 %v534_v7  ;;  %522 = vmatpush3.bf16.msra.mxu1 %v534_v7 }
  0x10   :  { %455 = vmatprep.subr.bf16.mxu0 %v535_v8  ;;  %515 = vmatprep.subr.bf16.mxu1 %v535_v8 }
  0x13   :  { %456 = vmatpush3.bf16.msra.mxu0 %v536_v9  ;;  %523 = vmatpush3.bf16.msra.mxu1 %v536_v9 }
  0x14   :  { %457 = vmatprep.subr.bf16.mxu0 %v537_v10  ;;  %516 = vmatprep.subr.bf16.mxu1 %v537_v10 }
  0x17   :  { %458 = vmatpush3.bf16.msra.mxu0 %v538_v13  ;;  %524 = vmatpush3.bf16.msra.mxu1 %v538_v13  ;;  %v349_v13 = vld [vmem:[%s808_s3 + $0x18] sm:$0xff] }
  0x18   :  { %459 = vmatprep.subr.bf16.mxu0 %v539_v14  ;;  %517 = vmatprep.subr.bf16.mxu1 %v539_v14  ;;  %v357_v14 = vld [vmem:[%s808_s3 + $0x58] sm:$0xff] }
  0x1b   :  { %460 = vmatpush3.bf16.msra.mxu0 %v540_v15  ;;  %525 = vmatpush3.bf16.msra.mxu1 %v540_v15 }
  0x1c   :  { %461 = vmatprep.subr.bf16.mxu0 %v541_v16  ;;  %518 = vmatprep.subr.bf16.mxu1 %v541_v16 }
  0x1f   :  { %462 = vmatpush3.bf16.msra.mxu0 %v542_v17  ;;  %526 = vmatpush3.bf16.msra.mxu1 %v542_v17 }
  0x22   :  { %282 = vmatmul.mubr.bf16.vlgmr.msra.gmra.mrb[0].mxu0 %v543_v18  ;;  %314 = vmatmul.mubr.bf16.vlgmr.msra.gmra.mrb[0].mxu1 %v546_v19 }
  0x23   :  { %289 = vmatprep.mubr.bf16.mxu0 %v549_v20  ;;  %321 = vmatprep.mubr.bf16.mxu1 %v551_v21 }
  0x2a   :  { %290 = vmatmul.mubr.bf16.gmra.mrb[4].mxu0 %v553_v22  ;;  %322 = vmatmul.mubr.bf16.gmra.mrb[4].mxu1 %v554_v23 }
  0x2b   :  { %297 = vmatprep.mubr.bf16.mxu0 %v555_v24  ;;  %329 = vmatprep.mubr.bf16.mxu1 %v557_v25 }
  0x32   :  { %298 = vmatmul.mubr.bf16.gmra.mrb[8].mxu0 %v559_v26  ;;  %330 = vmatmul.mubr.bf16.gmra.mrb[8].mxu1 %v560_v27 }
  0x33   :  { %305 = vmatprep.mubr.bf16.mxu0 %v561_v28  ;;  %337 = vmatprep.mubr.bf16.mxu1 %v563_v29 }
  0x3a   :  { %306 = vmatmul.mubr.bf16.gmra.mrb[12].mxu0 %v565_v30  ;;  %338 = vmatmul.mubr.bf16.gmra.mrb[12].mxu1 %v566_v31 }
  0xf5   :  { %v463_v32 = vpop.f32.mrb[0].mxu0  ;;  %v487_v33 = vpop.f32.mrb[0].mxu1 }
  0xf6   :  { %v464_v35 = vpop.f32.mrb[1].mxu0  ;;  %v488_v36 = vpop.f32.mrb[1].mxu1 }
  0xf7   :  { %v465_v37 = vadd.f32 %v464_v35, %v463_v32  ;;  %v489_v38 = vadd.f32 %v488_v36, %v487_v33  ;;  %v466_v39 = vpop.f32.mrb[2].mxu0  ;;  %v490_v40 = vpop.f32.mrb[2].mxu1  ;;  %v350_v33 = vld [vmem:[%s808_s3 + $0x20] sm:$0xff] }
  0xf8   :  { %v467_v43 = vpop.f32.mrb[3].mxu0  ;;  %v491_v44 = vpop.f32.mrb[3].mxu1  ;;  %v358_v35 = vld [vmem:[%s808_s3 + $0x60] sm:$0xff] }
  0xf9   :  { %v284_v45 = vadd.f32 %v465_v37, %v691_v34  ;;  %v316_v46 = vadd.f32 %v489_v38, %v691_v34  ;;  %v468_v47 = vadd.f32 %v467_v43, %v466_v39  ;;  %v492_v48 = vadd.f32 %v491_v44, %v490_v40  ;;  %v359_v43 = vld [vmem:[%s808_s3 + $0x68] sm:$0xff] }
  0xfb   :  { %v362_v51 = vadd.f32 %v346_v41, %v284_v45  ;;  %v370_v52 = vadd.f32 %v354_v42, %v316_v46  ;;  %v287_v53 = vadd.f32 %v468_v47, %v691_v34  ;;  %v319_v54 = vadd.f32 %v492_v48, %v691_v34  ;;  %v351_v42 = vld [vmem:[%s808_s3 + $0x28] sm:$0xff] }
  0xfd   :  { %v378_v55 = vmax.f32 %v362_v51, 0.0  ;;  %v386_v56 = vmax.f32 %v370_v52, 0.0  ;;  %v363_v57 = vadd.f32 %v347_v49, %v287_v53  ;;  %v371_v58 = vadd.f32 %v355_v50, %v319_v54  ;;  %v469_v59 = vpop.f32.mrb[4].mxu0  ;;  %v493_v60 = vpop.f32.mrb[4].mxu1 }
  0xfe   :  { %v470_v61 = vpop.f32.mrb[5].mxu0  ;;  %v494_v62 = vpop.f32.mrb[5].mxu1 }
  0xff   :  { %394 = vst [vmem:[%s809_s4] sm:$0xff] %v378_v55  ;;  %402 = vst [vmem:[%s809_s4 + $0x40] sm:$0xff] %v386_v56  ;;  %v379_v63 = vmax.f32 %v363_v57, 0.0  ;;  %v387_v0 = vmax.f32 %v371_v58, 0.0  ;;  %v471_v1 = vadd.f32 %v470_v61, %v469_v59  ;;  %v495_v2 = vadd.f32 %v494_v62, %v493_v60  ;;  %v472_v3 = vpop.f32.mrb[6].mxu0  ;;  %v496_v4 = vpop.f32.mrb[6].mxu1  ;;  %v352_v62 = vld [vmem:[%s808_s3 + $0x30] sm:$0xff] }
 0x100   :  { %v473_v7 = vpop.f32.mrb[7].mxu0  ;;  %v497_v8 = vpop.f32.mrb[7].mxu1 }
 0x101   :  { %395 = vst [vmem:[%s809_s4 + $0x8] sm:$0xff] %v379_v63  ;;  %403 = vst [vmem:[%s809_s4 + $0x48] sm:$0xff] %v387_v0  ;;  %v292_v9 = vadd.f32 %v471_v1, %v691_v34  ;;  %v324_v10 = vadd.f32 %v495_v2, %v691_v34  ;;  %v474_v11 = vadd.f32 %v473_v7, %v472_v3  ;;  %v360_v63 = vld [vmem:[%s808_s3 + $0x70] sm:$0xff]  ;;  %v361_v7 = vld [vmem:[%s808_s3 + $0x78] sm:$0xff] }
 0x102   :  { %v498_v12 = vadd.f32 %v497_v8, %v496_v4 }
 0x103   :  { %v364_v15 = vadd.f32 %v348_v5, %v292_v9  ;;  %v372_v16 = vadd.f32 %v356_v6, %v324_v10  ;;  %v295_v17 = vadd.f32 %v474_v11, %v691_v34  ;;  %v353_v6 = vld [vmem:[%s808_s3 + $0x38] sm:$0xff] }
 0x104   :  { %v327_v18 = vadd.f32 %v498_v12, %v691_v34 }
 0x105   :  { %v380_v19 = vmax.f32 %v364_v15, 0.0  ;;  %v388_v20 = vmax.f32 %v372_v16, 0.0  ;;  %v365_v21 = vadd.f32 %v349_v13, %v295_v17  ;;  %v475_v23 = vpop.f32.mrb[8].mxu0  ;;  %v499_v24 = vpop.f32.mrb[8].mxu1 }
 0x106   :  { %v373_v22 = vadd.f32 %v357_v14, %v327_v18  ;;  %v476_v25 = vpop.f32.mrb[9].mxu0  ;;  %v500_v26 = vpop.f32.mrb[9].mxu1 }
 0x107   :  { %396 = vst [vmem:[%s809_s4 + $0x10] sm:$0xff] %v380_v19  ;;  %404 = vst [vmem:[%s809_s4 + $0x50] sm:$0xff] %v388_v20  ;;  %v381_v27 = vmax.f32 %v365_v21, 0.0  ;;  %v477_v29 = vadd.f32 %v476_v25, %v475_v23  ;;  %v501_v30 = vadd.f32 %v500_v26, %v499_v24  ;;  %v478_v31 = vpop.f32.mrb[10].mxu0  ;;  %v502_v32 = vpop.f32.mrb[10].mxu1 }
 0x108   :  { %v389_v28 = vmax.f32 %v373_v22, 0.0  ;;  %v479_v36 = vpop.f32.mrb[11].mxu0  ;;  %v503_v37 = vpop.f32.mrb[11].mxu1 }
 0x109   :  { %397 = vst [vmem:[%s809_s4 + $0x18] sm:$0xff] %v381_v27  ;;  %v300_v38 = vadd.f32 %v477_v29, %v691_v34  ;;  %v332_v39 = vadd.f32 %v501_v30, %v691_v34  ;;  %v480_v40 = vadd.f32 %v479_v36, %v478_v31  ;;  %v504_v41 = vadd.f32 %v503_v37, %v502_v32 }
 0x10a   :  { %405 = vst [vmem:[%s809_s4 + $0x58] sm:$0xff] %v389_v28 }
 0x10b   :  { %v366_v44 = vadd.f32 %v350_v33, %v300_v38  ;;  %v374_v45 = vadd.f32 %v358_v35, %v332_v39  ;;  %v303_v46 = vadd.f32 %v480_v40, %v691_v34  ;;  %v335_v47 = vadd.f32 %v504_v41, %v691_v34 }
 0x10d   :  { %v382_v48 = vmax.f32 %v366_v44, 0.0  ;;  %v390_v49 = vmax.f32 %v374_v45, 0.0  ;;  %v367_v50 = vadd.f32 %v351_v42, %v303_v46  ;;  %v375_v51 = vadd.f32 %v359_v43, %v335_v47  ;;  %v481_v52 = vpop.f32.mrb[12].mxu0  ;;  %v505_v53 = vpop.f32.mrb[12].mxu1 }
 0x10e   :  { %v482_v54 = vpop.f32.mrb[13].mxu0  ;;  %v506_v55 = vpop.f32.mrb[13].mxu1 }
 0x10f   :  { %398 = vst [vmem:[%s809_s4 + $0x20] sm:$0xff] %v382_v48  ;;  %406 = vst [vmem:[%s809_s4 + $0x60] sm:$0xff] %v390_v49  ;;  %v383_v56 = vmax.f32 %v367_v50, 0.0  ;;  %v391_v57 = vmax.f32 %v375_v51, 0.0  ;;  %v483_v58 = vadd.f32 %v482_v54, %v481_v52  ;;  %v507_v59 = vadd.f32 %v506_v55, %v505_v53  ;;  %v484_v60 = vpop.f32.mrb[14].mxu0  ;;  %v508_v61 = vpop.f32.mrb[14].mxu1 }
 0x110   :  { %v485_v0 = vpop.f32.mrb[15].mxu0  ;;  %v509_v1 = vpop.f32.mrb[15].mxu1 }
 0x111   :  { %399 = vst [vmem:[%s809_s4 + $0x28] sm:$0xff] %v383_v56  ;;  %407 = vst [vmem:[%s809_s4 + $0x68] sm:$0xff] %v391_v57  ;;  %v308_v2 = vadd.f32 %v483_v58, %v691_v34  ;;  %v340_v3 = vadd.f32 %v507_v59, %v691_v34  ;;  %v486_v4 = vadd.f32 %v485_v0, %v484_v60 }
 0x112   :  { %v510_v5 = vadd.f32 %v509_v1, %v508_v61 }
 0x113   :  { %v368_v8 = vadd.f32 %v352_v62, %v308_v2  ;;  %v376_v9 = vadd.f32 %v360_v63, %v340_v3  ;;  %v311_v10 = vadd.f32 %v486_v4, %v691_v34 }
 0x114   :  { %v343_v11 = vadd.f32 %v510_v5, %v691_v34 }
 0x115   :  { %v384_v12 = vmax.f32 %v368_v8, 0.0  ;;  %v392_v13 = vmax.f32 %v376_v9, 0.0  ;;  %v369_v14 = vadd.f32 %v353_v6, %v311_v10 }
 0x116   :  { %v377_v15 = vadd.f32 %v361_v7, %v343_v11 }
 0x117   :  { %400 = vst [vmem:[%s809_s4 + $0x30] sm:$0xff] %v384_v12  ;;  %408 = vst [vmem:[%s809_s4 + $0x70] sm:$0xff] %v392_v13  ;;  %v385_v16 = vmax.f32 %v369_v14, 0.0 }
 0x118   :  { %v393_v17 = vmax.f32 %v377_v15, 0.0 }
 0x119   :  { %401 = vst [vmem:[%s809_s4 + $0x38] sm:$0xff] %v385_v16 }
 0x11a   :  { %409 = vst [vmem:[%s809_s4 + $0x78] sm:$0xff] %v393_v17 }

// kernel: resnet_backbone.24
= control target key start
LH: loop header
LB: loop body
LE: loop exit
PB: predicated region body
PF: predicated region fallthrough
CT: control target
= control target key end

     0   :  { %s417_s1 = inlined_call_operand.vmem [shape: bf16[256,128], index: 1, kind: input, shape index: {}]   ;;  %s418_s0 = inlined_call_operand.vmem [shape: bf16[32,256], index: 0, kind: input, shape index: {}]   ;;  %s419_s2 = inlined_call_operand.vmem [shape: f32[1,128], index: 2, kind: input, shape index: {}]   ;;  %s420_s3 = inlined_call_operand.vmem [shape: f32[32,128], index: 3, kind: output, shape index: {}]  }
   0x1   :  { %v300_v0 = vld [vmem:[%s417_s1 + $0x40] sm:$0xff]   ;;  %v302_v2 = vld [vmem:[%s417_s1 + $0x48] sm:$0xff]   ;;  %v304_v4 = vld [vmem:[%s417_s1 + $0x50] sm:$0xff]  }
   0x2   :  { %v301_v1 = vld [vmem:[%s417_s1] sm:$0xff]   ;;  %256 = vmatprep.subr.bf16.mxu0 %v300_v0  ;;  %284 = vmatprep.subr.bf16.mxu1 %v300_v0  ;;  %v303_v3 = vld [vmem:[%s417_s1 + $0x8] sm:$0xff]   ;;  %v305_v5 = vld [vmem:[%s417_s1 + $0x10] sm:$0xff]  }
   0x3   :  { %257 = vmatpush3.bf16.msra.mxu0 %v301_v1  ;;  %292 = vmatpush3.bf16.msra.mxu1 %v301_v1  ;;  %v306_v6 = vld [vmem:[%s417_s1 + $0x58] sm:$0xff]   ;;  %v308_v8 = vld [vmem:[%s417_s1 + $0x60] sm:$0xff]   ;;  %v310_v10 = vld [vmem:[%s417_s1 + $0x68] sm:$0xff]  }
   0x4   :  { %258 = vmatprep.subr.bf16.mxu0 %v302_v2  ;;  %285 = vmatprep.subr.bf16.mxu1 %v302_v2  ;;  %v307_v7 = vld [vmem:[%s417_s1 + $0x18] sm:$0xff]   ;;  %v309_v9 = vld [vmem:[%s417_s1 + $0x20] sm:$0xff]   ;;  %v311_v13 = vld [vmem:[%s417_s1 + $0x28] sm:$0xff]  }
   0x5   :  { %v318_v11 = vld [vmem:[%s418_s0 + $0x4] ss:$8 sps:$4 sm:$0xff]   ;;  %v321_v12 = vld [vmem:[%s418_s0 + $0x14] ss:$8 sps:$4 sm:$0xff]   ;;  %v316_v18 = vld [vmem:[%s418_s0] ss:$8 sps:$4 sm:$0xff]  }
   0x6   :  { %v312_v14 = vld [vmem:[%s417_s1 + $0x70] sm:$0xff]   ;;  %206 = vmatprep.mubr.bf16.mxu0 %v318_v11  ;;  %214 = vmatprep.mubr.bf16.mxu1 %v321_v12  ;;  %v314_v16 = vld [vmem:[%s417_s1 + $0x78] sm:$0xff]   ;;  %v235_v22 = vld [vmem:[%s419_s2] ss:$0 sm:$0xff] }
   0x7   :  { %259 = vmatpush3.bf16.msra.mxu0 %v303_v3  ;;  %293 = vmatpush3.bf16.msra.mxu1 %v303_v3  ;;  %v313_v15 = vld [vmem:[%s417_s1 + $0x30] sm:$0xff]   ;;  %v315_v17 = vld [vmem:[%s417_s1 + $0x38] sm:$0xff]  }
   0x8   :  { %260 = vmatprep.subr.bf16.mxu0 %v304_v4  ;;  %286 = vmatprep.subr.bf16.mxu1 %v304_v4  ;;  %v319_v19 = vld [vmem:[%s418_s0 + $0x10] ss:$8 sps:$4 sm:$0xff]  }
   0xb   :  { %261 = vmatpush3.bf16.msra.mxu0 %v305_v5  ;;  %294 = vmatpush3.bf16.msra.mxu1 %v305_v5 }
   0xc   :  { %262 = vmatprep.subr.bf16.mxu0 %v306_v6  ;;  %287 = vmatprep.subr.bf16.mxu1 %v306_v6 }
   0xf   :  { %263 = vmatpush3.bf16.msra.mxu0 %v307_v7  ;;  %295 = vmatpush3.bf16.msra.mxu1 %v307_v7 }
  0x10   :  { %264 = vmatprep.subr.bf16.mxu0 %v308_v8  ;;  %288 = vmatprep.subr.bf16.mxu1 %v308_v8 }
  0x13   :  { %265 = vmatpush3.bf16.msra.mxu0 %v309_v9  ;;  %296 = vmatpush3.bf16.msra.mxu1 %v309_v9 }
  0x14   :  { %266 = vmatprep.subr.bf16.mxu0 %v310_v10  ;;  %289 = vmatprep.subr.bf16.mxu1 %v310_v10 }
  0x17   :  { %267 = vmatpush3.bf16.msra.mxu0 %v311_v13  ;;  %297 = vmatpush3.bf16.msra.mxu1 %v311_v13 }
  0x18   :  { %268 = vmatprep.subr.bf16.mxu0 %v312_v14  ;;  %290 = vmatprep.subr.bf16.mxu1 %v312_v14 }
  0x1b   :  { %269 = vmatpush3.bf16.msra.mxu0 %v313_v15  ;;  %298 = vmatpush3.bf16.msra.mxu1 %v313_v15 }
  0x1c   :  { %270 = vmatprep.subr.bf16.mxu0 %v314_v16  ;;  %291 = vmatprep.subr.bf16.mxu1 %v314_v16 }
  0x1f   :  { %271 = vmatpush3.bf16.msra.mxu0 %v315_v17  ;;  %299 = vmatpush3.bf16.msra.mxu1 %v315_v17 }
  0x22   :  { %207 = vmatmul.mubr.bf16.vlgmr.msra.gmra.mrb[0].mxu0 %v316_v18  ;;  %215 = vmatmul.mubr.bf16.vlgmr.msra.gmra.mrb[0].mxu1 %v319_v19 }
  0xf5   :  { %v272_v20 = vpop.f32.mrb[0].mxu0  ;;  %v278_v21 = vpop.f32.mrb[0].mxu1 }
  0xf6   :  { %v273_v23 = vpop.f32.mrb[1].mxu0  ;;  %v279_v24 = vpop.f32.mrb[1].mxu1 }
  0xf7   :  { %v274_v25 = vadd.f32 %v273_v23, %v272_v20  ;;  %v280_v26 = vadd.f32 %v279_v24, %v278_v21  ;;  %v275_v27 = vpop.f32.mrb[2].mxu0  ;;  %v281_v28 = vpop.f32.mrb[2].mxu1 }
  0xf8   :  { %v276_v29 = vpop.f32.mrb[3].mxu0  ;;  %v282_v30 = vpop.f32.mrb[3].mxu1 }
  0xf9   :  { %v209_v31 = vadd.f32 %v274_v25, %v235_v22  ;;  %v217_v32 = vadd.f32 %v280_v26, %v235_v22  ;;  %v277_v33 = vadd.f32 %v276_v29, %v275_v27  ;;  %v283_v34 = vadd.f32 %v282_v30, %v281_v28 }
  0xfb   :  { %v223_v35 = vmax.f32 %v209_v31, 0.0  ;;  %v225_v36 = vmax.f32 %v217_v32, 0.0  ;;  %v212_v37 = vadd.f32 %v277_v33, %v235_v22  ;;  %v220_v38 = vadd.f32 %v283_v34, %v235_v22 }
  0xfd   :  { %227 = vst [vmem:[%s420_s3] sm:$0xff] %v223_v35  ;;  %229 = vst [vmem:[%s420_s3 + $0x10] sm:$0xff] %v225_v36  ;;  %v224_v39 = vmax.f32 %v212_v37, 0.0  ;;  %v226_v40 = vmax.f32 %v220_v38, 0.0 }
  0xff   :  { %228 = vst [vmem:[%s420_s3 + $0x8] sm:$0xff] %v224_v39  ;;  %230 = vst [vmem:[%s420_s3 + $0x18] sm:$0xff] %v226_v40 }

// kernel: resnet_backbone.26
= control target key start
LH: loop header
LB: loop body
LE: loop exit
PB: predicated region body
PF: predicated region fallthrough
CT: control target
= control target key end

     0   :  { %s610_s1 = inlined_call_operand.vmem [shape: bf16[384,128], index: 1, kind: input, shape index: {}]   ;;  %s611_s0 = inlined_call_operand.vmem [shape: bf16[32,384], index: 0, kind: input, shape index: {}]   ;;  %s612_s2 = inlined_call_operand.vmem [shape: f32[1,128], index: 2, kind: input, shape index: {}]   ;;  %s613_s3 = inlined_call_operand.vmem [shape: f32[32,128], index: 3, kind: output, shape index: {}]  }
   0x1   :  { %v453_v0 = vld [vmem:[%s610_s1 + $0x40] sm:$0xff]   ;;  %v455_v2 = vld [vmem:[%s610_s1 + $0x48] sm:$0xff]   ;;  %v458_v5 = vld [vmem:[%s610_s1 + $0x50] sm:$0xff]  }
   0x2   :  { %v454_v1 = vld [vmem:[%s610_s1] sm:$0xff]   ;;  %395 = vmatprep.subr.bf16.mxu0 %v453_v0  ;;  %v457_v4 = vld [vmem:[%s610_s1 + $0x8] sm:$0xff]   ;;  %v460_v7 = vld [vmem:[%s610_s1 + $0x10] sm:$0xff]  }
   0x3   :  { %396 = vmatpush3.bf16.msra.mxu0 %v454_v1  ;;  %v456_v3 = vld [vmem:[%s610_s1 + $0x80] sm:$0xff]   ;;  %v459_v6 = vld [vmem:[%s610_s1 + $0x88] sm:$0xff]   ;;  %v461_v8 = vld [vmem:[%s610_s1 + $0x58] sm:$0xff]  }
   0x4   :  { %397 = vmatprep.subr.bf16.mxu0 %v455_v2  ;;  %433 = vmatprep.subr.bf16.mxu1 %v456_v3  ;;  %v462_v9 = vld [vmem:[%s610_s1 + $0x90] sm:$0xff]   ;;  %v463_v10 = vld [vmem:[%s610_s1 + $0x18] sm:$0xff]   ;;  %v464_v11 = vld [vmem:[%s610_s1 + $0x60] sm:$0xff]  }
   0x5   :  { %434 = vmatpush3.bf16.msra.mxu1 %v456_v3  ;;  %v465_v12 = vld [vmem:[%s610_s1 + $0x98] sm:$0xff]   ;;  %v466_v13 = vld [vmem:[%s610_s1 + $0x20] sm:$0xff]   ;;  %v467_v15 = vld [vmem:[%s610_s1 + $0x68] sm:$0xff]  }
   0x6   :  { %435 = vmatprep.subr.bf16.mxu1 %v459_v6  ;;  %v468_v14 = vld [vmem:[%s610_s1 + $0xa0] sm:$0xff]   ;;  %v469_v16 = vld [vmem:[%s610_s1 + $0x28] sm:$0xff]   ;;  %v470_v18 = vld [vmem:[%s610_s1 + $0x70] sm:$0xff]  }
   0x7   :  { %398 = vmatpush3.bf16.msra.mxu0 %v457_v4  ;;  %v471_v17 = vld [vmem:[%s610_s1 + $0xa8] sm:$0xff]   ;;  %v472_v19 = vld [vmem:[%s610_s1 + $0x30] sm:$0xff]   ;;  %v473_v20 = vld [vmem:[%s610_s1 + $0x78] sm:$0xff]  }
   0x8   :  { %399 = vmatprep.subr.bf16.mxu0 %v458_v5  ;;  %v474_v21 = vld [vmem:[%s610_s1 + $0xb0] sm:$0xff]   ;;  %v475_v23 = vld [vmem:[%s610_s1 + $0x38] sm:$0xff]   ;;  %v476_v26 = vld [vmem:[%s611_s0] ss:$12 sps:$4 sm:$0xff]  }
   0x9   :  { %436 = vmatpush3.bf16.msra.mxu1 %v459_v6  ;;  %v478_v22 = vld [vmem:[%s611_s0 + $0x4] ss:$12 sps:$4 sm:$0xff]   ;;  %v480_v24 = vld [vmem:[%s611_s0 + $0x8] ss:$12 sps:$4 sm:$0xff]   ;;  %v479_v25 = vld [vmem:[%s610_s1 + $0xb8] sm:$0xff]  }
   0xa   :  { %437 = vmatprep.subr.bf16.mxu1 %v462_v9  ;;  %286 = vmatprep.mubr.bf16.mxu0 %v478_v22  ;;  %v482_v27 = vld [vmem:[%s611_s0 + $0x1c] ss:$12 sps:$4 sm:$0xff]   ;;  %v481_v28 = vld [vmem:[%s611_s0 + $0x20] ss:$12 sps:$4 sm:$0xff]   ;;  %v484_v29 = vld [vmem:[%s611_s0 + $0x18] ss:$12 sps:$4 sm:$0xff]  }
   0xb   :  { %400 = vmatpush3.bf16.msra.mxu0 %v460_v7  ;;  %449 = vmatprep.mubr.bf16.mxu1 %v480_v24  ;;  %v364_v32 = vld [vmem:[%s612_s2] ss:$0 sm:$0xff] }
   0xc   :  { %401 = vmatprep.subr.bf16.mxu0 %v461_v8 }
   0xd   :  { %438 = vmatpush3.bf16.msra.mxu1 %v462_v9 }
   0xe   :  { %439 = vmatprep.subr.bf16.mxu1 %v465_v12 }
   0xf   :  { %402 = vmatpush3.bf16.msra.mxu0 %v463_v10 }
  0x10   :  { %403 = vmatprep.subr.bf16.mxu0 %v464_v11 }
  0x11   :  { %440 = vmatpush3.bf16.msra.mxu1 %v465_v12 }
  0x12   :  { %441 = vmatprep.subr.bf16.mxu1 %v468_v14 }
  0x13   :  { %404 = vmatpush3.bf16.msra.mxu0 %v466_v13 }
  0x14   :  { %405 = vmatprep.subr.bf16.mxu0 %v467_v15 }
  0x15   :  { %442 = vmatpush3.bf16.msra.mxu1 %v468_v14 }
  0x16   :  { %443 = vmatprep.subr.bf16.mxu1 %v471_v17 }
  0x17   :  { %406 = vmatpush3.bf16.msra.mxu0 %v469_v16 }
  0x18   :  { %407 = vmatprep.subr.bf16.mxu0 %v470_v18 }
  0x19   :  { %444 = vmatpush3.bf16.msra.mxu1 %v471_v17 }
  0x1a   :  { %445 = vmatprep.subr.bf16.mxu1 %v474_v21 }
  0x1b   :  { %408 = vmatpush3.bf16.msra.mxu0 %v472_v19 }
  0x1c   :  { %409 = vmatprep.subr.bf16.mxu0 %v473_v20 }
  0x1d   :  { %446 = vmatpush3.bf16.msra.mxu1 %v474_v21 }
  0x1e   :  { %447 = vmatprep.subr.bf16.mxu1 %v479_v25 }
  0x1f   :  { %410 = vmatpush3.bf16.msra.mxu0 %v475_v23 }
  0x21   :  { %448 = vmatpush3.bf16.msra.mxu1 %v479_v25 }
  0x22   :  { %287 = vmatmul.mubr.bf16.vlgmr.msra.gmra.mrb[0].mxu0 %v476_v26 }
  0x23   :  { %294 = vmatprep.mubr.bf16.mxu0 %v482_v27 }
  0x24   :  { %450 = vmatmul.mubr.bf16.vlgmr.msra.gmra.mrb[0].mxu1 %v481_v28 }
  0x2a   :  { %295 = vmatmul.mubr.bf16.gmra.mrb[4].mxu0 %v484_v29 }
  0xf5   :  { %v411_v30 = vpop.f32.mrb[0].mxu0 }
  0xf6   :  { %v412_v31 = vpop.f32.mrb[1].mxu0 }
  0xf7   :  { %v413_v33 = vadd.f32 %v412_v31, %v411_v30  ;;  %v414_v34 = vpop.f32.mrb[2].mxu0  ;;  %v451_v36 = vpop.f32.mrb[0].mxu1 }
  0xf8   :  { %v415_v35 = vpop.f32.mrb[3].mxu0  ;;  %v337_v39 = vpop.f32.mrb[1].mxu1 }
  0xf9   :  { %v416_v37 = vadd.f32 %v415_v35, %v414_v34  ;;  %v289_v38 = vadd.f32 %v413_v33, %v364_v32  ;;  %v452_v40 = vpop.f32.mrb[2].mxu1 }
  0xfa   :  { %v340_v43 = vpop.f32.mrb[3].mxu1 }
  0xfb   :  { %v338_v41 = vadd.f32 %v337_v39, %v289_v38  ;;  %v292_v42 = vadd.f32 %v416_v37, %v364_v32 }
  0xfd   :  { %v352_v44 = vmax.f32 %v338_v41, 0.0  ;;  %v341_v45 = vadd.f32 %v340_v43, %v292_v42  ;;  %v417_v46 = vpop.f32.mrb[4].mxu0 }
  0xfe   :  { %v418_v47 = vpop.f32.mrb[5].mxu0 }
  0xff   :  { %356 = vst [vmem:[%s613_s3] sm:$0xff] %v352_v44  ;;  %v353_v48 = vmax.f32 %v341_v45, 0.0  ;;  %v419_v49 = vadd.f32 %v418_v47, %v417_v46  ;;  %v420_v50 = vpop.f32.mrb[6].mxu0 }
 0x100   :  { %v421_v51 = vpop.f32.mrb[7].mxu0 }
 0x101   :  { %357 = vst [vmem:[%s613_s3 + $0x8] sm:$0xff] %v353_v48  ;;  %v297_v52 = vadd.f32 %v419_v49, %v364_v32  ;;  %v422_v53 = vadd.f32 %v421_v51, %v420_v50 }
 0x103   :  { %v346_v54 = vadd.f32 %v451_v36, %v297_v52  ;;  %v300_v55 = vadd.f32 %v422_v53, %v364_v32 }
 0x105   :  { %v354_v56 = vmax.f32 %v346_v54, 0.0  ;;  %v349_v57 = vadd.f32 %v452_v40, %v300_v55 }
 0x107   :  { %358 = vst [vmem:[%s613_s3 + $0x10] sm:$0xff] %v354_v56  ;;  %v355_v58 = vmax.f32 %v349_v57, 0.0 }
 0x109   :  { %359 = vst [vmem:[%s613_s3 + $0x18] sm:$0xff] %v355_v58 }

// kernel: resnet_backbone.25
= control target key start
LH: loop header
LB: loop body
LE: loop exit
PB: predicated region body
PF: predicated region fallthrough
CT: control target
= control target key end

     0   :  { %s870_s1 = inlined_call_operand.vmem [shape: bf16[384,128], index: 1, kind: input, shape index: {}]   ;;  %s871_s0 = inlined_call_operand.vmem [shape: bf16[32,384], index: 0, kind: input, shape index: {}]   ;;  %s872_s4 = inlined_call_operand.vmem [shape: bf16[128,128], index: 4, kind: input, shape index: {}]   ;;  %s873_s3 = inlined_call_operand.vmem [shape: bf16[32,128], index: 3, kind: input, shape index: {}]   ;;  %s874_s2 = inlined_call_operand.vmem [shape: f32[1,128], index: 2, kind: input, shape index: {}]   ;;  %s875_s5 = inlined_call_operand.vmem [shape: f32[1,128], index: 5, kind: input, shape index: {}]   ;;  %s876_s6 = inlined_call_operand.vmem [shape: f32[32,128], index: 6, kind: output, shape index: {}]  }
   0x1   :  { %v655_v0 = vld [vmem:[%s870_s1 + $0x80] sm:$0xff]   ;;  %v656_v1 = vld [vmem:[%s870_s1 + $0x88] sm:$0xff]   ;;  %v657_v2 = vld [vmem:[%s870_s1 + $0x90] sm:$0xff]  }
   0x2   :  { %603 = vmatprep.subr.bf16.mxu1 %v655_v0  ;;  %v659_v3 = vld [vmem:[%s870_s1 + $0x40] sm:$0xff]   ;;  %v658_v5 = vld [vmem:[%s870_s1 + $0x98] sm:$0xff]   ;;  %v662_v6 = vld [vmem:[%s870_s1 + $0x48] sm:$0xff]  }
   0x3   :  { %604 = vmatpush3.bf16.msra.mxu1 %v655_v0  ;;  %v660_v4 = vld [vmem:[%s870_s1] sm:$0xff]   ;;  %555 = vmatprep.subr.bf16.mxu0 %v659_v3  ;;  %v663_v7 = vld [vmem:[%s870_s1 + $0x8] sm:$0xff]   ;;  %v665_v8 = vld [vmem:[%s870_s1 + $0x50] sm:$0xff]  }
   0x4   :  { %605 = vmatprep.subr.bf16.mxu1 %v656_v1  ;;  %556 = vmatpush3.bf16.msra.mxu0 %v660_v4  ;;  %v666_v9 = vld [vmem:[%s870_s1 + $0x10] sm:$0xff]   ;;  %v661_v10 = vld [vmem:[%s870_s1 + $0xa0] sm:$0xff]   ;;  %v668_v11 = vld [vmem:[%s870_s1 + $0x58] sm:$0xff]  }
   0x5   :  { %557 = vmatprep.subr.bf16.mxu0 %v662_v6  ;;  %v664_v12 = vld [vmem:[%s870_s1 + $0xa8] sm:$0xff]   ;;  %v669_v13 = vld [vmem:[%s870_s1 + $0x18] sm:$0xff]   ;;  %v671_v14 = vld [vmem:[%s870_s1 + $0x60] sm:$0xff]  }
   0x6   :  { %v673_v15 = vld [vmem:[%s871_s0 + $0x8] ss:$12 sps:$4 sm:$0xff]   ;;  %v672_v16 = vld [vmem:[%s870_s1 + $0x20] sm:$0xff]   ;;  %v670_v19 = vld [vmem:[%s870_s1 + $0xb8] sm:$0xff]  }
   0x7   :  { %606 = vmatpush3.bf16.msra.mxu1 %v656_v1  ;;  %v667_v17 = vld [vmem:[%s870_s1 + $0xb0] sm:$0xff]   ;;  %619 = vmatprep.mubr.bf16.mxu1 %v673_v15  ;;  %v676_v18 = vld [vmem:[%s870_s1 + $0x68] sm:$0xff]   ;;  %v674_v22 = vld [vmem:[%s872_s4] sm:$0xff]  }
   0x8   :  { %607 = vmatprep.subr.bf16.mxu1 %v657_v2  ;;  %558 = vmatpush3.bf16.msra.mxu0 %v663_v7  ;;  %v677_v20 = vld [vmem:[%s870_s1 + $0x28] sm:$0xff]   ;;  %v679_v21 = vld [vmem:[%s870_s1 + $0x70] sm:$0xff]   ;;  %v682_v24 = vld [vmem:[%s870_s1 + $0x78] sm:$0xff]  }
   0x9   :  { %559 = vmatprep.subr.bf16.mxu0 %v665_v8  ;;  %v680_v23 = vld [vmem:[%s870_s1 + $0x30] sm:$0xff]   ;;  %v675_v25 = vld [vmem:[%s871_s0 + $0x20] ss:$12 sps:$4 sm:$0xff]   ;;  %v683_v26 = vld [vmem:[%s870_s1 + $0x38] sm:$0xff]  }
   0xa   :  { %v687_v27 = vld [vmem:[%s871_s0 + $0x4] ss:$12 sps:$4 sm:$0xff]   ;;  %v678_v28 = vld [vmem:[%s872_s4 + $0x8] sm:$0xff]   ;;  %v684_v33 = vld [vmem:[%s872_s4 + $0x18] sm:$0xff]  }
   0xb   :  { %608 = vmatpush3.bf16.msra.mxu1 %v657_v2  ;;  %295 = vmatprep.mubr.bf16.mxu0 %v687_v27  ;;  %v685_v29 = vld [vmem:[%s871_s0] ss:$12 sps:$4 sm:$0xff]   ;;  %v690_v30 = vld [vmem:[%s871_s0 + $0x1c] ss:$12 sps:$4 sm:$0xff]   ;;  %v681_v31 = vld [vmem:[%s872_s4 + $0x10] sm:$0xff]  }
   0xc   :  { %609 = vmatprep.subr.bf16.mxu1 %v658_v5  ;;  %560 = vmatpush3.bf16.msra.mxu0 %v666_v9  ;;  %v695_v32 = vld [vmem:[%s873_s3] sm:$0xff]   ;;  %v689_v36 = vld [vmem:[%s872_s4 + $0x28] sm:$0xff]   ;;  %v693_v37 = vld [vmem:[%s872_s4 + $0x30] sm:$0xff]  }
   0xd   :  { %561 = vmatprep.subr.bf16.mxu0 %v668_v11  ;;  %v692_v34 = vld [vmem:[%s871_s0 + $0x18] ss:$12 sps:$4 sm:$0xff]   ;;  %v696_v39 = vld [vmem:[%s873_s3 + $0x8] sm:$0xff]   ;;  %v513_v52 = vld [vmem:[%s874_s2] ss:$0 sm:$0xff] }
   0xe   :  { %v688_v35 = vld [vmem:[%s872_s4 + $0x20] sm:$0xff]   ;;  %v694_v38 = vld [vmem:[%s872_s4 + $0x38] sm:$0xff]  }
   0xf   :  { %610 = vmatpush3.bf16.msra.mxu1 %v658_v5  ;;  %v544_v56 = vld [vmem:[%s875_s5] ss:$0 sm:$0xff] }
  0x10   :  { %611 = vmatprep.subr.bf16.mxu1 %v661_v10  ;;  %562 = vmatpush3.bf16.msra.mxu0 %v669_v13 }
  0x11   :  { %563 = vmatprep.subr.bf16.mxu0 %v671_v14 }
  0x13   :  { %612 = vmatpush3.bf16.msra.mxu1 %v661_v10 }
  0x14   :  { %613 = vmatprep.subr.bf16.mxu1 %v664_v12  ;;  %564 = vmatpush3.bf16.msra.mxu0 %v672_v16 }
  0x15   :  { %565 = vmatprep.subr.bf16.mxu0 %v676_v18 }
  0x17   :  { %614 = vmatpush3.bf16.msra.mxu1 %v664_v12 }
  0x18   :  { %615 = vmatprep.subr.bf16.mxu1 %v667_v17  ;;  %566 = vmatpush3.bf16.msra.mxu0 %v677_v20 }
  0x19   :  { %567 = vmatprep.subr.bf16.mxu0 %v679_v21 }
  0x1b   :  { %616 = vmatpush3.bf16.msra.mxu1 %v667_v17 }
  0x1c   :  { %617 = vmatprep.subr.bf16.mxu1 %v670_v19  ;;  %568 = vmatpush3.bf16.msra.mxu0 %v680_v23 }
  0x1d   :  { %569 = vmatprep.subr.bf16.mxu0 %v682_v24 }
  0x1f   :  { %618 = vmatpush3.bf16.msra.mxu1 %v670_v19 }
  0x20   :  { %623 = vmatprep.subr.bf16.mxu1 %v674_v22  ;;  %570 = vmatpush3.bf16.msra.mxu0 %v683_v26 }
  0x22   :  { %620 = vmatmul.mubr.bf16.vlgmr.msra.gmra.mrb[0].mxu1 %v675_v25 }
  0x23   :  { %624 = vmatpush3.bf16.msra.mxu1 %v674_v22  ;;  %296 = vmatmul.mubr.bf16.vlgmr.msra.gmra.mrb[0].mxu0 %v685_v29 }
  0x24   :  { %625 = vmatprep.subr.bf16.mxu1 %v678_v28  ;;  %303 = vmatprep.mubr.bf16.mxu0 %v690_v30 }
  0x25   :  { %639 = vmatprep.mubr.bf16.mxu1 %v695_v32 }
  0x27   :  { %626 = vmatpush3.bf16.msra.mxu1 %v678_v28 }
  0x28   :  { %627 = vmatprep.subr.bf16.mxu1 %v681_v31 }
  0x2b   :  { %628 = vmatpush3.bf16.msra.mxu1 %v681_v31  ;;  %304 = vmatmul.mubr.bf16.gmra.mrb[4].mxu0 %v692_v34 }
  0x2c   :  { %629 = vmatprep.subr.bf16.mxu1 %v684_v33 }
  0x2f   :  { %630 = vmatpush3.bf16.msra.mxu1 %v684_v33 }
  0x30   :  { %631 = vmatprep.subr.bf16.mxu1 %v688_v35 }
  0x33   :  { %632 = vmatpush3.bf16.msra.mxu1 %v688_v35 }
  0x34   :  { %633 = vmatprep.subr.bf16.mxu1 %v689_v36 }
  0x37   :  { %634 = vmatpush3.bf16.msra.mxu1 %v689_v36 }
  0x38   :  { %635 = vmatprep.subr.bf16.mxu1 %v693_v37 }
  0x3b   :  { %636 = vmatpush3.bf16.msra.mxu1 %v693_v37 }
  0x3c   :  { %637 = vmatprep.subr.bf16.mxu1 %v694_v38 }
  0x3f   :  { %638 = vmatpush3.bf16.msra.mxu1 %v694_v38 }
  0x42   :  { %640 = vmatmul.mubr.bf16.vlgmr.msra.gmra.mrb[0].mxu1 %v696_v39 }
  0xf6   :  { %v571_v40 = vpop.f32.mrb[0].mxu0 }
  0xf7   :  { %v572_v41 = vpop.f32.mrb[1].mxu0 }
  0xf8   :  { %v573_v42 = vadd.f32 %v572_v41, %v571_v40  ;;  %v574_v43 = vpop.f32.mrb[2].mxu0 }
  0xf9   :  { %v575_v44 = vpop.f32.mrb[3].mxu0 }
  0xfa   :  { %v576_v45 = vadd.f32 %v575_v44, %v574_v43  ;;  %v298_v58 = vadd.f32 %v573_v42, %v513_v52 }
  0xfc   :  { %v301_v54 = vadd.f32 %v576_v45, %v513_v52 }
  0xfe   :  { %v577_v46 = vpop.f32.mrb[4].mxu0  ;;  %v649_v0 = vadd.f32 %v544_v56, %v301_v54 }
  0xff   :  { %v578_v47 = vpop.f32.mrb[5].mxu0 }
 0x100   :  { %v579_v48 = vadd.f32 %v578_v47, %v577_v46  ;;  %v580_v49 = vpop.f32.mrb[6].mxu0 }
 0x101   :  { %v581_v50 = vpop.f32.mrb[7].mxu0 }
 0x102   :  { %v582_v51 = vadd.f32 %v581_v50, %v580_v49  ;;  %v306_v55 = vadd.f32 %v579_v48, %v513_v52 }
 0x104   :  { %v309_v53 = vadd.f32 %v582_v51, %v513_v52 }
 0x106   :  { %v647_v61 = vadd.f32 %v544_v56, %v309_v53 }
 0x115   :  { %v641_v57 = vpop.f32.mrb[0].mxu1 }
 0x116   :  { %v643_v59 = vadd.f32 %v641_v57, %v306_v55  ;;  %v482_v60 = vpop.f32.mrb[1].mxu1 }
 0x117   :  { %v645_v62 = vadd.f32 %v482_v60, %v298_v58  ;;  %v642_v63 = vpop.f32.mrb[2].mxu1 }
 0x118   :  { %v644_v1 = vadd.f32 %v643_v59, %v544_v56  ;;  %v648_v2 = vadd.f32 %v647_v61, %v642_v63  ;;  %v485_v3 = vpop.f32.mrb[3].mxu1 }
 0x119   :  { %v646_v4 = vadd.f32 %v645_v62, %v544_v56  ;;  %v650_v5 = vadd.f32 %v649_v0, %v485_v3 }
 0x11a   :  { %v503_v6 = vmax.f32 %v644_v1, 0.0  ;;  %v504_v7 = vmax.f32 %v648_v2, 0.0 }
 0x11b   :  { %v501_v8 = vmax.f32 %v646_v4, 0.0  ;;  %v502_v9 = vmax.f32 %v650_v5, 0.0 }
 0x11c   :  { %507 = vst [vmem:[%s876_s6 + $0x10] sm:$0xff] %v503_v6  ;;  %508 = vst [vmem:[%s876_s6 + $0x18] sm:$0xff] %v504_v7 }
 0x11d   :  { %505 = vst [vmem:[%s876_s6] sm:$0xff] %v501_v8  ;;  %506 = vst [vmem:[%s876_s6 + $0x8] sm:$0xff] %v502_v9 }

// kernel: resnet_backbone.27
= control target key start
LH: loop header
LB: loop body
LE: loop exit
PB: predicated region body
PF: predicated region fallthrough
CT: control target
= control target key end

     0   :  { %s638_s1 = inlined_call_operand.vmem [shape: bf16[384,128], index: 1, kind: input, shape index: {}]   ;;  %s639_s0 = inlined_call_operand.vmem [shape: bf16[32,384], index: 0, kind: input, shape index: {}]   ;;  %s640_s2 = inlined_call_operand.vmem [shape: f32[1,128], index: 2, kind: input, shape index: {}]   ;;  %s641_s3 = inlined_call_operand.vmem [shape: f32[32,128], index: 3, kind: input, shape index: {}]   ;;  %s642_s4 = inlined_call_operand.vmem [shape: f32[32,128], index: 4, kind: output, shape index: {}]  }
   0x1   :  { %v464_v0 = vld [vmem:[%s638_s1 + $0x40] sm:$0xff]   ;;  %v466_v2 = vld [vmem:[%s638_s1 + $0x48] sm:$0xff]   ;;  %v469_v5 = vld [vmem:[%s638_s1 + $0x50] sm:$0xff]  }
   0x2   :  { %v465_v1 = vld [vmem:[%s638_s1] sm:$0xff]   ;;  %406 = vmatprep.subr.bf16.mxu0 %v464_v0  ;;  %v468_v4 = vld [vmem:[%s638_s1 + $0x8] sm:$0xff]   ;;  %v471_v7 = vld [vmem:[%s638_s1 + $0x10] sm:$0xff]  }
   0x3   :  { %407 = vmatpush3.bf16.msra.mxu0 %v465_v1  ;;  %v467_v3 = vld [vmem:[%s638_s1 + $0x80] sm:$0xff]   ;;  %v470_v6 = vld [vmem:[%s638_s1 + $0x88] sm:$0xff]   ;;  %v472_v8 = vld [vmem:[%s638_s1 + $0x58] sm:$0xff]  }
   0x4   :  { %408 = vmatprep.subr.bf16.mxu0 %v466_v2  ;;  %444 = vmatprep.subr.bf16.mxu1 %v467_v3  ;;  %v473_v9 = vld [vmem:[%s638_s1 + $0x90] sm:$0xff]   ;;  %v474_v10 = vld [vmem:[%s638_s1 + $0x18] sm:$0xff]   ;;  %v475_v11 = vld [vmem:[%s638_s1 + $0x60] sm:$0xff]  }
   0x5   :  { %445 = vmatpush3.bf16.msra.mxu1 %v467_v3  ;;  %v476_v12 = vld [vmem:[%s638_s1 + $0x98] sm:$0xff]   ;;  %v477_v13 = vld [vmem:[%s638_s1 + $0x20] sm:$0xff]   ;;  %v478_v15 = vld [vmem:[%s638_s1 + $0x68] sm:$0xff]  }
   0x6   :  { %446 = vmatprep.subr.bf16.mxu1 %v470_v6  ;;  %v479_v14 = vld [vmem:[%s638_s1 + $0xa0] sm:$0xff]   ;;  %v480_v16 = vld [vmem:[%s638_s1 + $0x28] sm:$0xff]   ;;  %v481_v18 = vld [vmem:[%s638_s1 + $0x70] sm:$0xff]  }
   0x7   :  { %409 = vmatpush3.bf16.msra.mxu0 %v468_v4  ;;  %v482_v17 = vld [vmem:[%s638_s1 + $0xa8] sm:$0xff]   ;;  %v483_v19 = vld [vmem:[%s638_s1 + $0x30] sm:$0xff]   ;;  %v484_v20 = vld [vmem:[%s638_s1 + $0x78] sm:$0xff]  }
   0x8   :  { %410 = vmatprep.subr.bf16.mxu0 %v469_v5  ;;  %v485_v21 = vld [vmem:[%s638_s1 + $0xb0] sm:$0xff]   ;;  %v486_v23 = vld [vmem:[%s638_s1 + $0x38] sm:$0xff]   ;;  %v487_v26 = vld [vmem:[%s639_s0] ss:$12 sps:$4 sm:$0xff]  }
   0x9   :  { %447 = vmatpush3.bf16.msra.mxu1 %v470_v6  ;;  %v489_v22 = vld [vmem:[%s639_s0 + $0x4] ss:$12 sps:$4 sm:$0xff]   ;;  %v491_v24 = vld [vmem:[%s639_s0 + $0x8] ss:$12 sps:$4 sm:$0xff]   ;;  %v490_v25 = vld [vmem:[%s638_s1 + $0xb8] sm:$0xff]  }
   0xa   :  { %448 = vmatprep.subr.bf16.mxu1 %v473_v9  ;;  %289 = vmatprep.mubr.bf16.mxu0 %v489_v22  ;;  %v493_v27 = vld [vmem:[%s639_s0 + $0x1c] ss:$12 sps:$4 sm:$0xff]   ;;  %v492_v28 = vld [vmem:[%s639_s0 + $0x20] ss:$12 sps:$4 sm:$0xff]   ;;  %v495_v29 = vld [vmem:[%s639_s0 + $0x18] ss:$12 sps:$4 sm:$0xff]  }
   0xb   :  { %411 = vmatpush3.bf16.msra.mxu0 %v471_v7  ;;  %460 = vmatprep.mubr.bf16.mxu1 %v491_v24  ;;  %v375_v32 = vld [vmem:[%s640_s2] ss:$0 sm:$0xff]  ;;  %v356_v45 = vld [vmem:[%s641_s3 + $0x8] sm:$0xff]  ;;  %v357_v58 = vld [vmem:[%s641_s3 + $0x10] sm:$0xff] }
   0xc   :  { %412 = vmatprep.subr.bf16.mxu0 %v472_v8  ;;  %v355_v40 = vld [vmem:[%s641_s3] sm:$0xff]  ;;  %v358_v61 = vld [vmem:[%s641_s3 + $0x18] sm:$0xff] }
   0xd   :  { %449 = vmatpush3.bf16.msra.mxu1 %v473_v9 }
   0xe   :  { %450 = vmatprep.subr.bf16.mxu1 %v476_v12 }
   0xf   :  { %413 = vmatpush3.bf16.msra.mxu0 %v474_v10 }
  0x10   :  { %414 = vmatprep.subr.bf16.mxu0 %v475_v11 }
  0x11   :  { %451 = vmatpush3.bf16.msra.mxu1 %v476_v12 }
  0x12   :  { %452 = vmatprep.subr.bf16.mxu1 %v479_v14 }
  0x13   :  { %415 = vmatpush3.bf16.msra.mxu0 %v477_v13 }
  0x14   :  { %416 = vmatprep.subr.bf16.mxu0 %v478_v15 }
  0x15   :  { %453 = vmatpush3.bf16.msra.mxu1 %v479_v14 }
  0x16   :  { %454 = vmatprep.subr.bf16.mxu1 %v482_v17 }
  0x17   :  { %417 = vmatpush3.bf16.msra.mxu0 %v480_v16 }
  0x18   :  { %418 = vmatprep.subr.bf16.mxu0 %v481_v18 }
  0x19   :  { %455 = vmatpush3.bf16.msra.mxu1 %v482_v17 }
  0x1a   :  { %456 = vmatprep.subr.bf16.mxu1 %v485_v21 }
  0x1b   :  { %419 = vmatpush3.bf16.msra.mxu0 %v483_v19 }
  0x1c   :  { %420 = vmatprep.subr.bf16.mxu0 %v484_v20 }
  0x1d   :  { %457 = vmatpush3.bf16.msra.mxu1 %v485_v21 }
  0x1e   :  { %458 = vmatprep.subr.bf16.mxu1 %v490_v25 }
  0x1f   :  { %421 = vmatpush3.bf16.msra.mxu0 %v486_v23 }
  0x21   :  { %459 = vmatpush3.bf16.msra.mxu1 %v490_v25 }
  0x22   :  { %290 = vmatmul.mubr.bf16.vlgmr.msra.gmra.mrb[0].mxu0 %v487_v26 }
  0x23   :  { %297 = vmatprep.mubr.bf16.mxu0 %v493_v27 }
  0x24   :  { %461 = vmatmul.mubr.bf16.vlgmr.msra.gmra.mrb[0].mxu1 %v492_v28 }
  0x2a   :  { %298 = vmatmul.mubr.bf16.gmra.mrb[4].mxu0 %v495_v29 }
  0xf5   :  { %v422_v30 = vpop.f32.mrb[0].mxu0 }
  0xf6   :  { %v423_v31 = vpop.f32.mrb[1].mxu0 }
  0xf7   :  { %v424_v33 = vadd.f32 %v423_v31, %v422_v30  ;;  %v425_v34 = vpop.f32.mrb[2].mxu0  ;;  %v462_v36 = vpop.f32.mrb[0].mxu1 }
  0xf8   :  { %v426_v35 = vpop.f32.mrb[3].mxu0  ;;  %v340_v39 = vpop.f32.mrb[1].mxu1 }
  0xf9   :  { %v427_v37 = vadd.f32 %v426_v35, %v425_v34  ;;  %v292_v38 = vadd.f32 %v424_v33, %v375_v32  ;;  %v463_v41 = vpop.f32.mrb[2].mxu1 }
  0xfa   :  { %v343_v44 = vpop.f32.mrb[3].mxu1 }
  0xfb   :  { %v341_v42 = vadd.f32 %v340_v39, %v292_v38  ;;  %v295_v43 = vadd.f32 %v427_v37, %v375_v32 }
  0xfd   :  { %v359_v46 = vadd.f32 %v355_v40, %v341_v42  ;;  %v344_v47 = vadd.f32 %v343_v44, %v295_v43  ;;  %v428_v48 = vpop.f32.mrb[4].mxu0 }
  0xfe   :  { %v429_v49 = vpop.f32.mrb[5].mxu0 }
  0xff   :  { %v363_v50 = vmax.f32 %v359_v46, 0.0  ;;  %v360_v51 = vadd.f32 %v356_v45, %v344_v47  ;;  %v430_v52 = vadd.f32 %v429_v49, %v428_v48  ;;  %v431_v53 = vpop.f32.mrb[6].mxu0 }
 0x100   :  { %v432_v54 = vpop.f32.mrb[7].mxu0 }
 0x101   :  { %367 = vst [vmem:[%s642_s4] sm:$0xff] %v363_v50  ;;  %v364_v55 = vmax.f32 %v360_v51, 0.0  ;;  %v300_v56 = vadd.f32 %v430_v52, %v375_v32  ;;  %v433_v57 = vadd.f32 %v432_v54, %v431_v53 }
 0x103   :  { %368 = vst [vmem:[%s642_s4 + $0x8] sm:$0xff] %v364_v55  ;;  %v349_v59 = vadd.f32 %v462_v36, %v300_v56  ;;  %v303_v60 = vadd.f32 %v433_v57, %v375_v32 }
 0x105   :  { %v361_v62 = vadd.f32 %v357_v58, %v349_v59  ;;  %v352_v63 = vadd.f32 %v463_v41, %v303_v60 }
 0x107   :  { %v365_v0 = vmax.f32 %v361_v62, 0.0  ;;  %v362_v1 = vadd.f32 %v358_v61, %v352_v63 }
 0x109   :  { %369 = vst [vmem:[%s642_s4 + $0x10] sm:$0xff] %v365_v0  ;;  %v366_v2 = vmax.f32 %v362_v1, 0.0 }
 0x10b   :  { %370 = vst [vmem:[%s642_s4 + $0x18] sm:$0xff] %v366_v2 }

// kernel: resnet_backbone.28
= control target key start
LH: loop header
LB: loop body
LE: loop exit
PB: predicated region body
PF: predicated region fallthrough
CT: control target
= control target key end

     0   :  { %v433_v1 = vmov 0.0   ;;  %vm434_vm0 = vmmov 0   ;;  %s545_s1 = inlined_call_operand.vmem [shape: bf16[384,128], index: 1, kind: input, shape index: {}]   ;;  %s546_s0 = inlined_call_operand.vmem [shape: bf16[16,384], index: 0, kind: input, shape index: {}]   ;;  %s547_s2 = inlined_call_operand.vmem [shape: f32[1,128], index: 2, kind: input, shape index: {}]   ;;  %s548_s3 = inlined_call_operand.vmem [shape: f32[16,128], index: 3, kind: output, shape index: {}]  }
   0x1   :  { %v405_v0 = vld [vmem:[%s545_s1 + $0x40] sm:$0xff]   ;;  %383 = vmatprep.subr.bf16.mxu1 %v433_v1  ;;  %399 = vmatprep.mubr.msk.bf16.mxu1 %vm434_vm0, %v433_v1  ;;  %v408_v4 = vld [vmem:[%s545_s1 + $0x48] sm:$0xff]   ;;  %v411_v7 = vld [vmem:[%s545_s1 + $0x50] sm:$0xff]  }
   0x2   :  { %v406_v2 = vld [vmem:[%s545_s1] sm:$0xff]   ;;  %352 = vmatprep.subr.bf16.mxu0 %v405_v0  ;;  %v409_v5 = vld [vmem:[%s545_s1 + $0x8] sm:$0xff]   ;;  %v412_v8 = vld [vmem:[%s545_s1 + $0x10] sm:$0xff]  }
   0x3   :  { %v407_v3 = vld [vmem:[%s545_s1 + $0x80] sm:$0xff]   ;;  %353 = vmatpush3.bf16.msra.mxu0 %v406_v2  ;;  %v410_v6 = vld [vmem:[%s545_s1 + $0x88] sm:$0xff]   ;;  %v413_v9 = vld [vmem:[%s545_s1 + $0x90] sm:$0xff]  }
   0x4   :  { %384 = vmatpush3.bf16.msra.mxu1 %v407_v3  ;;  %354 = vmatprep.subr.bf16.mxu0 %v408_v4  ;;  %v414_v10 = vld [vmem:[%s545_s1 + $0x58] sm:$0xff]   ;;  %v417_v13 = vld [vmem:[%s545_s1 + $0x60] sm:$0xff]   ;;  %v420_v16 = vld [vmem:[%s545_s1 + $0x68] sm:$0xff]  }
   0x5   :  { %385 = vmatprep.subr.bf16.mxu1 %v433_v1  ;;  %v415_v11 = vld [vmem:[%s545_s1 + $0x18] sm:$0xff]   ;;  %v418_v14 = vld [vmem:[%s545_s1 + $0x20] sm:$0xff]   ;;  %v421_v17 = vld [vmem:[%s545_s1 + $0x28] sm:$0xff]  }
   0x6   :  { %v416_v12 = vld [vmem:[%s545_s1 + $0x98] sm:$0xff]   ;;  %v419_v15 = vld [vmem:[%s545_s1 + $0xa0] sm:$0xff]   ;;  %v422_v18 = vld [vmem:[%s545_s1 + $0xa8] sm:$0xff]  }
   0x7   :  { %355 = vmatpush3.bf16.msra.mxu0 %v409_v5  ;;  %v423_v19 = vld [vmem:[%s545_s1 + $0x70] sm:$0xff]   ;;  %v426_v22 = vld [vmem:[%s545_s1 + $0x78] sm:$0xff]   ;;  %v428_v26 = vld [vmem:[%s546_s0] ss:$12 sps:$4 sm:$0xff]  }
   0x8   :  { %386 = vmatpush3.bf16.msra.mxu1 %v410_v6  ;;  %356 = vmatprep.subr.bf16.mxu0 %v411_v7  ;;  %v424_v20 = vld [vmem:[%s545_s1 + $0x30] sm:$0xff]   ;;  %v427_v24 = vld [vmem:[%s545_s1 + $0x38] sm:$0xff]   ;;  %v324_v30 = vld [vmem:[%s547_s2] ss:$0 sm:$0xff] }
   0x9   :  { %387 = vmatprep.subr.bf16.mxu1 %v433_v1  ;;  %v425_v21 = vld [vmem:[%s545_s1 + $0xb0] sm:$0xff]   ;;  %v431_v25 = vld [vmem:[%s545_s1 + $0xb8] sm:$0xff]  }
   0xa   :  { %v430_v23 = vld [vmem:[%s546_s0 + $0x4] ss:$12 sps:$4 sm:$0xff]   ;;  %v432_v27 = vld [vmem:[%s546_s0 + $0x8] ss:$12 sps:$4 sm:$0xff]  }
   0xb   :  { %357 = vmatpush3.bf16.msra.mxu0 %v412_v8  ;;  %266 = vmatprep.mubr.bf16.mxu0 %v430_v23 }
   0xc   :  { %388 = vmatpush3.bf16.msra.mxu1 %v413_v9  ;;  %358 = vmatprep.subr.bf16.mxu0 %v414_v10 }
   0xd   :  { %389 = vmatprep.subr.bf16.mxu1 %v433_v1 }
   0xf   :  { %359 = vmatpush3.bf16.msra.mxu0 %v415_v11 }
  0x10   :  { %390 = vmatpush3.bf16.msra.mxu1 %v416_v12  ;;  %360 = vmatprep.subr.bf16.mxu0 %v417_v13 }
  0x11   :  { %391 = vmatprep.subr.bf16.mxu1 %v433_v1 }
  0x13   :  { %361 = vmatpush3.bf16.msra.mxu0 %v418_v14 }
  0x14   :  { %392 = vmatpush3.bf16.msra.mxu1 %v419_v15  ;;  %362 = vmatprep.subr.bf16.mxu0 %v420_v16 }
  0x15   :  { %393 = vmatprep.subr.bf16.mxu1 %v433_v1 }
  0x17   :  { %363 = vmatpush3.bf16.msra.mxu0 %v421_v17 }
  0x18   :  { %394 = vmatpush3.bf16.msra.mxu1 %v422_v18  ;;  %364 = vmatprep.subr.bf16.mxu0 %v423_v19 }
  0x19   :  { %395 = vmatprep.subr.bf16.mxu1 %v433_v1 }
  0x1b   :  { %365 = vmatpush3.bf16.msra.mxu0 %v424_v20 }
  0x1c   :  { %396 = vmatpush3.bf16.msra.mxu1 %v425_v21  ;;  %366 = vmatprep.subr.bf16.mxu0 %v426_v22 }
  0x1d   :  { %397 = vmatprep.subr.bf16.mxu1 %v433_v1 }
  0x1f   :  { %367 = vmatpush3.bf16.msra.mxu0 %v427_v24 }
  0x20   :  { %398 = vmatpush3.bf16.msra.mxu1 %v431_v25 }
  0x22   :  { %267 = vmatmul.mubr.bf16.vlgmr.msra.gmra.mrb[0].mxu0 %v428_v26 }
  0x23   :  { %400 = vmatmul.mubr.bf16.vlgmr.msra.gmra.mrb[0].mxu1 %v432_v27 }
  0xf5   :  { %v368_v28 = vpop.f32.mrb[0].mxu0 }
  0xf6   :  { %v369_v29 = vpop.f32.mrb[1].mxu0  ;;  %v309_v31 = vpop.f32.mrb[0].mxu1 }
  0xf7   :  { %v370_v32 = vadd.f32 %v369_v29, %v368_v28  ;;  %v371_v33 = vpop.f32.mrb[2].mxu0  ;;  %v401_v34 = vpop.f32.mrb[1].mxu1 }
  0xf8   :  { %v372_v35 = vpop.f32.mrb[3].mxu0  ;;  %v312_v36 = vpop.f32.mrb[2].mxu1 }
  0xf9   :  { %v269_v37 = vadd.f32 %v370_v32, %v324_v30  ;;  %v373_v38 = vadd.f32 %v372_v35, %v371_v33  ;;  %v402_v39 = vpop.f32.mrb[3].mxu1 }
  0xfb   :  { %v310_v40 = vadd.f32 %v309_v31, %v269_v37  ;;  %v272_v41 = vadd.f32 %v373_v38, %v324_v30 }
  0xfd   :  { %v316_v42 = vmax.f32 %v310_v40, 0.0  ;;  %v313_v43 = vadd.f32 %v312_v36, %v272_v41 }
  0xff   :  { %318 = vst [vmem:[%s548_s3] sm:$0xff] %v316_v42  ;;  %v317_v44 = vmax.f32 %v313_v43, 0.0 }
 0x101   :  { %319 = vst [vmem:[%s548_s3 + $0x8] sm:$0xff] %v317_v44 }

// kernel: resnet_backbone.30
= control target key start
LH: loop header
LB: loop body
LE: loop exit
PB: predicated region body
PF: predicated region fallthrough
CT: control target
= control target key end

     0   :  { %v673_v33 = vmov 0.0   ;;  %vm674_vm0 = vmmov 0   ;;  %s839_s1 = inlined_call_operand.vmem [shape: bf16[640,128], index: 1, kind: input, shape index: {}]   ;;  %s840_s0 = inlined_call_operand.vmem [shape: bf16[16,640], index: 0, kind: input, shape index: {}]   ;;  %s841_s2 = inlined_call_operand.vmem [shape: f32[1,128], index: 2, kind: input, shape index: {}]   ;;  %s842_s3 = inlined_call_operand.vmem [shape: f32[16,128], index: 3, kind: output, shape index: {}]  }
   0x1   :  { %v626_v0 = vld [vmem:[%s839_s1 + $0x40] sm:$0xff]   ;;  %v630_v4 = vld [vmem:[%s839_s1 + $0x48] sm:$0xff]   ;;  %v634_v8 = vld [vmem:[%s839_s1 + $0x50] sm:$0xff]  }
   0x2   :  { %v627_v1 = vld [vmem:[%s839_s1] sm:$0xff]   ;;  %551 = vmatprep.subr.bf16.mxu0 %v626_v0  ;;  %v631_v5 = vld [vmem:[%s839_s1 + $0x8] sm:$0xff]   ;;  %v635_v9 = vld [vmem:[%s839_s1 + $0x10] sm:$0xff]  }
   0x3   :  { %v628_v2 = vld [vmem:[%s839_s1 + $0xc0] sm:$0xff]   ;;  %552 = vmatpush3.bf16.msra.mxu0 %v627_v1  ;;  %v632_v6 = vld [vmem:[%s839_s1 + $0xc8] sm:$0xff]   ;;  %v636_v10 = vld [vmem:[%s839_s1 + $0xd0] sm:$0xff]  }
   0x4   :  { %v629_v3 = vld [vmem:[%s839_s1 + $0x80] sm:$0xff]   ;;  %573 = vmatprep.subr.bf16.mxu1 %v628_v2  ;;  %553 = vmatprep.subr.bf16.mxu0 %v630_v4  ;;  %v633_v7 = vld [vmem:[%s839_s1 + $0x88] sm:$0xff]   ;;  %v637_v11 = vld [vmem:[%s839_s1 + $0x90] sm:$0xff]  }
   0x5   :  { %574 = vmatpush3.bf16.msra.mxu1 %v629_v3  ;;  %v638_v12 = vld [vmem:[%s839_s1 + $0x58] sm:$0xff]   ;;  %v642_v16 = vld [vmem:[%s839_s1 + $0x60] sm:$0xff]   ;;  %v646_v20 = vld [vmem:[%s839_s1 + $0x68] sm:$0xff]  }
   0x6   :  { %575 = vmatprep.subr.bf16.mxu1 %v632_v6  ;;  %v639_v13 = vld [vmem:[%s839_s1 + $0x18] sm:$0xff]   ;;  %v643_v17 = vld [vmem:[%s839_s1 + $0x20] sm:$0xff]   ;;  %v647_v21 = vld [vmem:[%s839_s1 + $0x28] sm:$0xff]  }
   0x7   :  { %554 = vmatpush3.bf16.msra.mxu0 %v631_v5  ;;  %v640_v14 = vld [vmem:[%s839_s1 + $0xd8] sm:$0xff]   ;;  %v644_v18 = vld [vmem:[%s839_s1 + $0xe0] sm:$0xff]   ;;  %v648_v22 = vld [vmem:[%s839_s1 + $0xe8] sm:$0xff]  }
   0x8   :  { %555 = vmatprep.subr.bf16.mxu0 %v634_v8  ;;  %v641_v15 = vld [vmem:[%s839_s1 + $0x98] sm:$0xff]   ;;  %v645_v19 = vld [vmem:[%s839_s1 + $0xa0] sm:$0xff]   ;;  %v649_v23 = vld [vmem:[%s839_s1 + $0xa8] sm:$0xff]  }
   0x9   :  { %576 = vmatpush3.bf16.msra.mxu1 %v633_v7  ;;  %v650_v24 = vld [vmem:[%s839_s1 + $0x70] sm:$0xff]   ;;  %v654_v28 = vld [vmem:[%s839_s1 + $0x78] sm:$0xff]   ;;  %v663_v36 = vld [vmem:[%s840_s0 + $0xc] ss:$20 sps:$4 sm:$0xff]  }
   0xa   :  { %577 = vmatprep.subr.bf16.mxu1 %v636_v10  ;;  %v651_v25 = vld [vmem:[%s839_s1 + $0x30] sm:$0xff]   ;;  %v655_v29 = vld [vmem:[%s839_s1 + $0x38] sm:$0xff]   ;;  %v664_v37 = vld [vmem:[%s839_s1 + $0x100] sm:$0xff]   ;;  %447 = vmatprep.mubr.bf16.mxu1 %v663_v36 }
   0xb   :  { %556 = vmatpush3.bf16.msra.mxu0 %v635_v9  ;;  %v652_v26 = vld [vmem:[%s839_s1 + $0xf0] sm:$0xff]   ;;  %v656_v30 = vld [vmem:[%s839_s1 + $0xf8] sm:$0xff]   ;;  %v665_v38 = vld [vmem:[%s839_s1 + $0x108] sm:$0xff]  }
   0xc   :  { %557 = vmatprep.subr.bf16.mxu0 %v638_v12  ;;  %v653_v27 = vld [vmem:[%s839_s1 + $0xb0] sm:$0xff]   ;;  %v659_v32 = vld [vmem:[%s840_s0 + $0x4] ss:$20 sps:$4 sm:$0xff]   ;;  %v661_v35 = vld [vmem:[%s840_s0 + $0x8] ss:$20 sps:$4 sm:$0xff]  }
   0xd   :  { %578 = vmatpush3.bf16.msra.mxu1 %v637_v11  ;;  %v657_v31 = vld [vmem:[%s840_s0] ss:$20 sps:$4 sm:$0xff]   ;;  %v660_v34 = vld [vmem:[%s839_s1 + $0xb8] sm:$0xff]   ;;  %406 = vmatprep.mubr.bf16.mxu0 %v659_v32  ;;  %v669_v42 = vld [vmem:[%s839_s1 + $0x128] sm:$0xff]  }
   0xe   :  { %579 = vmatprep.subr.bf16.mxu1 %v640_v14  ;;  %v666_v39 = vld [vmem:[%s839_s1 + $0x110] sm:$0xff]   ;;  %v667_v40 = vld [vmem:[%s839_s1 + $0x118] sm:$0xff]   ;;  %v668_v41 = vld [vmem:[%s839_s1 + $0x120] sm:$0xff]  }
   0xf   :  { %558 = vmatpush3.bf16.msra.mxu0 %v639_v13  ;;  %v670_v43 = vld [vmem:[%s839_s1 + $0x130] sm:$0xff]   ;;  %v671_v44 = vld [vmem:[%s839_s1 + $0x138] sm:$0xff]   ;;  %v505_v47 = vld [vmem:[%s841_s2] ss:$0 sm:$0xff] }
  0x10   :  { %559 = vmatprep.subr.bf16.mxu0 %v642_v16  ;;  %v672_v45 = vld [vmem:[%s840_s0 + $0x10] ss:$20 sps:$4 sm:$0xff]  }
  0x11   :  { %580 = vmatpush3.bf16.msra.mxu1 %v641_v15 }
  0x12   :  { %581 = vmatprep.subr.bf16.mxu1 %v644_v18 }
  0x13   :  { %560 = vmatpush3.bf16.msra.mxu0 %v643_v17 }
  0x14   :  { %561 = vmatprep.subr.bf16.mxu0 %v646_v20 }
  0x15   :  { %582 = vmatpush3.bf16.msra.mxu1 %v645_v19 }
  0x16   :  { %583 = vmatprep.subr.bf16.mxu1 %v648_v22 }
  0x17   :  { %562 = vmatpush3.bf16.msra.mxu0 %v647_v21 }
  0x18   :  { %563 = vmatprep.subr.bf16.mxu0 %v650_v24 }
  0x19   :  { %584 = vmatpush3.bf16.msra.mxu1 %v649_v23 }
  0x1a   :  { %585 = vmatprep.subr.bf16.mxu1 %v652_v26 }
  0x1b   :  { %564 = vmatpush3.bf16.msra.mxu0 %v651_v25 }
  0x1c   :  { %565 = vmatprep.subr.bf16.mxu0 %v654_v28 }
  0x1d   :  { %586 = vmatpush3.bf16.msra.mxu1 %v653_v27 }
  0x1e   :  { %587 = vmatprep.subr.bf16.mxu1 %v656_v30 }
  0x1f   :  { %566 = vmatpush3.bf16.msra.mxu0 %v655_v29 }
  0x20   :  { %604 = vmatprep.subr.bf16.mxu0 %v673_v33 }
  0x21   :  { %588 = vmatpush3.bf16.msra.mxu1 %v660_v34 }
  0x22   :  { %407 = vmatmul.mubr.bf16.vlgmr.msra.gmra.mrb[0].mxu0 %v657_v31 }
  0x23   :  { %620 = vmatprep.mubr.msk.bf16.mxu0 %vm674_vm0, %v673_v33  ;;  %605 = vmatpush3.bf16.msra.mxu0 %v664_v37 }
  0x24   :  { %448 = vmatmul.mubr.bf16.vlgmr.msra.gmra.mrb[0].mxu1 %v661_v35  ;;  %606 = vmatprep.subr.bf16.mxu0 %v673_v33 }
  0x27   :  { %607 = vmatpush3.bf16.msra.mxu0 %v665_v38 }
  0x28   :  { %608 = vmatprep.subr.bf16.mxu0 %v673_v33 }
  0x2b   :  { %609 = vmatpush3.bf16.msra.mxu0 %v666_v39 }
  0x2c   :  { %610 = vmatprep.subr.bf16.mxu0 %v673_v33 }
  0x2f   :  { %611 = vmatpush3.bf16.msra.mxu0 %v667_v40 }
  0x30   :  { %612 = vmatprep.subr.bf16.mxu0 %v673_v33 }
  0x33   :  { %613 = vmatpush3.bf16.msra.mxu0 %v668_v41 }
  0x34   :  { %614 = vmatprep.subr.bf16.mxu0 %v673_v33 }
  0x37   :  { %615 = vmatpush3.bf16.msra.mxu0 %v669_v42 }
  0x38   :  { %616 = vmatprep.subr.bf16.mxu0 %v673_v33 }
  0x3b   :  { %617 = vmatpush3.bf16.msra.mxu0 %v670_v43 }
  0x3c   :  { %618 = vmatprep.subr.bf16.mxu0 %v673_v33 }
  0x3f   :  { %619 = vmatpush3.bf16.msra.mxu0 %v671_v44 }
  0x42   :  { %621 = vmatmul.mubr.bf16.vlgmr.msra.gmra.mrb[4].mxu0 %v672_v45 }
  0xf5   :  { %v567_v46 = vpop.f32.mrb[0].mxu0 }
  0xf6   :  { %v568_v48 = vpop.f32.mrb[1].mxu0 }
  0xf7   :  { %v569_v49 = vadd.f32 %v568_v48, %v567_v46  ;;  %v570_v50 = vpop.f32.mrb[2].mxu0  ;;  %v589_v51 = vpop.f32.mrb[0].mxu1 }
  0xf8   :  { %v571_v52 = vpop.f32.mrb[3].mxu0  ;;  %v590_v55 = vpop.f32.mrb[1].mxu1 }
  0xf9   :  { %v409_v53 = vadd.f32 %v569_v49, %v505_v47  ;;  %v572_v54 = vadd.f32 %v571_v52, %v570_v50  ;;  %v591_v56 = vadd.f32 %v590_v55, %v589_v51  ;;  %v592_v57 = vpop.f32.mrb[2].mxu1 }
  0xfa   :  { %v593_v59 = vpop.f32.mrb[3].mxu1 }
  0xfb   :  { %v412_v58 = vadd.f32 %v572_v54, %v505_v47  ;;  %v594_v60 = vadd.f32 %v593_v59, %v592_v57  ;;  %v450_v61 = vadd.f32 %v591_v56, %v409_v53 }
  0xfd   :  { %v453_v62 = vadd.f32 %v594_v60, %v412_v58 }
 0x115   :  { %v490_v63 = vpop.f32.mrb[4].mxu0 }
 0x116   :  { %v491_v0 = vadd.f32 %v490_v63, %v450_v61  ;;  %v622_v1 = vpop.f32.mrb[5].mxu0 }
 0x117   :  { %v493_v2 = vpop.f32.mrb[6].mxu0 }
 0x118   :  { %v497_v3 = vmax.f32 %v491_v0, 0.0  ;;  %v494_v4 = vadd.f32 %v493_v2, %v453_v62  ;;  %v623_v5 = vpop.f32.mrb[7].mxu0 }
 0x11a   :  { %499 = vst [vmem:[%s842_s3] sm:$0xff] %v497_v3  ;;  %v498_v6 = vmax.f32 %v494_v4, 0.0 }
 0x11c   :  { %500 = vst [vmem:[%s842_s3 + $0x8] sm:$0xff] %v498_v6 }

// kernel: resnet_backbone.29
= control target key start
LH: loop header
LB: loop body
LE: loop exit
PB: predicated region body
PF: predicated region fallthrough
CT: control target
= control target key end

     0   :  { %v860_v0 = vmov 0.0   ;;  %vm861_vm0 = vmmov 0   ;;  %s1091_s1 = inlined_call_operand.vmem [shape: bf16[640,128], index: 1, kind: input, shape index: {}]   ;;  %s1092_s0 = inlined_call_operand.vmem [shape: bf16[16,640], index: 0, kind: input, shape index: {}]   ;;  %s1093_s4 = inlined_call_operand.vmem [shape: bf16[128,128], index: 4, kind: input, shape index: {}]   ;;  %s1094_s3 = inlined_call_operand.vmem [shape: bf16[16,128], index: 3, kind: input, shape index: {}]   ;;  %s1095_s2 = inlined_call_operand.vmem [shape: f32[1,128], index: 2, kind: input, shape index: {}]   ;;  %s1096_s5 = inlined_call_operand.vmem [shape: f32[1,128], index: 5, kind: input, shape index: {}]   ;;  %s1097_s6 = inlined_call_operand.vmem [shape: f32[16,128], index: 6, kind: output, shape index: {}]  }
   0x1   :  { %754 = vmatprep.subr.bf16.mxu0 %v860_v0  ;;  %v804_v1 = vld [vmem:[%s1091_s1 + $0x40] sm:$0xff]   ;;  %770 = vmatprep.mubr.msk.bf16.mxu0 %vm861_vm0, %v860_v0  ;;  %v807_v4 = vld [vmem:[%s1091_s1 + $0x48] sm:$0xff]   ;;  %v810_v7 = vld [vmem:[%s1091_s1 + $0x50] sm:$0xff]  }
   0x2   :  { %v805_v2 = vld [vmem:[%s1091_s1 + $0x100] sm:$0xff]   ;;  %692 = vmatprep.subr.bf16.mxu1 %v804_v1  ;;  %v808_v5 = vld [vmem:[%s1091_s1 + $0x108] sm:$0xff]   ;;  %v811_v8 = vld [vmem:[%s1091_s1 + $0x110] sm:$0xff]  }
   0x3   :  { %v806_v3 = vld [vmem:[%s1091_s1] sm:$0xff]   ;;  %755 = vmatpush3.bf16.msra.mxu0 %v805_v2  ;;  %v809_v6 = vld [vmem:[%s1091_s1 + $0x8] sm:$0xff]   ;;  %v812_v9 = vld [vmem:[%s1091_s1 + $0x10] sm:$0xff]  }
   0x4   :  { %693 = vmatpush3.bf16.msra.mxu1 %v806_v3  ;;  %756 = vmatprep.subr.bf16.mxu0 %v860_v0  ;;  %v813_v10 = vld [vmem:[%s1091_s1 + $0x58] sm:$0xff]   ;;  %v816_v13 = vld [vmem:[%s1091_s1 + $0x60] sm:$0xff]   ;;  %v819_v16 = vld [vmem:[%s1091_s1 + $0x68] sm:$0xff]  }
   0x5   :  { %694 = vmatprep.subr.bf16.mxu1 %v807_v4  ;;  %v814_v11 = vld [vmem:[%s1091_s1 + $0x118] sm:$0xff]   ;;  %v817_v14 = vld [vmem:[%s1091_s1 + $0x120] sm:$0xff]   ;;  %v820_v17 = vld [vmem:[%s1091_s1 + $0x128] sm:$0xff]  }
   0x6   :  { %v815_v12 = vld [vmem:[%s1091_s1 + $0x18] sm:$0xff]   ;;  %v818_v15 = vld [vmem:[%s1091_s1 + $0x20] sm:$0xff]   ;;  %v821_v18 = vld [vmem:[%s1091_s1 + $0x28] sm:$0xff]  }
   0x7   :  { %757 = vmatpush3.bf16.msra.mxu0 %v808_v5  ;;  %v822_v19 = vld [vmem:[%s1091_s1 + $0x70] sm:$0xff]   ;;  %v825_v22 = vld [vmem:[%s1091_s1 + $0x78] sm:$0xff]   ;;  %v831_v27 = vld [vmem:[%s1091_s1 + $0xc0] sm:$0xff]  }
   0x8   :  { %695 = vmatpush3.bf16.msra.mxu1 %v809_v6  ;;  %758 = vmatprep.subr.bf16.mxu0 %v860_v0  ;;  %v823_v20 = vld [vmem:[%s1091_s1 + $0x130] sm:$0xff]   ;;  %v830_v23 = vld [vmem:[%s1092_s0 + $0x4] ss:$20 sps:$4 sm:$0xff]   ;;  %v835_v31 = vld [vmem:[%s1091_s1 + $0xc8] sm:$0xff]  }
   0x9   :  { %696 = vmatprep.subr.bf16.mxu1 %v810_v7  ;;  %v824_v21 = vld [vmem:[%s1091_s1 + $0x30] sm:$0xff]   ;;  %v826_v24 = vld [vmem:[%s1091_s1 + $0x138] sm:$0xff]   ;;  %415 = vmatprep.mubr.bf16.mxu1 %v830_v23  ;;  %v833_v29 = vld [vmem:[%s1093_s4] sm:$0xff]  }
   0xa   :  { %v827_v25 = vld [vmem:[%s1091_s1 + $0x38] sm:$0xff]   ;;  %v828_v26 = vld [vmem:[%s1092_s0] ss:$20 sps:$4 sm:$0xff]   ;;  %v832_v28 = vld [vmem:[%s1092_s0 + $0x10] ss:$20 sps:$4 sm:$0xff]  }
   0xb   :  { %759 = vmatpush3.bf16.msra.mxu0 %v811_v8  ;;  %v834_v30 = vld [vmem:[%s1091_s1 + $0x80] sm:$0xff]   ;;  %v836_v32 = vld [vmem:[%s1093_s4 + $0x8] sm:$0xff]   ;;  %v838_v34 = vld [vmem:[%s1091_s1 + $0xd0] sm:$0xff]  }
   0xc   :  { %697 = vmatpush3.bf16.msra.mxu1 %v812_v9  ;;  %760 = vmatprep.subr.bf16.mxu0 %v860_v0  ;;  %v837_v33 = vld [vmem:[%s1091_s1 + $0x88] sm:$0xff]   ;;  %v839_v35 = vld [vmem:[%s1093_s4 + $0x10] sm:$0xff]   ;;  %v841_v37 = vld [vmem:[%s1091_s1 + $0xd8] sm:$0xff]  }
   0xd   :  { %698 = vmatprep.subr.bf16.mxu1 %v813_v10  ;;  %v840_v36 = vld [vmem:[%s1091_s1 + $0x90] sm:$0xff]   ;;  %v842_v38 = vld [vmem:[%s1093_s4 + $0x18] sm:$0xff]   ;;  %v844_v40 = vld [vmem:[%s1091_s1 + $0xe0] sm:$0xff]  }
   0xe   :  { %v843_v39 = vld [vmem:[%s1091_s1 + $0x98] sm:$0xff]   ;;  %v845_v41 = vld [vmem:[%s1093_s4 + $0x20] sm:$0xff]   ;;  %v847_v43 = vld [vmem:[%s1091_s1 + $0xe8] sm:$0xff]  }
   0xf   :  { %761 = vmatpush3.bf16.msra.mxu0 %v814_v11  ;;  %v846_v42 = vld [vmem:[%s1091_s1 + $0xa0] sm:$0xff]   ;;  %v848_v44 = vld [vmem:[%s1093_s4 + $0x28] sm:$0xff]   ;;  %v850_v47 = vld [vmem:[%s1091_s1 + $0xf0] sm:$0xff]  }
  0x10   :  { %699 = vmatpush3.bf16.msra.mxu1 %v815_v12  ;;  %762 = vmatprep.subr.bf16.mxu0 %v860_v0  ;;  %v858_v45 = vld [vmem:[%s1092_s0 + $0xc] ss:$20 sps:$4 sm:$0xff]   ;;  %v851_v48 = vld [vmem:[%s1093_s4 + $0x30] sm:$0xff]   ;;  %v853_v50 = vld [vmem:[%s1091_s1 + $0xf8] sm:$0xff]  }
  0x11   :  { %700 = vmatprep.subr.bf16.mxu1 %v816_v13  ;;  %v849_v46 = vld [vmem:[%s1091_s1 + $0xa8] sm:$0xff]   ;;  %v852_v49 = vld [vmem:[%s1091_s1 + $0xb0] sm:$0xff]   ;;  %v854_v51 = vld [vmem:[%s1093_s4 + $0x38] sm:$0xff]  }
  0x12   :  { %v855_v52 = vld [vmem:[%s1091_s1 + $0xb8] sm:$0xff]   ;;  %v859_v53 = vld [vmem:[%s1094_s3] sm:$0xff]  }
  0x13   :  { %763 = vmatpush3.bf16.msra.mxu0 %v817_v14  ;;  %v856_v54 = vld [vmem:[%s1092_s0 + $0x8] ss:$20 sps:$4 sm:$0xff]   ;;  %v636_v61 = vld [vmem:[%s1095_s2] ss:$0 sm:$0xff] }
  0x14   :  { %701 = vmatpush3.bf16.msra.mxu1 %v818_v15  ;;  %764 = vmatprep.subr.bf16.mxu0 %v860_v0  ;;  %v682_v7 = vld [vmem:[%s1096_s5] ss:$0 sm:$0xff] }
  0x15   :  { %702 = vmatprep.subr.bf16.mxu1 %v819_v16 }
  0x17   :  { %765 = vmatpush3.bf16.msra.mxu0 %v820_v17 }
  0x18   :  { %703 = vmatpush3.bf16.msra.mxu1 %v821_v18  ;;  %766 = vmatprep.subr.bf16.mxu0 %v860_v0 }
  0x19   :  { %704 = vmatprep.subr.bf16.mxu1 %v822_v19 }
  0x1b   :  { %767 = vmatpush3.bf16.msra.mxu0 %v823_v20 }
  0x1c   :  { %705 = vmatpush3.bf16.msra.mxu1 %v824_v21  ;;  %768 = vmatprep.subr.bf16.mxu0 %v860_v0 }
  0x1d   :  { %706 = vmatprep.subr.bf16.mxu1 %v825_v22 }
  0x1f   :  { %769 = vmatpush3.bf16.msra.mxu0 %v826_v24 }
  0x20   :  { %707 = vmatpush3.bf16.msra.mxu1 %v827_v25  ;;  %774 = vmatprep.subr.bf16.mxu0 %v860_v0 }
  0x21   :  { %714 = vmatprep.subr.bf16.mxu1 %v831_v27 }
  0x22   :  { %771 = vmatmul.mubr.bf16.vlgmr.msra.gmra.mrb[0].mxu0 %v832_v28 }
  0x23   :  { %416 = vmatmul.mubr.bf16.vlgmr.msra.gmra.mrb[0].mxu1 %v828_v26  ;;  %775 = vmatpush3.bf16.msra.mxu0 %v833_v29 }
  0x24   :  { %715 = vmatpush3.bf16.msra.mxu1 %v834_v30  ;;  %776 = vmatprep.subr.bf16.mxu0 %v860_v0 }
  0x25   :  { %716 = vmatprep.subr.bf16.mxu1 %v835_v31  ;;  %790 = vmatprep.mubr.msk.bf16.mxu0 %vm861_vm0, %v860_v0 }
  0x26   :  { %456 = vmatprep.mubr.bf16.mxu1 %v858_v45 }
  0x27   :  { %777 = vmatpush3.bf16.msra.mxu0 %v836_v32 }
  0x28   :  { %717 = vmatpush3.bf16.msra.mxu1 %v837_v33  ;;  %778 = vmatprep.subr.bf16.mxu0 %v860_v0 }
  0x29   :  { %718 = vmatprep.subr.bf16.mxu1 %v838_v34 }
  0x2b   :  { %779 = vmatpush3.bf16.msra.mxu0 %v839_v35 }
  0x2c   :  { %719 = vmatpush3.bf16.msra.mxu1 %v840_v36  ;;  %780 = vmatprep.subr.bf16.mxu0 %v860_v0 }
  0x2d   :  { %720 = vmatprep.subr.bf16.mxu1 %v841_v37 }
  0x2f   :  { %781 = vmatpush3.bf16.msra.mxu0 %v842_v38 }
  0x30   :  { %721 = vmatpush3.bf16.msra.mxu1 %v843_v39  ;;  %782 = vmatprep.subr.bf16.mxu0 %v860_v0 }
  0x31   :  { %722 = vmatprep.subr.bf16.mxu1 %v844_v40 }
  0x33   :  { %783 = vmatpush3.bf16.msra.mxu0 %v845_v41 }
  0x34   :  { %723 = vmatpush3.bf16.msra.mxu1 %v846_v42  ;;  %784 = vmatprep.subr.bf16.mxu0 %v860_v0 }
  0x35   :  { %724 = vmatprep.subr.bf16.mxu1 %v847_v43 }
  0x37   :  { %785 = vmatpush3.bf16.msra.mxu0 %v848_v44 }
  0x38   :  { %725 = vmatpush3.bf16.msra.mxu1 %v849_v46  ;;  %786 = vmatprep.subr.bf16.mxu0 %v860_v0 }
  0x39   :  { %726 = vmatprep.subr.bf16.mxu1 %v850_v47 }
  0x3b   :  { %787 = vmatpush3.bf16.msra.mxu0 %v851_v48 }
  0x3c   :  { %727 = vmatpush3.bf16.msra.mxu1 %v852_v49  ;;  %788 = vmatprep.subr.bf16.mxu0 %v860_v0 }
  0x3d   :  { %728 = vmatprep.subr.bf16.mxu1 %v853_v50 }
  0x3f   :  { %789 = vmatpush3.bf16.msra.mxu0 %v854_v51 }
  0x40   :  { %729 = vmatpush3.bf16.msra.mxu1 %v855_v52 }
  0x42   :  { %791 = vmatmul.mubr.bf16.vlgmr.msra.gmra.mrb[0].mxu0 %v859_v53 }
  0x43   :  { %457 = vmatmul.mubr.bf16.vlgmr.msra.gmra.mrb[4].mxu1 %v856_v54 }
  0xf6   :  { %v708_v55 = vpop.f32.mrb[0].mxu1 }
  0xf7   :  { %v709_v56 = vpop.f32.mrb[1].mxu1 }
  0xf8   :  { %v710_v57 = vadd.f32 %v709_v56, %v708_v55  ;;  %v711_v58 = vpop.f32.mrb[2].mxu1 }
  0xf9   :  { %v712_v59 = vpop.f32.mrb[3].mxu1 }
  0xfa   :  { %v713_v60 = vadd.f32 %v712_v59, %v711_v58  ;;  %v418_v3 = vadd.f32 %v710_v57, %v636_v61 }
  0xfc   :  { %v421_v9 = vadd.f32 %v713_v60, %v636_v61 }
 0x115   :  { %v619_v62 = vpop.f32.mrb[0].mxu0 }
 0x116   :  { %v730_v63 = vpop.f32.mrb[4].mxu1  ;;  %v792_v0 = vpop.f32.mrb[1].mxu0 }
 0x117   :  { %v731_v1 = vpop.f32.mrb[5].mxu1  ;;  %v622_v2 = vpop.f32.mrb[2].mxu0 }
 0x118   :  { %v732_v4 = vadd.f32 %v731_v1, %v730_v63  ;;  %v733_v5 = vpop.f32.mrb[6].mxu1  ;;  %v793_v6 = vpop.f32.mrb[3].mxu0 }
 0x119   :  { %v734_v8 = vpop.f32.mrb[7].mxu1 }
 0x11a   :  { %v459_v10 = vadd.f32 %v732_v4, %v418_v3  ;;  %v735_v11 = vadd.f32 %v734_v8, %v733_v5 }
 0x11c   :  { %v794_v12 = vadd.f32 %v682_v7, %v459_v10  ;;  %v462_v13 = vadd.f32 %v735_v11, %v421_v9 }
 0x11e   :  { %v795_v14 = vadd.f32 %v794_v12, %v619_v62  ;;  %v796_v15 = vadd.f32 %v682_v7, %v462_v13 }
 0x120   :  { %v628_v16 = vmax.f32 %v795_v14, 0.0  ;;  %v797_v17 = vadd.f32 %v796_v15, %v622_v2 }
 0x122   :  { %630 = vst [vmem:[%s1097_s6] sm:$0xff] %v628_v16  ;;  %v629_v18 = vmax.f32 %v797_v17, 0.0 }
 0x124   :  { %631 = vst [vmem:[%s1097_s6 + $0x8] sm:$0xff] %v629_v18 }

// kernel: resnet_backbone.31
= control target key start
LH: loop header
LB: loop body
LE: loop exit
PB: predicated region body
PF: predicated region fallthrough
CT: control target
= control target key end

     0   :  { %v680_v33 = vmov 0.0   ;;  %vm681_vm0 = vmmov 0   ;;  %s857_s1 = inlined_call_operand.vmem [shape: bf16[640,128], index: 1, kind: input, shape index: {}]   ;;  %s858_s0 = inlined_call_operand.vmem [shape: bf16[16,640], index: 0, kind: input, shape index: {}]   ;;  %s859_s2 = inlined_call_operand.vmem [shape: f32[1,128], index: 2, kind: input, shape index: {}]   ;;  %s860_s3 = inlined_call_operand.vmem [shape: f32[16,128], index: 3, kind: input, shape index: {}]   ;;  %s861_s4 = inlined_call_operand.vmem [shape: f32[16,128], index: 4, kind: output, shape index: {}]  }
   0x1   :  { %v633_v0 = vld [vmem:[%s857_s1 + $0x40] sm:$0xff]   ;;  %v637_v4 = vld [vmem:[%s857_s1 + $0x48] sm:$0xff]   ;;  %v641_v8 = vld [vmem:[%s857_s1 + $0x50] sm:$0xff]  }
   0x2   :  { %v634_v1 = vld [vmem:[%s857_s1] sm:$0xff]   ;;  %558 = vmatprep.subr.bf16.mxu0 %v633_v0  ;;  %v638_v5 = vld [vmem:[%s857_s1 + $0x8] sm:$0xff]   ;;  %v642_v9 = vld [vmem:[%s857_s1 + $0x10] sm:$0xff]  }
   0x3   :  { %v635_v2 = vld [vmem:[%s857_s1 + $0xc0] sm:$0xff]   ;;  %559 = vmatpush3.bf16.msra.mxu0 %v634_v1  ;;  %v639_v6 = vld [vmem:[%s857_s1 + $0xc8] sm:$0xff]   ;;  %v643_v10 = vld [vmem:[%s857_s1 + $0xd0] sm:$0xff]  }
   0x4   :  { %v636_v3 = vld [vmem:[%s857_s1 + $0x80] sm:$0xff]   ;;  %580 = vmatprep.subr.bf16.mxu1 %v635_v2  ;;  %560 = vmatprep.subr.bf16.mxu0 %v637_v4  ;;  %v640_v7 = vld [vmem:[%s857_s1 + $0x88] sm:$0xff]   ;;  %v644_v11 = vld [vmem:[%s857_s1 + $0x90] sm:$0xff]  }
   0x5   :  { %581 = vmatpush3.bf16.msra.mxu1 %v636_v3  ;;  %v645_v12 = vld [vmem:[%s857_s1 + $0x58] sm:$0xff]   ;;  %v649_v16 = vld [vmem:[%s857_s1 + $0x60] sm:$0xff]   ;;  %v653_v20 = vld [vmem:[%s857_s1 + $0x68] sm:$0xff]  }
   0x6   :  { %582 = vmatprep.subr.bf16.mxu1 %v639_v6  ;;  %v646_v13 = vld [vmem:[%s857_s1 + $0x18] sm:$0xff]   ;;  %v650_v17 = vld [vmem:[%s857_s1 + $0x20] sm:$0xff]   ;;  %v654_v21 = vld [vmem:[%s857_s1 + $0x28] sm:$0xff]  }
   0x7   :  { %561 = vmatpush3.bf16.msra.mxu0 %v638_v5  ;;  %v647_v14 = vld [vmem:[%s857_s1 + $0xd8] sm:$0xff]   ;;  %v651_v18 = vld [vmem:[%s857_s1 + $0xe0] sm:$0xff]   ;;  %v655_v22 = vld [vmem:[%s857_s1 + $0xe8] sm:$0xff]  }
   0x8   :  { %562 = vmatprep.subr.bf16.mxu0 %v641_v8  ;;  %v648_v15 = vld [vmem:[%s857_s1 + $0x98] sm:$0xff]   ;;  %v652_v19 = vld [vmem:[%s857_s1 + $0xa0] sm:$0xff]   ;;  %v656_v23 = vld [vmem:[%s857_s1 + $0xa8] sm:$0xff]  }
   0x9   :  { %583 = vmatpush3.bf16.msra.mxu1 %v640_v7  ;;  %v657_v24 = vld [vmem:[%s857_s1 + $0x70] sm:$0xff]   ;;  %v661_v28 = vld [vmem:[%s857_s1 + $0x78] sm:$0xff]   ;;  %v670_v36 = vld [vmem:[%s858_s0 + $0xc] ss:$20 sps:$4 sm:$0xff]  }
   0xa   :  { %584 = vmatprep.subr.bf16.mxu1 %v643_v10  ;;  %v658_v25 = vld [vmem:[%s857_s1 + $0x30] sm:$0xff]   ;;  %v662_v29 = vld [vmem:[%s857_s1 + $0x38] sm:$0xff]   ;;  %v671_v37 = vld [vmem:[%s857_s1 + $0x100] sm:$0xff]   ;;  %450 = vmatprep.mubr.bf16.mxu1 %v670_v36 }
   0xb   :  { %563 = vmatpush3.bf16.msra.mxu0 %v642_v9  ;;  %v659_v26 = vld [vmem:[%s857_s1 + $0xf0] sm:$0xff]   ;;  %v663_v30 = vld [vmem:[%s857_s1 + $0xf8] sm:$0xff]   ;;  %v672_v38 = vld [vmem:[%s857_s1 + $0x108] sm:$0xff]  }
   0xc   :  { %564 = vmatprep.subr.bf16.mxu0 %v645_v12  ;;  %v660_v27 = vld [vmem:[%s857_s1 + $0xb0] sm:$0xff]   ;;  %v666_v32 = vld [vmem:[%s858_s0 + $0x4] ss:$20 sps:$4 sm:$0xff]   ;;  %v668_v35 = vld [vmem:[%s858_s0 + $0x8] ss:$20 sps:$4 sm:$0xff]  }
   0xd   :  { %585 = vmatpush3.bf16.msra.mxu1 %v644_v11  ;;  %v664_v31 = vld [vmem:[%s858_s0] ss:$20 sps:$4 sm:$0xff]   ;;  %v667_v34 = vld [vmem:[%s857_s1 + $0xb8] sm:$0xff]   ;;  %409 = vmatprep.mubr.bf16.mxu0 %v666_v32  ;;  %v676_v42 = vld [vmem:[%s857_s1 + $0x128] sm:$0xff]  }
   0xe   :  { %586 = vmatprep.subr.bf16.mxu1 %v647_v14  ;;  %v673_v39 = vld [vmem:[%s857_s1 + $0x110] sm:$0xff]   ;;  %v674_v40 = vld [vmem:[%s857_s1 + $0x118] sm:$0xff]   ;;  %v675_v41 = vld [vmem:[%s857_s1 + $0x120] sm:$0xff]  }
   0xf   :  { %565 = vmatpush3.bf16.msra.mxu0 %v646_v13  ;;  %v677_v43 = vld [vmem:[%s857_s1 + $0x130] sm:$0xff]   ;;  %v678_v44 = vld [vmem:[%s857_s1 + $0x138] sm:$0xff]   ;;  %v512_v47 = vld [vmem:[%s859_s2] ss:$0 sm:$0xff] }
  0x10   :  { %566 = vmatprep.subr.bf16.mxu0 %v649_v16  ;;  %v679_v45 = vld [vmem:[%s858_s0 + $0x10] ss:$20 sps:$4 sm:$0xff]   ;;  %v501_v4 = vld [vmem:[%s860_s3 + $0x8] sm:$0xff] }
  0x11   :  { %587 = vmatpush3.bf16.msra.mxu1 %v648_v15  ;;  %v500_v0 = vld [vmem:[%s860_s3] sm:$0xff] }
  0x12   :  { %588 = vmatprep.subr.bf16.mxu1 %v651_v18 }
  0x13   :  { %567 = vmatpush3.bf16.msra.mxu0 %v650_v17 }
  0x14   :  { %568 = vmatprep.subr.bf16.mxu0 %v653_v20 }
  0x15   :  { %589 = vmatpush3.bf16.msra.mxu1 %v652_v19 }
  0x16   :  { %590 = vmatprep.subr.bf16.mxu1 %v655_v22 }
  0x17   :  { %569 = vmatpush3.bf16.msra.mxu0 %v654_v21 }
  0x18   :  { %570 = vmatprep.subr.bf16.mxu0 %v657_v24 }
  0x19   :  { %591 = vmatpush3.bf16.msra.mxu1 %v656_v23 }
  0x1a   :  { %592 = vmatprep.subr.bf16.mxu1 %v659_v26 }
  0x1b   :  { %571 = vmatpush3.bf16.msra.mxu0 %v658_v25 }
  0x1c   :  { %572 = vmatprep.subr.bf16.mxu0 %v661_v28 }
  0x1d   :  { %593 = vmatpush3.bf16.msra.mxu1 %v660_v27 }
  0x1e   :  { %594 = vmatprep.subr.bf16.mxu1 %v663_v30 }
  0x1f   :  { %573 = vmatpush3.bf16.msra.mxu0 %v662_v29 }
  0x20   :  { %611 = vmatprep.subr.bf16.mxu0 %v680_v33 }
  0x21   :  { %595 = vmatpush3.bf16.msra.mxu1 %v667_v34 }
  0x22   :  { %410 = vmatmul.mubr.bf16.vlgmr.msra.gmra.mrb[0].mxu0 %v664_v31 }
  0x23   :  { %627 = vmatprep.mubr.msk.bf16.mxu0 %vm681_vm0, %v680_v33  ;;  %612 = vmatpush3.bf16.msra.mxu0 %v671_v37 }
  0x24   :  { %451 = vmatmul.mubr.bf16.vlgmr.msra.gmra.mrb[0].mxu1 %v668_v35  ;;  %613 = vmatprep.subr.bf16.mxu0 %v680_v33 }
  0x27   :  { %614 = vmatpush3.bf16.msra.mxu0 %v672_v38 }
  0x28   :  { %615 = vmatprep.subr.bf16.mxu0 %v680_v33 }
  0x2b   :  { %616 = vmatpush3.bf16.msra.mxu0 %v673_v39 }
  0x2c   :  { %617 = vmatprep.subr.bf16.mxu0 %v680_v33 }
  0x2f   :  { %618 = vmatpush3.bf16.msra.mxu0 %v674_v40 }
  0x30   :  { %619 = vmatprep.subr.bf16.mxu0 %v680_v33 }
  0x33   :  { %620 = vmatpush3.bf16.msra.mxu0 %v675_v41 }
  0x34   :  { %621 = vmatprep.subr.bf16.mxu0 %v680_v33 }
  0x37   :  { %622 = vmatpush3.bf16.msra.mxu0 %v676_v42 }
  0x38   :  { %623 = vmatprep.subr.bf16.mxu0 %v680_v33 }
  0x3b   :  { %624 = vmatpush3.bf16.msra.mxu0 %v677_v43 }
  0x3c   :  { %625 = vmatprep.subr.bf16.mxu0 %v680_v33 }
  0x3f   :  { %626 = vmatpush3.bf16.msra.mxu0 %v678_v44 }
  0x42   :  { %628 = vmatmul.mubr.bf16.vlgmr.msra.gmra.mrb[4].mxu0 %v679_v45 }
  0xf5   :  { %v574_v46 = vpop.f32.mrb[0].mxu0 }
  0xf6   :  { %v575_v48 = vpop.f32.mrb[1].mxu0 }
  0xf7   :  { %v576_v49 = vadd.f32 %v575_v48, %v574_v46  ;;  %v577_v50 = vpop.f32.mrb[2].mxu0  ;;  %v596_v51 = vpop.f32.mrb[0].mxu1 }
  0xf8   :  { %v578_v52 = vpop.f32.mrb[3].mxu0  ;;  %v597_v55 = vpop.f32.mrb[1].mxu1 }
  0xf9   :  { %v412_v53 = vadd.f32 %v576_v49, %v512_v47  ;;  %v579_v54 = vadd.f32 %v578_v52, %v577_v50  ;;  %v598_v56 = vadd.f32 %v597_v55, %v596_v51  ;;  %v599_v57 = vpop.f32.mrb[2].mxu1 }
  0xfa   :  { %v600_v59 = vpop.f32.mrb[3].mxu1 }
  0xfb   :  { %v415_v58 = vadd.f32 %v579_v54, %v512_v47  ;;  %v601_v60 = vadd.f32 %v600_v59, %v599_v57  ;;  %v453_v61 = vadd.f32 %v598_v56, %v412_v53 }
  0xfd   :  { %v456_v62 = vadd.f32 %v601_v60, %v415_v58 }
 0x115   :  { %v493_v63 = vpop.f32.mrb[4].mxu0 }
 0x116   :  { %v494_v1 = vadd.f32 %v493_v63, %v453_v61  ;;  %v629_v2 = vpop.f32.mrb[5].mxu0 }
 0x117   :  { %v496_v3 = vpop.f32.mrb[6].mxu0 }
 0x118   :  { %v502_v5 = vadd.f32 %v500_v0, %v494_v1  ;;  %v497_v6 = vadd.f32 %v496_v3, %v456_v62  ;;  %v630_v7 = vpop.f32.mrb[7].mxu0 }
 0x11a   :  { %v504_v8 = vmax.f32 %v502_v5, 0.0  ;;  %v503_v9 = vadd.f32 %v501_v4, %v497_v6 }
 0x11c   :  { %506 = vst [vmem:[%s861_s4] sm:$0xff] %v504_v8  ;;  %v505_v10 = vmax.f32 %v503_v9, 0.0 }
 0x11e   :  { %507 = vst [vmem:[%s861_s4 + $0x8] sm:$0xff] %v505_v10 }

// kernel: resnet_backbone.34
= control target key start
LH: loop header
LB: loop body
LE: loop exit
PB: predicated region body
PF: predicated region fallthrough
CT: control target
= control target key end

     0   :  { %vm1154_vm0 = vmmov 0   ;;  %s1427_s1 = inlined_call_operand.vmem [shape: bf16[1152,128], index: 1, kind: input, shape index: {}]   ;;  %s1428_s0 = inlined_call_operand.vmem [shape: bf16[16,1152], index: 0, kind: input, shape index: {}]   ;;  %s1429_s2 = inlined_call_operand.vmem [shape: f32[1,128], index: 2, kind: input, shape index: {}]   ;;  %s1430_s3 = inlined_call_operand.vmem [shape: f32[16,128], index: 3, kind: output, shape index: {}]  }
   0x1   :  { %v1068_v0 = vld [vmem:[%s1427_s1 + $0x40] sm:$0xff]   ;;  %v1072_v4 = vld [vmem:[%s1427_s1 + $0x48] sm:$0xff]   ;;  %v1076_v8 = vld [vmem:[%s1427_s1 + $0x50] sm:$0xff]  }
   0x2   :  { %v1069_v1 = vld [vmem:[%s1427_s1] sm:$0xff]   ;;  %949 = vmatprep.subr.bf16.mxu0 %v1068_v0  ;;  %v1073_v5 = vld [vmem:[%s1427_s1 + $0x8] sm:$0xff]   ;;  %v1077_v9 = vld [vmem:[%s1427_s1 + $0x10] sm:$0xff]  }
   0x3   :  { %v1070_v2 = vld [vmem:[%s1427_s1 + $0xc0] sm:$0xff]   ;;  %950 = vmatpush3.bf16.msra.mxu0 %v1069_v1  ;;  %v1074_v6 = vld [vmem:[%s1427_s1 + $0xc8] sm:$0xff]   ;;  %v1078_v10 = vld [vmem:[%s1427_s1 + $0xd0] sm:$0xff]  }
   0x4   :  { %v1071_v3 = vld [vmem:[%s1427_s1 + $0x80] sm:$0xff]   ;;  %971 = vmatprep.subr.bf16.mxu1 %v1070_v2  ;;  %951 = vmatprep.subr.bf16.mxu0 %v1072_v4  ;;  %v1075_v7 = vld [vmem:[%s1427_s1 + $0x88] sm:$0xff]   ;;  %v1079_v11 = vld [vmem:[%s1427_s1 + $0x90] sm:$0xff]  }
   0x5   :  { %972 = vmatpush3.bf16.msra.mxu1 %v1071_v3  ;;  %v1080_v12 = vld [vmem:[%s1427_s1 + $0x58] sm:$0xff]   ;;  %v1084_v16 = vld [vmem:[%s1427_s1 + $0x60] sm:$0xff]   ;;  %v1088_v20 = vld [vmem:[%s1427_s1 + $0x68] sm:$0xff]  }
   0x6   :  { %973 = vmatprep.subr.bf16.mxu1 %v1074_v6  ;;  %v1081_v13 = vld [vmem:[%s1427_s1 + $0x18] sm:$0xff]   ;;  %v1085_v17 = vld [vmem:[%s1427_s1 + $0x20] sm:$0xff]   ;;  %v1089_v21 = vld [vmem:[%s1427_s1 + $0x28] sm:$0xff]   ;;  %v1153_v6 = vmov 0.0  }
   0x7   :  { %952 = vmatpush3.bf16.msra.mxu0 %v1073_v5  ;;  %v1082_v14 = vld [vmem:[%s1427_s1 + $0xd8] sm:$0xff]   ;;  %v1086_v18 = vld [vmem:[%s1427_s1 + $0xe0] sm:$0xff]   ;;  %v1090_v22 = vld [vmem:[%s1427_s1 + $0xe8] sm:$0xff]  }
   0x8   :  { %953 = vmatprep.subr.bf16.mxu0 %v1076_v8  ;;  %v1083_v15 = vld [vmem:[%s1427_s1 + $0x98] sm:$0xff]   ;;  %v1087_v19 = vld [vmem:[%s1427_s1 + $0xa0] sm:$0xff]   ;;  %v1091_v23 = vld [vmem:[%s1427_s1 + $0xa8] sm:$0xff]  }
   0x9   :  { %974 = vmatpush3.bf16.msra.mxu1 %v1075_v7  ;;  %v1092_v24 = vld [vmem:[%s1427_s1 + $0x70] sm:$0xff]   ;;  %v1096_v28 = vld [vmem:[%s1427_s1 + $0x78] sm:$0xff]   ;;  %v1099_v31 = vld [vmem:[%s1428_s0] ss:$36 sps:$4 sm:$0xff]  }
   0xa   :  { %975 = vmatprep.subr.bf16.mxu1 %v1078_v10  ;;  %v1093_v25 = vld [vmem:[%s1427_s1 + $0x30] sm:$0xff]   ;;  %v1097_v29 = vld [vmem:[%s1427_s1 + $0x38] sm:$0xff]   ;;  %v1101_v32 = vld [vmem:[%s1428_s0 + $0x4] ss:$36 sps:$4 sm:$0xff]  }
   0xb   :  { %954 = vmatpush3.bf16.msra.mxu0 %v1077_v9  ;;  %v1094_v26 = vld [vmem:[%s1427_s1 + $0xf0] sm:$0xff]   ;;  %v1098_v30 = vld [vmem:[%s1427_s1 + $0xf8] sm:$0xff]   ;;  %686 = vmatprep.mubr.bf16.mxu0 %v1101_v32  ;;  %v1103_v34 = vld [vmem:[%s1427_s1 + $0x140] sm:$0xff]  }
   0xc   :  { %955 = vmatprep.subr.bf16.mxu0 %v1080_v12  ;;  %v1095_v27 = vld [vmem:[%s1427_s1 + $0xb0] sm:$0xff]   ;;  %v1102_v33 = vld [vmem:[%s1427_s1 + $0xb8] sm:$0xff]   ;;  %v1104_v35 = vld [vmem:[%s1428_s0 + $0x8] ss:$36 sps:$4 sm:$0xff]  }
   0xd   :  { %976 = vmatpush3.bf16.msra.mxu1 %v1079_v11  ;;  %v1106_v36 = vld [vmem:[%s1428_s0 + $0xc] ss:$36 sps:$4 sm:$0xff]   ;;  %v1107_v37 = vld [vmem:[%s1427_s1 + $0x100] sm:$0xff]   ;;  %v1118_v48 = vld [vmem:[%s1427_s1 + $0x158] sm:$0xff]  }
   0xe   :  { %977 = vmatprep.subr.bf16.mxu1 %v1082_v14  ;;  %727 = vmatprep.mubr.bf16.mxu1 %v1106_v36  ;;  %v1108_v38 = vld [vmem:[%s1427_s1 + $0x1c0] sm:$0xff]   ;;  %v1110_v40 = vld [vmem:[%s1427_s1 + $0x148] sm:$0xff]   ;;  %v1114_v44 = vld [vmem:[%s1427_s1 + $0x150] sm:$0xff]  }
   0xf   :  { %956 = vmatpush3.bf16.msra.mxu0 %v1081_v13  ;;  %v1109_v39 = vld [vmem:[%s1427_s1 + $0x180] sm:$0xff]   ;;  %v1111_v41 = vld [vmem:[%s1427_s1 + $0x108] sm:$0xff]   ;;  %v1115_v45 = vld [vmem:[%s1427_s1 + $0x110] sm:$0xff]  }
  0x10   :  { %957 = vmatprep.subr.bf16.mxu0 %v1084_v16  ;;  %v1112_v42 = vld [vmem:[%s1427_s1 + $0x1c8] sm:$0xff]   ;;  %v1116_v46 = vld [vmem:[%s1427_s1 + $0x1d0] sm:$0xff]   ;;  %v1119_v49 = vld [vmem:[%s1427_s1 + $0x118] sm:$0xff]  }
  0x11   :  { %978 = vmatpush3.bf16.msra.mxu1 %v1083_v15  ;;  %v1113_v43 = vld [vmem:[%s1427_s1 + $0x188] sm:$0xff]   ;;  %v1117_v47 = vld [vmem:[%s1427_s1 + $0x190] sm:$0xff]   ;;  %v1120_v50 = vld [vmem:[%s1427_s1 + $0x1d8] sm:$0xff]  }
  0x12   :  { %979 = vmatprep.subr.bf16.mxu1 %v1086_v18  ;;  %v1121_v51 = vld [vmem:[%s1427_s1 + $0x198] sm:$0xff]   ;;  %v1122_v52 = vld [vmem:[%s1427_s1 + $0x160] sm:$0xff]   ;;  %v1126_v56 = vld [vmem:[%s1427_s1 + $0x168] sm:$0xff]  }
  0x13   :  { %958 = vmatpush3.bf16.msra.mxu0 %v1085_v17  ;;  %v1123_v53 = vld [vmem:[%s1427_s1 + $0x120] sm:$0xff]   ;;  %v1127_v57 = vld [vmem:[%s1427_s1 + $0x128] sm:$0xff]   ;;  %v1130_v60 = vld [vmem:[%s1427_s1 + $0x170] sm:$0xff]  }
  0x14   :  { %959 = vmatprep.subr.bf16.mxu0 %v1088_v20  ;;  %v1124_v54 = vld [vmem:[%s1427_s1 + $0x1e0] sm:$0xff]   ;;  %v1128_v58 = vld [vmem:[%s1427_s1 + $0x1e8] sm:$0xff]   ;;  %v1131_v61 = vld [vmem:[%s1427_s1 + $0x130] sm:$0xff]  }
  0x15   :  { %980 = vmatpush3.bf16.msra.mxu1 %v1087_v19  ;;  %v1125_v55 = vld [vmem:[%s1427_s1 + $0x1a0] sm:$0xff]   ;;  %v1129_v59 = vld [vmem:[%s1427_s1 + $0x1a8] sm:$0xff]   ;;  %v1132_v62 = vld [vmem:[%s1427_s1 + $0x1f0] sm:$0xff]  }
  0x16   :  { %981 = vmatprep.subr.bf16.mxu1 %v1090_v22  ;;  %v1133_v63 = vld [vmem:[%s1427_s1 + $0x1b0] sm:$0xff]   ;;  %v1134_v0 = vld [vmem:[%s1427_s1 + $0x178] sm:$0xff]   ;;  %v1144_v9 = vld [vmem:[%s1427_s1 + $0x200] sm:$0xff]  }
  0x17   :  { %960 = vmatpush3.bf16.msra.mxu0 %v1089_v21  ;;  %v1135_v1 = vld [vmem:[%s1427_s1 + $0x138] sm:$0xff]   ;;  %v1137_v3 = vld [vmem:[%s1428_s0 + $0x10] ss:$36 sps:$4 sm:$0xff]   ;;  %v1145_v10 = vld [vmem:[%s1427_s1 + $0x208] sm:$0xff]  }
  0x18   :  { %961 = vmatprep.subr.bf16.mxu0 %v1092_v24  ;;  %v1136_v2 = vld [vmem:[%s1427_s1 + $0x1f8] sm:$0xff]   ;;  %v1146_v11 = vld [vmem:[%s1427_s1 + $0x210] sm:$0xff]   ;;  %v1148_v13 = vld [vmem:[%s1427_s1 + $0x220] sm:$0xff]  }
  0x19   :  { %982 = vmatpush3.bf16.msra.mxu1 %v1091_v23  ;;  %v1139_v4 = vld [vmem:[%s1428_s0 + $0x14] ss:$36 sps:$4 sm:$0xff]   ;;  %v1143_v8 = vld [vmem:[%s1428_s0 + $0x1c] ss:$36 sps:$4 sm:$0xff]   ;;  %v1149_v14 = vld [vmem:[%s1427_s1 + $0x228] sm:$0xff]  }
  0x1a   :  { %983 = vmatprep.subr.bf16.mxu1 %v1094_v26  ;;  %v1140_v5 = vld [vmem:[%s1427_s1 + $0x1b8] sm:$0xff]   ;;  %v1150_v15 = vld [vmem:[%s1427_s1 + $0x230] sm:$0xff]   ;;  %v1152_v17 = vld [vmem:[%s1428_s0 + $0x20] ss:$36 sps:$4 sm:$0xff]  }
  0x1b   :  { %962 = vmatpush3.bf16.msra.mxu0 %v1093_v25  ;;  %v1141_v7 = vld [vmem:[%s1428_s0 + $0x18] ss:$36 sps:$4 sm:$0xff]   ;;  %v867_v19 = vld [vmem:[%s1429_s2] ss:$0 sm:$0xff] }
  0x1c   :  { %963 = vmatprep.subr.bf16.mxu0 %v1096_v28  ;;  %v1147_v12 = vld [vmem:[%s1427_s1 + $0x218] sm:$0xff]  }
  0x1d   :  { %984 = vmatpush3.bf16.msra.mxu1 %v1095_v27  ;;  %v1151_v16 = vld [vmem:[%s1427_s1 + $0x238] sm:$0xff]  }
  0x1e   :  { %985 = vmatprep.subr.bf16.mxu1 %v1098_v30 }
  0x1f   :  { %964 = vmatpush3.bf16.msra.mxu0 %v1097_v29 }
  0x20   :  { %993 = vmatprep.subr.bf16.mxu0 %v1103_v34 }
  0x21   :  { %986 = vmatpush3.bf16.msra.mxu1 %v1102_v33 }
  0x22   :  { %687 = vmatmul.mubr.bf16.vlgmr.msra.gmra.mrb[0].mxu0 %v1099_v31  ;;  %1015 = vmatprep.subr.bf16.mxu1 %v1108_v38 }
  0x23   :  { %994 = vmatpush3.bf16.msra.mxu0 %v1107_v37  ;;  %768 = vmatprep.mubr.bf16.mxu0 %v1139_v4 }
  0x24   :  { %728 = vmatmul.mubr.bf16.vlgmr.msra.gmra.mrb[0].mxu1 %v1104_v35  ;;  %995 = vmatprep.subr.bf16.mxu0 %v1110_v40 }
  0x25   :  { %1016 = vmatpush3.bf16.msra.mxu1 %v1109_v39  ;;  %809 = vmatprep.mubr.bf16.mxu1 %v1143_v8 }
  0x26   :  { %1017 = vmatprep.subr.bf16.mxu1 %v1112_v42 }
  0x27   :  { %996 = vmatpush3.bf16.msra.mxu0 %v1111_v41 }
  0x28   :  { %997 = vmatprep.subr.bf16.mxu0 %v1114_v44 }
  0x29   :  { %1018 = vmatpush3.bf16.msra.mxu1 %v1113_v43 }
  0x2a   :  { %1019 = vmatprep.subr.bf16.mxu1 %v1116_v46 }
  0x2b   :  { %998 = vmatpush3.bf16.msra.mxu0 %v1115_v45 }
  0x2c   :  { %999 = vmatprep.subr.bf16.mxu0 %v1118_v48 }
  0x2d   :  { %1020 = vmatpush3.bf16.msra.mxu1 %v1117_v47 }
  0x2e   :  { %1021 = vmatprep.subr.bf16.mxu1 %v1120_v50 }
  0x2f   :  { %1000 = vmatpush3.bf16.msra.mxu0 %v1119_v49 }
  0x30   :  { %1001 = vmatprep.subr.bf16.mxu0 %v1122_v52 }
  0x31   :  { %1022 = vmatpush3.bf16.msra.mxu1 %v1121_v51 }
  0x32   :  { %1023 = vmatprep.subr.bf16.mxu1 %v1124_v54 }
  0x33   :  { %1002 = vmatpush3.bf16.msra.mxu0 %v1123_v53 }
  0x34   :  { %1003 = vmatprep.subr.bf16.mxu0 %v1126_v56 }
  0x35   :  { %1024 = vmatpush3.bf16.msra.mxu1 %v1125_v55 }
  0x36   :  { %1025 = vmatprep.subr.bf16.mxu1 %v1128_v58 }
  0x37   :  { %1004 = vmatpush3.bf16.msra.mxu0 %v1127_v57 }
  0x38   :  { %1005 = vmatprep.subr.bf16.mxu0 %v1130_v60 }
  0x39   :  { %1026 = vmatpush3.bf16.msra.mxu1 %v1129_v59 }
  0x3a   :  { %1027 = vmatprep.subr.bf16.mxu1 %v1132_v62 }
  0x3b   :  { %1006 = vmatpush3.bf16.msra.mxu0 %v1131_v61 }
  0x3c   :  { %1007 = vmatprep.subr.bf16.mxu0 %v1134_v0 }
  0x3d   :  { %1028 = vmatpush3.bf16.msra.mxu1 %v1133_v63 }
  0x3e   :  { %1029 = vmatprep.subr.bf16.mxu1 %v1136_v2 }
  0x3f   :  { %1008 = vmatpush3.bf16.msra.mxu0 %v1135_v1 }
  0x40   :  { %1046 = vmatprep.subr.bf16.mxu0 %v1153_v6 }
  0x41   :  { %1030 = vmatpush3.bf16.msra.mxu1 %v1140_v5 }
  0x42   :  { %769 = vmatmul.mubr.bf16.vlgmr.msra.gmra.mrb[4].mxu0 %v1137_v3 }
  0x43   :  { %1062 = vmatprep.mubr.msk.bf16.mxu0 %vm1154_vm0, %v1153_v6  ;;  %1047 = vmatpush3.bf16.msra.mxu0 %v1144_v9 }
  0x44   :  { %810 = vmatmul.mubr.bf16.vlgmr.msra.gmra.mrb[4].mxu1 %v1141_v7  ;;  %1048 = vmatprep.subr.bf16.mxu0 %v1153_v6 }
  0x47   :  { %1049 = vmatpush3.bf16.msra.mxu0 %v1145_v10 }
  0x48   :  { %1050 = vmatprep.subr.bf16.mxu0 %v1153_v6 }
  0x4b   :  { %1051 = vmatpush3.bf16.msra.mxu0 %v1146_v11 }
  0x4c   :  { %1052 = vmatprep.subr.bf16.mxu0 %v1153_v6 }
  0x4f   :  { %1053 = vmatpush3.bf16.msra.mxu0 %v1147_v12 }
  0x50   :  { %1054 = vmatprep.subr.bf16.mxu0 %v1153_v6 }
  0x53   :  { %1055 = vmatpush3.bf16.msra.mxu0 %v1148_v13 }
  0x54   :  { %1056 = vmatprep.subr.bf16.mxu0 %v1153_v6 }
  0x57   :  { %1057 = vmatpush3.bf16.msra.mxu0 %v1149_v14 }
  0x58   :  { %1058 = vmatprep.subr.bf16.mxu0 %v1153_v6 }
  0x5b   :  { %1059 = vmatpush3.bf16.msra.mxu0 %v1150_v15 }
  0x5c   :  { %1060 = vmatprep.subr.bf16.mxu0 %v1153_v6 }
  0x5f   :  { %1061 = vmatpush3.bf16.msra.mxu0 %v1151_v16 }
  0x62   :  { %1063 = vmatmul.mubr.bf16.vlgmr.msra.gmra.mrb[8].mxu0 %v1152_v17 }
  0xf5   :  { %v965_v18 = vpop.f32.mrb[0].mxu0 }
  0xf6   :  { %v966_v20 = vpop.f32.mrb[1].mxu0 }
  0xf7   :  { %v967_v21 = vadd.f32 %v966_v20, %v965_v18  ;;  %v968_v22 = vpop.f32.mrb[2].mxu0  ;;  %v987_v23 = vpop.f32.mrb[0].mxu1 }
  0xf8   :  { %v969_v24 = vpop.f32.mrb[3].mxu0  ;;  %v988_v27 = vpop.f32.mrb[1].mxu1 }
  0xf9   :  { %v689_v25 = vadd.f32 %v967_v21, %v867_v19  ;;  %v970_v26 = vadd.f32 %v969_v24, %v968_v22  ;;  %v989_v28 = vadd.f32 %v988_v27, %v987_v23  ;;  %v990_v29 = vpop.f32.mrb[2].mxu1 }
  0xfa   :  { %v991_v31 = vpop.f32.mrb[3].mxu1 }
  0xfb   :  { %v692_v30 = vadd.f32 %v970_v26, %v867_v19  ;;  %v730_v32 = vadd.f32 %v989_v28, %v689_v25  ;;  %v992_v33 = vadd.f32 %v991_v31, %v990_v29 }
  0xfd   :  { %v733_v34 = vadd.f32 %v992_v33, %v692_v30 }
 0x115   :  { %v1009_v35 = vpop.f32.mrb[4].mxu0 }
 0x116   :  { %v1010_v36 = vpop.f32.mrb[5].mxu0 }
 0x117   :  { %v1011_v37 = vadd.f32 %v1010_v36, %v1009_v35  ;;  %v1012_v38 = vpop.f32.mrb[6].mxu0  ;;  %v1031_v39 = vpop.f32.mrb[4].mxu1 }
 0x118   :  { %v1013_v40 = vpop.f32.mrb[7].mxu0  ;;  %v1032_v43 = vpop.f32.mrb[5].mxu1 }
 0x119   :  { %v771_v41 = vadd.f32 %v1011_v37, %v730_v32  ;;  %v1014_v42 = vadd.f32 %v1013_v40, %v1012_v38  ;;  %v1033_v44 = vadd.f32 %v1032_v43, %v1031_v39  ;;  %v1034_v45 = vpop.f32.mrb[6].mxu1 }
 0x11a   :  { %v1035_v47 = vpop.f32.mrb[7].mxu1 }
 0x11b   :  { %v774_v46 = vadd.f32 %v1014_v42, %v733_v34  ;;  %v1036_v48 = vadd.f32 %v1035_v47, %v1034_v45  ;;  %v812_v49 = vadd.f32 %v1033_v44, %v771_v41 }
 0x11d   :  { %v815_v50 = vadd.f32 %v1036_v48, %v774_v46 }
 0x135   :  { %v852_v51 = vpop.f32.mrb[8].mxu0 }
 0x136   :  { %v853_v52 = vadd.f32 %v852_v51, %v812_v49  ;;  %v1064_v53 = vpop.f32.mrb[9].mxu0 }
 0x137   :  { %v855_v54 = vpop.f32.mrb[10].mxu0 }
 0x138   :  { %v859_v55 = vmax.f32 %v853_v52, 0.0  ;;  %v856_v56 = vadd.f32 %v855_v54, %v815_v50  ;;  %v1065_v57 = vpop.f32.mrb[11].mxu0 }
 0x13a   :  { %861 = vst [vmem:[%s1430_s3] sm:$0xff] %v859_v55  ;;  %v860_v58 = vmax.f32 %v856_v56, 0.0 }
 0x13c   :  { %862 = vst [vmem:[%s1430_s3 + $0x8] sm:$0xff] %v860_v58 }

// kernel: resnet_backbone.33
= control target key start
LH: loop header
LB: loop body
LE: loop exit
PB: predicated region body
PF: predicated region fallthrough
CT: control target
= control target key end

     0   :  { %v1340_v35 = vmov 0.0   ;;  %vm1341_vm0 = vmmov 0   ;;  %s1679_s1 = inlined_call_operand.vmem [shape: bf16[1152,128], index: 1, kind: input, shape index: {}]   ;;  %s1680_s0 = inlined_call_operand.vmem [shape: bf16[16,1152], index: 0, kind: input, shape index: {}]   ;;  %s1681_s4 = inlined_call_operand.vmem [shape: bf16[128,128], index: 4, kind: input, shape index: {}]   ;;  %s1682_s3 = inlined_call_operand.vmem [shape: bf16[16,128], index: 3, kind: input, shape index: {}]   ;;  %s1683_s2 = inlined_call_operand.vmem [shape: f32[1,128], index: 2, kind: input, shape index: {}]   ;;  %s1684_s5 = inlined_call_operand.vmem [shape: f32[1,128], index: 5, kind: input, shape index: {}]   ;;  %s1685_s6 = inlined_call_operand.vmem [shape: f32[16,128], index: 6, kind: output, shape index: {}]  }
   0x1   :  { %v1246_v0 = vld [vmem:[%s1679_s1 + $0x40] sm:$0xff]   ;;  %v1250_v4 = vld [vmem:[%s1679_s1 + $0x48] sm:$0xff]   ;;  %v1254_v8 = vld [vmem:[%s1679_s1 + $0x50] sm:$0xff]  }
   0x2   :  { %v1247_v1 = vld [vmem:[%s1679_s1 + $0x140] sm:$0xff]   ;;  %1090 = vmatprep.subr.bf16.mxu1 %v1246_v0  ;;  %v1251_v5 = vld [vmem:[%s1679_s1 + $0x148] sm:$0xff]   ;;  %v1255_v9 = vld [vmem:[%s1679_s1 + $0x150] sm:$0xff]  }
   0x3   :  { %v1248_v2 = vld [vmem:[%s1679_s1] sm:$0xff]   ;;  %1134 = vmatprep.subr.bf16.mxu0 %v1247_v1  ;;  %v1252_v6 = vld [vmem:[%s1679_s1 + $0x8] sm:$0xff]   ;;  %v1256_v10 = vld [vmem:[%s1679_s1 + $0x10] sm:$0xff]  }
   0x4   :  { %v1249_v3 = vld [vmem:[%s1679_s1 + $0x100] sm:$0xff]   ;;  %1091 = vmatpush3.bf16.msra.mxu1 %v1248_v2  ;;  %v1253_v7 = vld [vmem:[%s1679_s1 + $0x108] sm:$0xff]   ;;  %v1257_v11 = vld [vmem:[%s1679_s1 + $0x110] sm:$0xff]  }
   0x5   :  { %1135 = vmatpush3.bf16.msra.mxu0 %v1249_v3  ;;  %1092 = vmatprep.subr.bf16.mxu1 %v1250_v4  ;;  %v1258_v12 = vld [vmem:[%s1679_s1 + $0x58] sm:$0xff]   ;;  %v1262_v16 = vld [vmem:[%s1679_s1 + $0x60] sm:$0xff]   ;;  %v1266_v20 = vld [vmem:[%s1679_s1 + $0x68] sm:$0xff]  }
   0x6   :  { %1136 = vmatprep.subr.bf16.mxu0 %v1251_v5  ;;  %v1259_v13 = vld [vmem:[%s1679_s1 + $0x158] sm:$0xff]   ;;  %v1263_v17 = vld [vmem:[%s1679_s1 + $0x160] sm:$0xff]   ;;  %v1267_v21 = vld [vmem:[%s1679_s1 + $0x168] sm:$0xff]  }
   0x7   :  { %v1260_v14 = vld [vmem:[%s1679_s1 + $0x18] sm:$0xff]   ;;  %v1264_v18 = vld [vmem:[%s1679_s1 + $0x20] sm:$0xff]   ;;  %v1268_v22 = vld [vmem:[%s1679_s1 + $0x28] sm:$0xff]  }
   0x8   :  { %1093 = vmatpush3.bf16.msra.mxu1 %v1252_v6  ;;  %v1261_v15 = vld [vmem:[%s1679_s1 + $0x118] sm:$0xff]   ;;  %v1265_v19 = vld [vmem:[%s1679_s1 + $0x120] sm:$0xff]   ;;  %v1269_v23 = vld [vmem:[%s1679_s1 + $0x128] sm:$0xff]  }
   0x9   :  { %1137 = vmatpush3.bf16.msra.mxu0 %v1253_v7  ;;  %1094 = vmatprep.subr.bf16.mxu1 %v1254_v8  ;;  %v1270_v24 = vld [vmem:[%s1679_s1 + $0x70] sm:$0xff]   ;;  %v1274_v28 = vld [vmem:[%s1679_s1 + $0x78] sm:$0xff]   ;;  %v1278_v32 = vld [vmem:[%s1680_s0] ss:$36 sps:$4 sm:$0xff]  }
   0xa   :  { %1138 = vmatprep.subr.bf16.mxu0 %v1255_v9  ;;  %v1271_v25 = vld [vmem:[%s1679_s1 + $0x170] sm:$0xff]   ;;  %v1275_v29 = vld [vmem:[%s1679_s1 + $0x178] sm:$0xff]   ;;  %v1280_v33 = vld [vmem:[%s1680_s0 + $0x4] ss:$36 sps:$4 sm:$0xff]  }
   0xb   :  { %v1272_v26 = vld [vmem:[%s1679_s1 + $0x30] sm:$0xff]   ;;  %v1276_v30 = vld [vmem:[%s1679_s1 + $0x38] sm:$0xff]   ;;  %v1281_v34 = vld [vmem:[%s1679_s1 + $0xc0] sm:$0xff]   ;;  %695 = vmatprep.mubr.bf16.mxu1 %v1280_v33 }
   0xc   :  { %1095 = vmatpush3.bf16.msra.mxu1 %v1256_v10  ;;  %v1273_v27 = vld [vmem:[%s1679_s1 + $0x130] sm:$0xff]   ;;  %v1277_v31 = vld [vmem:[%s1679_s1 + $0x138] sm:$0xff]   ;;  %v1285_v38 = vld [vmem:[%s1679_s1 + $0x80] sm:$0xff]  }
   0xd   :  { %1139 = vmatpush3.bf16.msra.mxu0 %v1257_v11  ;;  %1096 = vmatprep.subr.bf16.mxu1 %v1258_v12  ;;  %v1282_v36 = vld [vmem:[%s1680_s0 + $0x10] ss:$36 sps:$4 sm:$0xff]   ;;  %v1286_v39 = vld [vmem:[%s1679_s1 + $0x200] sm:$0xff]   ;;  %v1287_v40 = vld [vmem:[%s1679_s1 + $0xc8] sm:$0xff]  }
   0xe   :  { %1140 = vmatprep.subr.bf16.mxu0 %v1259_v13  ;;  %v1284_v37 = vld [vmem:[%s1680_s0 + $0x14] ss:$36 sps:$4 sm:$0xff]   ;;  %v1288_v41 = vld [vmem:[%s1679_s1 + $0x88] sm:$0xff]   ;;  %v1296_v49 = vld [vmem:[%s1679_s1 + $0xe0] sm:$0xff]  }
   0xf   :  { %777 = vmatprep.mubr.bf16.mxu0 %v1284_v37  ;;  %v1289_v42 = vld [vmem:[%s1679_s1 + $0x208] sm:$0xff]   ;;  %v1290_v43 = vld [vmem:[%s1679_s1 + $0xd0] sm:$0xff]   ;;  %v1293_v46 = vld [vmem:[%s1679_s1 + $0xd8] sm:$0xff]  }
  0x10   :  { %1097 = vmatpush3.bf16.msra.mxu1 %v1260_v14  ;;  %v1291_v44 = vld [vmem:[%s1679_s1 + $0x90] sm:$0xff]   ;;  %v1294_v47 = vld [vmem:[%s1679_s1 + $0x98] sm:$0xff]   ;;  %v1297_v50 = vld [vmem:[%s1679_s1 + $0xa0] sm:$0xff]  }
  0x11   :  { %1141 = vmatpush3.bf16.msra.mxu0 %v1261_v15  ;;  %1098 = vmatprep.subr.bf16.mxu1 %v1262_v16  ;;  %v1292_v45 = vld [vmem:[%s1679_s1 + $0x210] sm:$0xff]   ;;  %v1295_v48 = vld [vmem:[%s1679_s1 + $0x218] sm:$0xff]   ;;  %v1298_v51 = vld [vmem:[%s1679_s1 + $0x220] sm:$0xff]  }
  0x12   :  { %1142 = vmatprep.subr.bf16.mxu0 %v1263_v17  ;;  %v1299_v52 = vld [vmem:[%s1679_s1 + $0xe8] sm:$0xff]   ;;  %v1302_v55 = vld [vmem:[%s1679_s1 + $0xf0] sm:$0xff]   ;;  %v1305_v58 = vld [vmem:[%s1679_s1 + $0xf8] sm:$0xff]  }
  0x13   :  { %v1300_v53 = vld [vmem:[%s1679_s1 + $0xa8] sm:$0xff]   ;;  %v1303_v56 = vld [vmem:[%s1679_s1 + $0xb0] sm:$0xff]   ;;  %v1306_v60 = vld [vmem:[%s1679_s1 + $0xb8] sm:$0xff]  }
  0x14   :  { %1099 = vmatpush3.bf16.msra.mxu1 %v1264_v18  ;;  %v1301_v54 = vld [vmem:[%s1679_s1 + $0x228] sm:$0xff]   ;;  %v1304_v57 = vld [vmem:[%s1679_s1 + $0x230] sm:$0xff]   ;;  %v1307_v61 = vld [vmem:[%s1679_s1 + $0x238] sm:$0xff]  }
  0x15   :  { %1143 = vmatpush3.bf16.msra.mxu0 %v1265_v19  ;;  %1100 = vmatprep.subr.bf16.mxu1 %v1266_v20  ;;  %v1310_v59 = vld [vmem:[%s1680_s0 + $0xc] ss:$36 sps:$4 sm:$0xff]   ;;  %v1311_v63 = vld [vmem:[%s1679_s1 + $0x1c0] sm:$0xff]   ;;  %v1321_v9 = vld [vmem:[%s1679_s1 + $0x1d8] sm:$0xff]  }
  0x16   :  { %1144 = vmatprep.subr.bf16.mxu0 %v1267_v21  ;;  %v1308_v62 = vld [vmem:[%s1680_s0 + $0x8] ss:$36 sps:$4 sm:$0xff]   ;;  %v1312_v0 = vld [vmem:[%s1679_s1 + $0x180] sm:$0xff]   ;;  %v1318_v6 = vld [vmem:[%s1679_s1 + $0x1d0] sm:$0xff]  }
  0x17   :  { %v1313_v1 = vld [vmem:[%s1680_s0 + $0x20] ss:$36 sps:$4 sm:$0xff]   ;;  %v1315_v3 = vld [vmem:[%s1679_s1 + $0x1c8] sm:$0xff]   ;;  %v1319_v7 = vld [vmem:[%s1679_s1 + $0x190] sm:$0xff]  }
  0x18   :  { %1101 = vmatpush3.bf16.msra.mxu1 %v1268_v22  ;;  %v1314_v2 = vld [vmem:[%s1681_s4] sm:$0xff]   ;;  %v1316_v4 = vld [vmem:[%s1679_s1 + $0x188] sm:$0xff]   ;;  %v1320_v8 = vld [vmem:[%s1681_s4 + $0x10] sm:$0xff]  }
  0x19   :  { %1145 = vmatpush3.bf16.msra.mxu0 %v1269_v23  ;;  %1102 = vmatprep.subr.bf16.mxu1 %v1270_v24  ;;  %v1317_v5 = vld [vmem:[%s1681_s4 + $0x8] sm:$0xff]   ;;  %v1322_v10 = vld [vmem:[%s1679_s1 + $0x198] sm:$0xff]   ;;  %v1324_v12 = vld [vmem:[%s1679_s1 + $0x1e0] sm:$0xff]  }
  0x1a   :  { %1146 = vmatprep.subr.bf16.mxu0 %v1271_v25  ;;  %v1323_v11 = vld [vmem:[%s1681_s4 + $0x18] sm:$0xff]   ;;  %v1325_v13 = vld [vmem:[%s1679_s1 + $0x1a0] sm:$0xff]   ;;  %v1327_v15 = vld [vmem:[%s1679_s1 + $0x1e8] sm:$0xff]  }
  0x1b   :  { %v1326_v14 = vld [vmem:[%s1681_s4 + $0x20] sm:$0xff]   ;;  %v1328_v16 = vld [vmem:[%s1679_s1 + $0x1a8] sm:$0xff]   ;;  %v1330_v19 = vld [vmem:[%s1679_s1 + $0x1f0] sm:$0xff]  }
  0x1c   :  { %1103 = vmatpush3.bf16.msra.mxu1 %v1272_v26  ;;  %v1338_v17 = vld [vmem:[%s1680_s0 + $0x1c] ss:$36 sps:$4 sm:$0xff]   ;;  %v1329_v18 = vld [vmem:[%s1681_s4 + $0x28] sm:$0xff]   ;;  %v1331_v20 = vld [vmem:[%s1679_s1 + $0x1b0] sm:$0xff]  }
  0x1d   :  { %1147 = vmatpush3.bf16.msra.mxu0 %v1273_v27  ;;  %1104 = vmatprep.subr.bf16.mxu1 %v1274_v28  ;;  %v1332_v21 = vld [vmem:[%s1681_s4 + $0x30] sm:$0xff]   ;;  %v1333_v22 = vld [vmem:[%s1679_s1 + $0x1f8] sm:$0xff]   ;;  %v1339_v26 = vld [vmem:[%s1682_s3] sm:$0xff]  }
  0x1e   :  { %1148 = vmatprep.subr.bf16.mxu0 %v1275_v29  ;;  %v1334_v23 = vld [vmem:[%s1679_s1 + $0x1b8] sm:$0xff]  }
  0x1f   :  { %v1335_v24 = vld [vmem:[%s1681_s4 + $0x38] sm:$0xff]  }
  0x20   :  { %1105 = vmatpush3.bf16.msra.mxu1 %v1276_v30  ;;  %v1336_v25 = vld [vmem:[%s1680_s0 + $0x18] ss:$36 sps:$4 sm:$0xff]  }
  0x21   :  { %1149 = vmatpush3.bf16.msra.mxu0 %v1277_v31  ;;  %1112 = vmatprep.subr.bf16.mxu1 %v1281_v34 }
  0x22   :  { %1196 = vmatprep.subr.bf16.mxu0 %v1340_v35 }
  0x23   :  { %696 = vmatmul.mubr.bf16.vlgmr.msra.gmra.mrb[0].mxu1 %v1278_v32 }
  0x24   :  { %1113 = vmatpush3.bf16.msra.mxu1 %v1285_v38  ;;  %778 = vmatmul.mubr.bf16.vlgmr.msra.gmra.mrb[0].mxu0 %v1282_v36 }
  0x25   :  { %1197 = vmatpush3.bf16.msra.mxu0 %v1286_v39  ;;  %1212 = vmatprep.mubr.msk.bf16.mxu0 %vm1341_vm0, %v1340_v35  ;;  %v998_v39 = vld [vmem:[%s1683_s2] ss:$0 sm:$0xff] }
  0x26   :  { %1114 = vmatprep.subr.bf16.mxu1 %v1287_v40  ;;  %1198 = vmatprep.subr.bf16.mxu0 %v1340_v35 }
  0x27   :  { %736 = vmatprep.mubr.bf16.mxu1 %v1310_v59 }
  0x28   :  { %1115 = vmatpush3.bf16.msra.mxu1 %v1288_v41 }
  0x29   :  { %1199 = vmatpush3.bf16.msra.mxu0 %v1289_v42  ;;  %1116 = vmatprep.subr.bf16.mxu1 %v1290_v43 }
  0x2a   :  { %1200 = vmatprep.subr.bf16.mxu0 %v1340_v35 }
  0x2c   :  { %1117 = vmatpush3.bf16.msra.mxu1 %v1291_v44 }
  0x2d   :  { %1201 = vmatpush3.bf16.msra.mxu0 %v1292_v45  ;;  %1118 = vmatprep.subr.bf16.mxu1 %v1293_v46 }
  0x2e   :  { %1202 = vmatprep.subr.bf16.mxu0 %v1340_v35 }
  0x30   :  { %1119 = vmatpush3.bf16.msra.mxu1 %v1294_v47 }
  0x31   :  { %1203 = vmatpush3.bf16.msra.mxu0 %v1295_v48  ;;  %1120 = vmatprep.subr.bf16.mxu1 %v1296_v49 }
  0x32   :  { %1204 = vmatprep.subr.bf16.mxu0 %v1340_v35 }
  0x34   :  { %1121 = vmatpush3.bf16.msra.mxu1 %v1297_v50 }
  0x35   :  { %1205 = vmatpush3.bf16.msra.mxu0 %v1298_v51  ;;  %1122 = vmatprep.subr.bf16.mxu1 %v1299_v52 }
  0x36   :  { %1206 = vmatprep.subr.bf16.mxu0 %v1340_v35 }
  0x38   :  { %1123 = vmatpush3.bf16.msra.mxu1 %v1300_v53 }
  0x39   :  { %1207 = vmatpush3.bf16.msra.mxu0 %v1301_v54  ;;  %1124 = vmatprep.subr.bf16.mxu1 %v1302_v55 }
  0x3a   :  { %1208 = vmatprep.subr.bf16.mxu0 %v1340_v35 }
  0x3c   :  { %1125 = vmatpush3.bf16.msra.mxu1 %v1303_v56 }
  0x3d   :  { %1209 = vmatpush3.bf16.msra.mxu0 %v1304_v57  ;;  %1126 = vmatprep.subr.bf16.mxu1 %v1305_v58  ;;  %v1080_v58 = vld [vmem:[%s1684_s5] ss:$0 sm:$0xff] }
  0x3e   :  { %1210 = vmatprep.subr.bf16.mxu0 %v1340_v35 }
  0x40   :  { %1127 = vmatpush3.bf16.msra.mxu1 %v1306_v60 }
  0x41   :  { %1211 = vmatpush3.bf16.msra.mxu0 %v1307_v61  ;;  %1156 = vmatprep.subr.bf16.mxu1 %v1311_v63 }
  0x42   :  { %1216 = vmatprep.subr.bf16.mxu0 %v1340_v35 }
  0x43   :  { %737 = vmatmul.mubr.bf16.vlgmr.msra.gmra.mrb[4].mxu1 %v1308_v62 }
  0x44   :  { %1157 = vmatpush3.bf16.msra.mxu1 %v1312_v0  ;;  %1213 = vmatmul.mubr.bf16.vlgmr.msra.gmra.mrb[4].mxu0 %v1313_v1 }
  0x45   :  { %1217 = vmatpush3.bf16.msra.mxu0 %v1314_v2  ;;  %1158 = vmatprep.subr.bf16.mxu1 %v1315_v3 }
  0x46   :  { %1218 = vmatprep.subr.bf16.mxu0 %v1340_v35  ;;  %1232 = vmatprep.mubr.msk.bf16.mxu0 %vm1341_vm0, %v1340_v35 }
  0x47   :  { %818 = vmatprep.mubr.bf16.mxu1 %v1338_v17 }
  0x48   :  { %1159 = vmatpush3.bf16.msra.mxu1 %v1316_v4 }
  0x49   :  { %1219 = vmatpush3.bf16.msra.mxu0 %v1317_v5  ;;  %1160 = vmatprep.subr.bf16.mxu1 %v1318_v6 }
  0x4a   :  { %1220 = vmatprep.subr.bf16.mxu0 %v1340_v35 }
  0x4c   :  { %1161 = vmatpush3.bf16.msra.mxu1 %v1319_v7 }
  0x4d   :  { %1221 = vmatpush3.bf16.msra.mxu0 %v1320_v8  ;;  %1162 = vmatprep.subr.bf16.mxu1 %v1321_v9 }
  0x4e   :  { %1222 = vmatprep.subr.bf16.mxu0 %v1340_v35 }
  0x50   :  { %1163 = vmatpush3.bf16.msra.mxu1 %v1322_v10 }
  0x51   :  { %1223 = vmatpush3.bf16.msra.mxu0 %v1323_v11  ;;  %1164 = vmatprep.subr.bf16.mxu1 %v1324_v12 }
  0x52   :  { %1224 = vmatprep.subr.bf16.mxu0 %v1340_v35 }
  0x54   :  { %1165 = vmatpush3.bf16.msra.mxu1 %v1325_v13 }
  0x55   :  { %1225 = vmatpush3.bf16.msra.mxu0 %v1326_v14  ;;  %1166 = vmatprep.subr.bf16.mxu1 %v1327_v15 }
  0x56   :  { %1226 = vmatprep.subr.bf16.mxu0 %v1340_v35 }
  0x58   :  { %1167 = vmatpush3.bf16.msra.mxu1 %v1328_v16 }
  0x59   :  { %1227 = vmatpush3.bf16.msra.mxu0 %v1329_v18  ;;  %1168 = vmatprep.subr.bf16.mxu1 %v1330_v19 }
  0x5a   :  { %1228 = vmatprep.subr.bf16.mxu0 %v1340_v35 }
  0x5c   :  { %1169 = vmatpush3.bf16.msra.mxu1 %v1331_v20 }
  0x5d   :  { %1229 = vmatpush3.bf16.msra.mxu0 %v1332_v21  ;;  %1170 = vmatprep.subr.bf16.mxu1 %v1333_v22 }
  0x5e   :  { %1230 = vmatprep.subr.bf16.mxu0 %v1340_v35 }
  0x60   :  { %1171 = vmatpush3.bf16.msra.mxu1 %v1334_v23 }
  0x61   :  { %1231 = vmatpush3.bf16.msra.mxu0 %v1335_v24 }
  0x63   :  { %819 = vmatmul.mubr.bf16.vlgmr.msra.gmra.mrb[8].mxu1 %v1336_v25 }
  0x64   :  { %1233 = vmatmul.mubr.bf16.vlgmr.msra.gmra.mrb[4].mxu0 %v1339_v26 }
  0xf6   :  { %v1106_v27 = vpop.f32.mrb[0].mxu1 }
  0xf7   :  { %v1107_v28 = vpop.f32.mrb[1].mxu1  ;;  %v1150_v31 = vpop.f32.mrb[0].mxu0 }
  0xf8   :  { %v1108_v29 = vadd.f32 %v1107_v28, %v1106_v27  ;;  %v1109_v30 = vpop.f32.mrb[2].mxu1  ;;  %v1151_v33 = vpop.f32.mrb[1].mxu0 }
  0xf9   :  { %v1110_v32 = vpop.f32.mrb[3].mxu1  ;;  %v1152_v35 = vadd.f32 %v1151_v33, %v1150_v31  ;;  %v1153_v36 = vpop.f32.mrb[2].mxu0 }
  0xfa   :  { %v1111_v34 = vadd.f32 %v1110_v32, %v1109_v30  ;;  %v1154_v37 = vpop.f32.mrb[3].mxu0  ;;  %v698_v42 = vadd.f32 %v1108_v29, %v998_v39 }
  0xfb   :  { %v1155_v38 = vadd.f32 %v1154_v37, %v1153_v36 }
  0xfc   :  { %v701_v46 = vadd.f32 %v1111_v34, %v998_v39 }
 0x116   :  { %v1128_v40 = vpop.f32.mrb[4].mxu1 }
 0x117   :  { %v1129_v41 = vpop.f32.mrb[5].mxu1 }
 0x118   :  { %v1130_v43 = vadd.f32 %v1129_v41, %v1128_v40  ;;  %v1131_v44 = vpop.f32.mrb[6].mxu1 }
 0x119   :  { %v1132_v45 = vpop.f32.mrb[7].mxu1 }
 0x11a   :  { %v739_v47 = vadd.f32 %v1130_v43, %v698_v42  ;;  %v1133_v48 = vadd.f32 %v1132_v45, %v1131_v44 }
 0x11c   :  { %v742_v49 = vadd.f32 %v1133_v48, %v701_v46  ;;  %v780_v50 = vadd.f32 %v1152_v35, %v739_v47 }
 0x11e   :  { %v783_v51 = vadd.f32 %v1155_v38, %v742_v49 }
 0x136   :  { %v1172_v52 = vpop.f32.mrb[8].mxu1 }
 0x137   :  { %v981_v53 = vpop.f32.mrb[4].mxu0  ;;  %v1173_v54 = vpop.f32.mrb[9].mxu1 }
 0x138   :  { %v1174_v55 = vadd.f32 %v1173_v54, %v1172_v52  ;;  %v1234_v56 = vpop.f32.mrb[5].mxu0  ;;  %v1175_v57 = vpop.f32.mrb[10].mxu1 }
 0x139   :  { %v984_v59 = vpop.f32.mrb[6].mxu0  ;;  %v1176_v60 = vpop.f32.mrb[11].mxu1 }
 0x13a   :  { %v821_v61 = vadd.f32 %v1174_v55, %v780_v50  ;;  %v1177_v62 = vadd.f32 %v1176_v60, %v1175_v57  ;;  %v1235_v63 = vpop.f32.mrb[7].mxu0 }
 0x13c   :  { %v1236_v0 = vadd.f32 %v1080_v58, %v821_v61  ;;  %v824_v1 = vadd.f32 %v1177_v62, %v783_v51 }
 0x13e   :  { %v1237_v2 = vadd.f32 %v1236_v0, %v981_v53  ;;  %v1238_v3 = vadd.f32 %v1080_v58, %v824_v1 }
 0x140   :  { %v990_v4 = vmax.f32 %v1237_v2, 0.0  ;;  %v1239_v5 = vadd.f32 %v1238_v3, %v984_v59 }
 0x142   :  { %992 = vst [vmem:[%s1685_s6] sm:$0xff] %v990_v4  ;;  %v991_v6 = vmax.f32 %v1239_v5, 0.0 }
 0x144   :  { %993 = vst [vmem:[%s1685_s6 + $0x8] sm:$0xff] %v991_v6 }

// kernel: resnet_backbone.35
= control target key start
LH: loop header
LB: loop body
LE: loop exit
PB: predicated region body
PF: predicated region fallthrough
CT: control target
= control target key end

     0   :  { %vm1161_vm0 = vmmov 0   ;;  %s1445_s1 = inlined_call_operand.vmem [shape: bf16[1152,128], index: 1, kind: input, shape index: {}]   ;;  %s1446_s0 = inlined_call_operand.vmem [shape: bf16[16,1152], index: 0, kind: input, shape index: {}]   ;;  %s1447_s2 = inlined_call_operand.vmem [shape: f32[1,128], index: 2, kind: input, shape index: {}]   ;;  %s1448_s3 = inlined_call_operand.vmem [shape: f32[16,128], index: 3, kind: input, shape index: {}]   ;;  %s1449_s4 = inlined_call_operand.vmem [shape: f32[16,128], index: 4, kind: output, shape index: {}]  }
   0x1   :  { %v1075_v0 = vld [vmem:[%s1445_s1 + $0x40] sm:$0xff]   ;;  %v1079_v4 = vld [vmem:[%s1445_s1 + $0x48] sm:$0xff]   ;;  %v1083_v8 = vld [vmem:[%s1445_s1 + $0x50] sm:$0xff]  }
   0x2   :  { %v1076_v1 = vld [vmem:[%s1445_s1] sm:$0xff]   ;;  %956 = vmatprep.subr.bf16.mxu0 %v1075_v0  ;;  %v1080_v5 = vld [vmem:[%s1445_s1 + $0x8] sm:$0xff]   ;;  %v1084_v9 = vld [vmem:[%s1445_s1 + $0x10] sm:$0xff]  }
   0x3   :  { %v1077_v2 = vld [vmem:[%s1445_s1 + $0xc0] sm:$0xff]   ;;  %957 = vmatpush3.bf16.msra.mxu0 %v1076_v1  ;;  %v1081_v6 = vld [vmem:[%s1445_s1 + $0xc8] sm:$0xff]   ;;  %v1085_v10 = vld [vmem:[%s1445_s1 + $0xd0] sm:$0xff]  }
   0x4   :  { %v1078_v3 = vld [vmem:[%s1445_s1 + $0x80] sm:$0xff]   ;;  %978 = vmatprep.subr.bf16.mxu1 %v1077_v2  ;;  %958 = vmatprep.subr.bf16.mxu0 %v1079_v4  ;;  %v1082_v7 = vld [vmem:[%s1445_s1 + $0x88] sm:$0xff]   ;;  %v1086_v11 = vld [vmem:[%s1445_s1 + $0x90] sm:$0xff]  }
   0x5   :  { %979 = vmatpush3.bf16.msra.mxu1 %v1078_v3  ;;  %v1087_v12 = vld [vmem:[%s1445_s1 + $0x58] sm:$0xff]   ;;  %v1091_v16 = vld [vmem:[%s1445_s1 + $0x60] sm:$0xff]   ;;  %v1095_v20 = vld [vmem:[%s1445_s1 + $0x68] sm:$0xff]  }
   0x6   :  { %980 = vmatprep.subr.bf16.mxu1 %v1081_v6  ;;  %v1088_v13 = vld [vmem:[%s1445_s1 + $0x18] sm:$0xff]   ;;  %v1092_v17 = vld [vmem:[%s1445_s1 + $0x20] sm:$0xff]   ;;  %v1096_v21 = vld [vmem:[%s1445_s1 + $0x28] sm:$0xff]   ;;  %v1160_v6 = vmov 0.0  }
   0x7   :  { %959 = vmatpush3.bf16.msra.mxu0 %v1080_v5  ;;  %v1089_v14 = vld [vmem:[%s1445_s1 + $0xd8] sm:$0xff]   ;;  %v1093_v18 = vld [vmem:[%s1445_s1 + $0xe0] sm:$0xff]   ;;  %v1097_v22 = vld [vmem:[%s1445_s1 + $0xe8] sm:$0xff]  }
   0x8   :  { %960 = vmatprep.subr.bf16.mxu0 %v1083_v8  ;;  %v1090_v15 = vld [vmem:[%s1445_s1 + $0x98] sm:$0xff]   ;;  %v1094_v19 = vld [vmem:[%s1445_s1 + $0xa0] sm:$0xff]   ;;  %v1098_v23 = vld [vmem:[%s1445_s1 + $0xa8] sm:$0xff]  }
   0x9   :  { %981 = vmatpush3.bf16.msra.mxu1 %v1082_v7  ;;  %v1099_v24 = vld [vmem:[%s1445_s1 + $0x70] sm:$0xff]   ;;  %v1103_v28 = vld [vmem:[%s1445_s1 + $0x78] sm:$0xff]   ;;  %v1106_v31 = vld [vmem:[%s1446_s0] ss:$36 sps:$4 sm:$0xff]  }
   0xa   :  { %982 = vmatprep.subr.bf16.mxu1 %v1085_v10  ;;  %v1100_v25 = vld [vmem:[%s1445_s1 + $0x30] sm:$0xff]   ;;  %v1104_v29 = vld [vmem:[%s1445_s1 + $0x38] sm:$0xff]   ;;  %v1108_v32 = vld [vmem:[%s1446_s0 + $0x4] ss:$36 sps:$4 sm:$0xff]  }
   0xb   :  { %961 = vmatpush3.bf16.msra.mxu0 %v1084_v9  ;;  %v1101_v26 = vld [vmem:[%s1445_s1 + $0xf0] sm:$0xff]   ;;  %v1105_v30 = vld [vmem:[%s1445_s1 + $0xf8] sm:$0xff]   ;;  %689 = vmatprep.mubr.bf16.mxu0 %v1108_v32  ;;  %v1110_v34 = vld [vmem:[%s1445_s1 + $0x140] sm:$0xff]  }
   0xc   :  { %962 = vmatprep.subr.bf16.mxu0 %v1087_v12  ;;  %v1102_v27 = vld [vmem:[%s1445_s1 + $0xb0] sm:$0xff]   ;;  %v1109_v33 = vld [vmem:[%s1445_s1 + $0xb8] sm:$0xff]   ;;  %v1111_v35 = vld [vmem:[%s1446_s0 + $0x8] ss:$36 sps:$4 sm:$0xff]  }
   0xd   :  { %983 = vmatpush3.bf16.msra.mxu1 %v1086_v11  ;;  %v1113_v36 = vld [vmem:[%s1446_s0 + $0xc] ss:$36 sps:$4 sm:$0xff]   ;;  %v1114_v37 = vld [vmem:[%s1445_s1 + $0x100] sm:$0xff]   ;;  %v1125_v48 = vld [vmem:[%s1445_s1 + $0x158] sm:$0xff]  }
   0xe   :  { %984 = vmatprep.subr.bf16.mxu1 %v1089_v14  ;;  %730 = vmatprep.mubr.bf16.mxu1 %v1113_v36  ;;  %v1115_v38 = vld [vmem:[%s1445_s1 + $0x1c0] sm:$0xff]   ;;  %v1117_v40 = vld [vmem:[%s1445_s1 + $0x148] sm:$0xff]   ;;  %v1121_v44 = vld [vmem:[%s1445_s1 + $0x150] sm:$0xff]  }
   0xf   :  { %963 = vmatpush3.bf16.msra.mxu0 %v1088_v13  ;;  %v1116_v39 = vld [vmem:[%s1445_s1 + $0x180] sm:$0xff]   ;;  %v1118_v41 = vld [vmem:[%s1445_s1 + $0x108] sm:$0xff]   ;;  %v1122_v45 = vld [vmem:[%s1445_s1 + $0x110] sm:$0xff]  }
  0x10   :  { %964 = vmatprep.subr.bf16.mxu0 %v1091_v16  ;;  %v1119_v42 = vld [vmem:[%s1445_s1 + $0x1c8] sm:$0xff]   ;;  %v1123_v46 = vld [vmem:[%s1445_s1 + $0x1d0] sm:$0xff]   ;;  %v1126_v49 = vld [vmem:[%s1445_s1 + $0x118] sm:$0xff]  }
  0x11   :  { %985 = vmatpush3.bf16.msra.mxu1 %v1090_v15  ;;  %v1120_v43 = vld [vmem:[%s1445_s1 + $0x188] sm:$0xff]   ;;  %v1124_v47 = vld [vmem:[%s1445_s1 + $0x190] sm:$0xff]   ;;  %v1127_v50 = vld [vmem:[%s1445_s1 + $0x1d8] sm:$0xff]  }
  0x12   :  { %986 = vmatprep.subr.bf16.mxu1 %v1093_v18  ;;  %v1128_v51 = vld [vmem:[%s1445_s1 + $0x198] sm:$0xff]   ;;  %v1129_v52 = vld [vmem:[%s1445_s1 + $0x160] sm:$0xff]   ;;  %v1133_v56 = vld [vmem:[%s1445_s1 + $0x168] sm:$0xff]  }
  0x13   :  { %965 = vmatpush3.bf16.msra.mxu0 %v1092_v17  ;;  %v1130_v53 = vld [vmem:[%s1445_s1 + $0x120] sm:$0xff]   ;;  %v1134_v57 = vld [vmem:[%s1445_s1 + $0x128] sm:$0xff]   ;;  %v1137_v60 = vld [vmem:[%s1445_s1 + $0x170] sm:$0xff]  }
  0x14   :  { %966 = vmatprep.subr.bf16.mxu0 %v1095_v20  ;;  %v1131_v54 = vld [vmem:[%s1445_s1 + $0x1e0] sm:$0xff]   ;;  %v1135_v58 = vld [vmem:[%s1445_s1 + $0x1e8] sm:$0xff]   ;;  %v1138_v61 = vld [vmem:[%s1445_s1 + $0x130] sm:$0xff]  }
  0x15   :  { %987 = vmatpush3.bf16.msra.mxu1 %v1094_v19  ;;  %v1132_v55 = vld [vmem:[%s1445_s1 + $0x1a0] sm:$0xff]   ;;  %v1136_v59 = vld [vmem:[%s1445_s1 + $0x1a8] sm:$0xff]   ;;  %v1139_v62 = vld [vmem:[%s1445_s1 + $0x1f0] sm:$0xff]  }
  0x16   :  { %988 = vmatprep.subr.bf16.mxu1 %v1097_v22  ;;  %v1140_v63 = vld [vmem:[%s1445_s1 + $0x1b0] sm:$0xff]   ;;  %v1141_v0 = vld [vmem:[%s1445_s1 + $0x178] sm:$0xff]   ;;  %v1151_v9 = vld [vmem:[%s1445_s1 + $0x200] sm:$0xff]  }
  0x17   :  { %967 = vmatpush3.bf16.msra.mxu0 %v1096_v21  ;;  %v1142_v1 = vld [vmem:[%s1445_s1 + $0x138] sm:$0xff]   ;;  %v1144_v3 = vld [vmem:[%s1446_s0 + $0x10] ss:$36 sps:$4 sm:$0xff]   ;;  %v1152_v10 = vld [vmem:[%s1445_s1 + $0x208] sm:$0xff]  }
  0x18   :  { %968 = vmatprep.subr.bf16.mxu0 %v1099_v24  ;;  %v1143_v2 = vld [vmem:[%s1445_s1 + $0x1f8] sm:$0xff]   ;;  %v1153_v11 = vld [vmem:[%s1445_s1 + $0x210] sm:$0xff]   ;;  %v1155_v13 = vld [vmem:[%s1445_s1 + $0x220] sm:$0xff]  }
  0x19   :  { %989 = vmatpush3.bf16.msra.mxu1 %v1098_v23  ;;  %v1146_v4 = vld [vmem:[%s1446_s0 + $0x14] ss:$36 sps:$4 sm:$0xff]   ;;  %v1150_v8 = vld [vmem:[%s1446_s0 + $0x1c] ss:$36 sps:$4 sm:$0xff]   ;;  %v1156_v14 = vld [vmem:[%s1445_s1 + $0x228] sm:$0xff]  }
  0x1a   :  { %990 = vmatprep.subr.bf16.mxu1 %v1101_v26  ;;  %v1147_v5 = vld [vmem:[%s1445_s1 + $0x1b8] sm:$0xff]   ;;  %v1157_v15 = vld [vmem:[%s1445_s1 + $0x230] sm:$0xff]   ;;  %v1159_v17 = vld [vmem:[%s1446_s0 + $0x20] ss:$36 sps:$4 sm:$0xff]  }
  0x1b   :  { %969 = vmatpush3.bf16.msra.mxu0 %v1100_v25  ;;  %v1148_v7 = vld [vmem:[%s1446_s0 + $0x18] ss:$36 sps:$4 sm:$0xff]   ;;  %v874_v19 = vld [vmem:[%s1447_s2] ss:$0 sm:$0xff] }
  0x1c   :  { %970 = vmatprep.subr.bf16.mxu0 %v1103_v28  ;;  %v1154_v12 = vld [vmem:[%s1445_s1 + $0x218] sm:$0xff]  }
  0x1d   :  { %991 = vmatpush3.bf16.msra.mxu1 %v1102_v27  ;;  %v1158_v16 = vld [vmem:[%s1445_s1 + $0x238] sm:$0xff]  }
  0x1e   :  { %992 = vmatprep.subr.bf16.mxu1 %v1105_v30 }
  0x1f   :  { %971 = vmatpush3.bf16.msra.mxu0 %v1104_v29 }
  0x20   :  { %1000 = vmatprep.subr.bf16.mxu0 %v1110_v34 }
  0x21   :  { %993 = vmatpush3.bf16.msra.mxu1 %v1109_v33 }
  0x22   :  { %690 = vmatmul.mubr.bf16.vlgmr.msra.gmra.mrb[0].mxu0 %v1106_v31  ;;  %1022 = vmatprep.subr.bf16.mxu1 %v1115_v38 }
  0x23   :  { %1001 = vmatpush3.bf16.msra.mxu0 %v1114_v37  ;;  %771 = vmatprep.mubr.bf16.mxu0 %v1146_v4 }
  0x24   :  { %731 = vmatmul.mubr.bf16.vlgmr.msra.gmra.mrb[0].mxu1 %v1111_v35  ;;  %1002 = vmatprep.subr.bf16.mxu0 %v1117_v40 }
  0x25   :  { %1023 = vmatpush3.bf16.msra.mxu1 %v1116_v39  ;;  %812 = vmatprep.mubr.bf16.mxu1 %v1150_v8 }
  0x26   :  { %1024 = vmatprep.subr.bf16.mxu1 %v1119_v42 }
  0x27   :  { %1003 = vmatpush3.bf16.msra.mxu0 %v1118_v41 }
  0x28   :  { %1004 = vmatprep.subr.bf16.mxu0 %v1121_v44 }
  0x29   :  { %1025 = vmatpush3.bf16.msra.mxu1 %v1120_v43 }
  0x2a   :  { %1026 = vmatprep.subr.bf16.mxu1 %v1123_v46 }
  0x2b   :  { %1005 = vmatpush3.bf16.msra.mxu0 %v1122_v45 }
  0x2c   :  { %1006 = vmatprep.subr.bf16.mxu0 %v1125_v48 }
  0x2d   :  { %1027 = vmatpush3.bf16.msra.mxu1 %v1124_v47 }
  0x2e   :  { %1028 = vmatprep.subr.bf16.mxu1 %v1127_v50 }
  0x2f   :  { %1007 = vmatpush3.bf16.msra.mxu0 %v1126_v49 }
  0x30   :  { %1008 = vmatprep.subr.bf16.mxu0 %v1129_v52  ;;  %v862_v52 = vld [vmem:[%s1448_s3] sm:$0xff] }
  0x31   :  { %1029 = vmatpush3.bf16.msra.mxu1 %v1128_v51 }
  0x32   :  { %1030 = vmatprep.subr.bf16.mxu1 %v1131_v54 }
  0x33   :  { %1009 = vmatpush3.bf16.msra.mxu0 %v1130_v53 }
  0x34   :  { %1010 = vmatprep.subr.bf16.mxu0 %v1133_v56  ;;  %v863_v56 = vld [vmem:[%s1448_s3 + $0x8] sm:$0xff] }
  0x35   :  { %1031 = vmatpush3.bf16.msra.mxu1 %v1132_v55 }
  0x36   :  { %1032 = vmatprep.subr.bf16.mxu1 %v1135_v58 }
  0x37   :  { %1011 = vmatpush3.bf16.msra.mxu0 %v1134_v57 }
  0x38   :  { %1012 = vmatprep.subr.bf16.mxu0 %v1137_v60 }
  0x39   :  { %1033 = vmatpush3.bf16.msra.mxu1 %v1136_v59 }
  0x3a   :  { %1034 = vmatprep.subr.bf16.mxu1 %v1139_v62 }
  0x3b   :  { %1013 = vmatpush3.bf16.msra.mxu0 %v1138_v61 }
  0x3c   :  { %1014 = vmatprep.subr.bf16.mxu0 %v1141_v0 }
  0x3d   :  { %1035 = vmatpush3.bf16.msra.mxu1 %v1140_v63 }
  0x3e   :  { %1036 = vmatprep.subr.bf16.mxu1 %v1143_v2 }
  0x3f   :  { %1015 = vmatpush3.bf16.msra.mxu0 %v1142_v1 }
  0x40   :  { %1053 = vmatprep.subr.bf16.mxu0 %v1160_v6 }
  0x41   :  { %1037 = vmatpush3.bf16.msra.mxu1 %v1147_v5 }
  0x42   :  { %772 = vmatmul.mubr.bf16.vlgmr.msra.gmra.mrb[4].mxu0 %v1144_v3 }
  0x43   :  { %1069 = vmatprep.mubr.msk.bf16.mxu0 %vm1161_vm0, %v1160_v6  ;;  %1054 = vmatpush3.bf16.msra.mxu0 %v1151_v9 }
  0x44   :  { %813 = vmatmul.mubr.bf16.vlgmr.msra.gmra.mrb[4].mxu1 %v1148_v7  ;;  %1055 = vmatprep.subr.bf16.mxu0 %v1160_v6 }
  0x47   :  { %1056 = vmatpush3.bf16.msra.mxu0 %v1152_v10 }
  0x48   :  { %1057 = vmatprep.subr.bf16.mxu0 %v1160_v6 }
  0x4b   :  { %1058 = vmatpush3.bf16.msra.mxu0 %v1153_v11 }
  0x4c   :  { %1059 = vmatprep.subr.bf16.mxu0 %v1160_v6 }
  0x4f   :  { %1060 = vmatpush3.bf16.msra.mxu0 %v1154_v12 }
  0x50   :  { %1061 = vmatprep.subr.bf16.mxu0 %v1160_v6 }
  0x53   :  { %1062 = vmatpush3.bf16.msra.mxu0 %v1155_v13 }
  0x54   :  { %1063 = vmatprep.subr.bf16.mxu0 %v1160_v6 }
  0x57   :  { %1064 = vmatpush3.bf16.msra.mxu0 %v1156_v14 }
  0x58   :  { %1065 = vmatprep.subr.bf16.mxu0 %v1160_v6 }
  0x5b   :  { %1066 = vmatpush3.bf16.msra.mxu0 %v1157_v15 }
  0x5c   :  { %1067 = vmatprep.subr.bf16.mxu0 %v1160_v6 }
  0x5f   :  { %1068 = vmatpush3.bf16.msra.mxu0 %v1158_v16 }
  0x62   :  { %1070 = vmatmul.mubr.bf16.vlgmr.msra.gmra.mrb[8].mxu0 %v1159_v17 }
  0xf5   :  { %v972_v18 = vpop.f32.mrb[0].mxu0 }
  0xf6   :  { %v973_v20 = vpop.f32.mrb[1].mxu0 }
  0xf7   :  { %v974_v21 = vadd.f32 %v973_v20, %v972_v18  ;;  %v975_v22 = vpop.f32.mrb[2].mxu0  ;;  %v994_v23 = vpop.f32.mrb[0].mxu1 }
  0xf8   :  { %v976_v24 = vpop.f32.mrb[3].mxu0  ;;  %v995_v27 = vpop.f32.mrb[1].mxu1 }
  0xf9   :  { %v692_v25 = vadd.f32 %v974_v21, %v874_v19  ;;  %v977_v26 = vadd.f32 %v976_v24, %v975_v22  ;;  %v996_v28 = vadd.f32 %v995_v27, %v994_v23  ;;  %v997_v29 = vpop.f32.mrb[2].mxu1 }
  0xfa   :  { %v998_v31 = vpop.f32.mrb[3].mxu1 }
  0xfb   :  { %v695_v30 = vadd.f32 %v977_v26, %v874_v19  ;;  %v733_v32 = vadd.f32 %v996_v28, %v692_v25  ;;  %v999_v33 = vadd.f32 %v998_v31, %v997_v29 }
  0xfd   :  { %v736_v34 = vadd.f32 %v999_v33, %v695_v30 }
 0x115   :  { %v1016_v35 = vpop.f32.mrb[4].mxu0 }
 0x116   :  { %v1017_v36 = vpop.f32.mrb[5].mxu0 }
 0x117   :  { %v1018_v37 = vadd.f32 %v1017_v36, %v1016_v35  ;;  %v1019_v38 = vpop.f32.mrb[6].mxu0  ;;  %v1038_v39 = vpop.f32.mrb[4].mxu1 }
 0x118   :  { %v1020_v40 = vpop.f32.mrb[7].mxu0  ;;  %v1039_v43 = vpop.f32.mrb[5].mxu1 }
 0x119   :  { %v774_v41 = vadd.f32 %v1018_v37, %v733_v32  ;;  %v1021_v42 = vadd.f32 %v1020_v40, %v1019_v38  ;;  %v1040_v44 = vadd.f32 %v1039_v43, %v1038_v39  ;;  %v1041_v45 = vpop.f32.mrb[6].mxu1 }
 0x11a   :  { %v1042_v47 = vpop.f32.mrb[7].mxu1 }
 0x11b   :  { %v777_v46 = vadd.f32 %v1021_v42, %v736_v34  ;;  %v1043_v48 = vadd.f32 %v1042_v47, %v1041_v45  ;;  %v815_v49 = vadd.f32 %v1040_v44, %v774_v41 }
 0x11d   :  { %v818_v50 = vadd.f32 %v1043_v48, %v777_v46 }
 0x135   :  { %v855_v51 = vpop.f32.mrb[8].mxu0 }
 0x136   :  { %v856_v53 = vadd.f32 %v855_v51, %v815_v49  ;;  %v1071_v54 = vpop.f32.mrb[9].mxu0 }
 0x137   :  { %v858_v55 = vpop.f32.mrb[10].mxu0 }
 0x138   :  { %v864_v57 = vadd.f32 %v862_v52, %v856_v53  ;;  %v859_v58 = vadd.f32 %v858_v55, %v818_v50  ;;  %v1072_v59 = vpop.f32.mrb[11].mxu0 }
 0x13a   :  { %v866_v60 = vmax.f32 %v864_v57, 0.0  ;;  %v865_v61 = vadd.f32 %v863_v56, %v859_v58 }
 0x13c   :  { %868 = vst [vmem:[%s1449_s4] sm:$0xff] %v866_v60  ;;  %v867_v62 = vmax.f32 %v865_v61, 0.0 }
 0x13e   :  { %869 = vst [vmem:[%s1449_s4 + $0x8] sm:$0xff] %v867_v62 }

</bundles_post_ra>
